<compile_context>
chip_gen: v6e
topology: v6e:2x2x1
jax: 0.10.0
libtpu: 0.0.40
codegen_flags: <defaults>
</compile_context>

<pallas_src>
import jax
import jax.numpy as jnp
from jax.experimental import pallas as pl
from jax.experimental.pallas import tpu as pltpu


def _round_up(x, m):
    return (x + m - 1) // m * m


def mlp_kernel(x_ref,
               w1, b1, w2, b2, w3, b3, w4, b4, w5, b5, w6, b6,
               logits_ref, feat_ref):
    """Fused forward: relu(linear) x5 -> features, then final linear -> logits."""

    def linear(h, w_ref, b_ref):
        # bf16 x bf16 MXU matmul, f32 accumulation; bias-add stays in f32.
        y = jnp.dot(h.astype(w_ref.dtype), w_ref[...],
                    preferred_element_type=jnp.float32)
        return y + b_ref[...]           # (1, out) bias broadcasts over batch

    h = x_ref[...]                      # already f32 (no redundant cast)
    h = jnp.maximum(linear(h, w1, b1), 0.0)   # fc1 + relu (dropout1 = identity)
    h = jnp.maximum(linear(h, w2, b2), 0.0)   # fc2 + relu (dropout2 = identity)
    h = jnp.maximum(linear(h, w3, b3), 0.0)   # fc3 + relu (dropout3 = identity)
    h = jnp.maximum(linear(h, w4, b4), 0.0)   # fc4 + relu (dropout4 = identity)
    h = jnp.maximum(linear(h, w5, b5), 0.0)   # fc5 + relu (dropout5 = identity)

    feat_ref[...] = h.astype(feat_ref.dtype)
    logits_ref[...] = linear(h, w6, b6).astype(logits_ref.dtype)


def init_params(key, data_dim, num_classes):
    """Deterministic PyTorch-style init: U(-1/sqrt(fan_in), 1/sqrt(fan_in)).

    Weights stored (in_features, out_features), i.e. transposed vs. torch.
    """
    dims = [(data_dim, 100), (100, 1000), (1000, 1000),
            (1000, 100), (100, 100), (100, num_classes)]
    params = []
    for (fan_in, fan_out) in dims:
        key, kw, kb = jax.random.split(key, 3)
        bound = 1.0 / jnp.sqrt(float(fan_in))
        w = jax.random.uniform(kw, (fan_in, fan_out), jnp.float32,
                               minval=-bound, maxval=bound)
        b = jax.random.uniform(kb, (fan_out,), jnp.float32,
                               minval=-bound, maxval=bound)
        params.append((w, b))
    return params


def prepare_params(params, weight_dtype=jnp.bfloat16):
    """One-time host-side prep: zero-pad feature dims to 128 and cast W->bf16."""
    padded = []
    for w, b in params:
        fi, fo = w.shape
        fi_p, fo_p = _round_up(fi, 128), _round_up(fo, 128)
        w_p = jnp.zeros((fi_p, fo_p), weight_dtype)
        w_p = w_p.at[:fi, :fo].set(w.astype(weight_dtype))
        b_p = jnp.zeros((1, fo_p), jnp.float32)
        b_p = b_p.at[0, :fo].set(b.astype(jnp.float32))
        padded.append((w_p, b_p))
    return padded


def mlp_forward(x, padded_params, num_classes, feat_dim=100, tm=256):
    """x: (N, data_dim) f32; padded_params: list of (W_pad bf16, b_pad f32)."""
    n, d = x.shape
    d_pad = padded_params[0][0].shape[0]
    feat_pad = padded_params[-2][0].shape[1]
    out_pad = padded_params[-1][0].shape[1]

    # Batch tile: big enough to feed the MXU, but no bigger than the (padded)
    # batch itself for tiny serving batches.
    tm_eff = min(tm, _round_up(n, 8))
    n_pad = _round_up(n, tm_eff)

    x_p = jnp.zeros((n_pad, d_pad), jnp.float32)
    x_p = x_p.at[:n, :d].set(x.astype(jnp.float32))

    flat_params = []
    param_specs = []
    for w, b in padded_params:
        flat_params.extend([w, b])
        # Constant index_map -> weights/biases stay VMEM-resident over the grid.
        param_specs.append(pl.BlockSpec(w.shape, lambda i: (0, 0)))
        param_specs.append(pl.BlockSpec(b.shape, lambda i: (0, 0)))

    x_spec = pl.BlockSpec((tm_eff, d_pad), lambda i: (i, 0))
    out_specs = (
        pl.BlockSpec((tm_eff, out_pad), lambda i: (i, 0)),
        pl.BlockSpec((tm_eff, feat_pad), lambda i: (i, 0)),
    )
    out_shapes = (
        jax.ShapeDtypeStruct((n_pad, out_pad), jnp.float32),
        jax.ShapeDtypeStruct((n_pad, feat_pad), jnp.float32),
    )

    logits_p, feat_p = pl.pallas_call(
        mlp_kernel,
        out_shape=out_shapes,
        grid=(n_pad // tm_eff,),
        in_specs=[x_spec] + param_specs,
        out_specs=out_specs,
        compiler_params=pltpu.CompilerParams(
            dimension_semantics=("parallel",),   # megacore sharding on v7x
            vmem_limit_bytes=32 << 20),
    )(x_p, *flat_params)

    return logits_p[:n, :num_classes], feat_p[:n, :feat_dim]


def reference_forward(x, params, weight_dtype=jnp.bfloat16):
    """Plain-JAX reference mirroring the kernel's bf16-weight eval forward."""
    h = x.astype(jnp.float32)
    qparams = [(w.astype(weight_dtype), b) for w, b in params]
    for (w, b) in qparams[:-1]:
        y = jnp.dot(h.astype(weight_dtype), w,
                    preferred_element_type=jnp.float32) + b[None, :]
        h = jnp.maximum(y, 0.0)
    feat = h
    w6, b6 = qparams[-1]
    logits = jnp.dot(feat.astype(weight_dtype), w6,
                     preferred_element_type=jnp.float32) + b6[None, :]
    return logits, feat


if __name__ == "__main__":
    data_dim = 32
    num_classes = 10
    batch = 2

    key = jax.random.PRNGKey(0)
    key, kx = jax.random.split(key)
    x = jax.random.normal(kx, (batch, data_dim), jnp.float32)

    params = init_params(key, data_dim, num_classes)
    padded_params = prepare_params(params)

    logits, features = jax.block_until_ready(
        mlp_forward(x, padded_params, num_classes))

    ref_logits, ref_features = reference_forward(x, params)

    assert logits.shape == (batch, num_classes)
    assert features.shape == (batch, 100)
    assert jnp.allclose(logits, ref_logits, atol=2e-3, rtol=2e-3)
    assert jnp.allclose(features, ref_features, atol=2e-3, rtol=2e-3)

    print("KERNEL_OK")
</pallas_src>

<mosaic_0001>
module attributes {stable_mosaic.version = 11 : i64} {
  func.func @mlp_kernel(%arg0: i32, %arg1: memref<8x128xf32, #tpu.memory_space<vmem>>, %arg2: memref<128x128xbf16, #tpu.memory_space<vmem>>, %arg3: memref<1x128xf32, #tpu.memory_space<vmem>>, %arg4: memref<128x1024xbf16, #tpu.memory_space<vmem>>, %arg5: memref<1x1024xf32, #tpu.memory_space<vmem>>, %arg6: memref<1024x1024xbf16, #tpu.memory_space<vmem>>, %arg7: memref<1x1024xf32, #tpu.memory_space<vmem>>, %arg8: memref<1024x128xbf16, #tpu.memory_space<vmem>>, %arg9: memref<1x128xf32, #tpu.memory_space<vmem>>, %arg10: memref<128x128xbf16, #tpu.memory_space<vmem>>, %arg11: memref<1x128xf32, #tpu.memory_space<vmem>>, %arg12: memref<128x128xbf16, #tpu.memory_space<vmem>>, %arg13: memref<1x128xf32, #tpu.memory_space<vmem>>, %arg14: memref<8x128xf32, #tpu.memory_space<vmem>>, %arg15: memref<8x128xf32, #tpu.memory_space<vmem>>) attributes {dimension_semantics = [#tpu.dimension_semantics<parallel>], iteration_bounds = array<i64: 1>, scalar_prefetch = 0 : i64, scratch_operands = 0 : i64, tpu.core_type = #tpu.core_type<tc>, window_params = [{transform_indices = @transform_0, window_bounds = array<i64: 8, 128>}, {pipeline_mode = #tpu.pipeline_mode<synchronous>, transform_indices = @transform_1, window_bounds = array<i64: 128, 128>}, {pipeline_mode = #tpu.pipeline_mode<synchronous>, transform_indices = @transform_2, window_bounds = array<i64: 1, 128>}, {pipeline_mode = #tpu.pipeline_mode<synchronous>, transform_indices = @transform_3, window_bounds = array<i64: 128, 1024>}, {pipeline_mode = #tpu.pipeline_mode<synchronous>, transform_indices = @transform_4, window_bounds = array<i64: 1, 1024>}, {pipeline_mode = #tpu.pipeline_mode<synchronous>, transform_indices = @transform_5, window_bounds = array<i64: 1024, 1024>}, {pipeline_mode = #tpu.pipeline_mode<synchronous>, transform_indices = @transform_6, window_bounds = array<i64: 1, 1024>}, {pipeline_mode = #tpu.pipeline_mode<synchronous>, transform_indices = @transform_7, window_bounds = array<i64: 1024, 128>}, {pipeline_mode = #tpu.pipeline_mode<synchronous>, transform_indices = @transform_8, window_bounds = array<i64: 1, 128>}, {pipeline_mode = #tpu.pipeline_mode<synchronous>, transform_indices = @transform_9, window_bounds = array<i64: 128, 128>}, {pipeline_mode = #tpu.pipeline_mode<synchronous>, transform_indices = @transform_10, window_bounds = array<i64: 1, 128>}, {pipeline_mode = #tpu.pipeline_mode<synchronous>, transform_indices = @transform_11, window_bounds = array<i64: 128, 128>}, {pipeline_mode = #tpu.pipeline_mode<synchronous>, transform_indices = @transform_12, window_bounds = array<i64: 1, 128>}, {transform_indices = @transform_13, window_bounds = array<i64: 8, 128>}, {transform_indices = @transform_14, window_bounds = array<i64: 8, 128>}]} {
    %c0 = arith.constant 0 : index
    %c0_0 = arith.constant 0 : index
    %0 = vector.load %arg1[%c0, %c0_0] : memref<8x128xf32, #tpu.memory_space<vmem>>, vector<8x128xf32>
    %1 = arith.truncf %0 : vector<8x128xf32> to vector<8x128xbf16>
    %c0_1 = arith.constant 0 : index
    %c0_2 = arith.constant 0 : index
    %2 = vector.load %arg2[%c0_1, %c0_2] : memref<128x128xbf16, #tpu.memory_space<vmem>>, vector<128x128xbf16>
    %cst = arith.constant dense<0.000000e+00> : vector<8x128xf32>
    %3 = tpu.matmul %1, %2, %cst {dimension_numbers = #tpu.dot_dimension_numbers<[1], [0], [0], [1], [0, 0, 1, 1], [], []>} : vector<8x128xbf16>, vector<128x128xbf16>, vector<8x128xf32> -> vector<8x128xf32>
    %c0_3 = arith.constant 0 : index
    %c0_4 = arith.constant 0 : index
    %4 = vector.load %arg3[%c0_3, %c0_4] : memref<1x128xf32, #tpu.memory_space<vmem>>, vector<1x128xf32>
    %5 = vector.broadcast %4 : vector<1x128xf32> to vector<8x128xf32>
    %6 = arith.addf %3, %5 : vector<8x128xf32>
    %cst_5 = arith.constant 0.000000e+00 : f32
    %7 = vector.broadcast %cst_5 : f32 to vector<8x128xf32>
    %8 = arith.maximumf %6, %7 : vector<8x128xf32>
    %9 = arith.truncf %8 : vector<8x128xf32> to vector<8x128xbf16>
    %c0_6 = arith.constant 0 : index
    %c0_7 = arith.constant 0 : index
    %10 = vector.load %arg4[%c0_6, %c0_7] : memref<128x1024xbf16, #tpu.memory_space<vmem>>, vector<128x1024xbf16>
    %cst_8 = arith.constant dense<0.000000e+00> : vector<8x1024xf32>
    %11 = tpu.matmul %9, %10, %cst_8 {dimension_numbers = #tpu.dot_dimension_numbers<[1], [0], [0], [1], [0, 0, 1, 1], [], []>} : vector<8x128xbf16>, vector<128x1024xbf16>, vector<8x1024xf32> -> vector<8x1024xf32>
    %c0_9 = arith.constant 0 : index
    %c0_10 = arith.constant 0 : index
    %12 = vector.load %arg5[%c0_9, %c0_10] : memref<1x1024xf32, #tpu.memory_space<vmem>>, vector<1x1024xf32>
    %13 = vector.broadcast %12 : vector<1x1024xf32> to vector<8x1024xf32>
    %14 = arith.addf %11, %13 : vector<8x1024xf32>
    %cst_11 = arith.constant 0.000000e+00 : f32
    %15 = vector.broadcast %cst_11 : f32 to vector<8x1024xf32>
    %16 = arith.maximumf %14, %15 : vector<8x1024xf32>
    %17 = arith.truncf %16 : vector<8x1024xf32> to vector<8x1024xbf16>
    %c0_12 = arith.constant 0 : index
    %c0_13 = arith.constant 0 : index
    %18 = vector.load %arg6[%c0_12, %c0_13] : memref<1024x1024xbf16, #tpu.memory_space<vmem>>, vector<1024x1024xbf16>
    %cst_14 = arith.constant dense<0.000000e+00> : vector<8x1024xf32>
    %19 = tpu.matmul %17, %18, %cst_14 {dimension_numbers = #tpu.dot_dimension_numbers<[1], [0], [0], [1], [0, 0, 1, 1], [], []>} : vector<8x1024xbf16>, vector<1024x1024xbf16>, vector<8x1024xf32> -> vector<8x1024xf32>
    %c0_15 = arith.constant 0 : index
    %c0_16 = arith.constant 0 : index
    %20 = vector.load %arg7[%c0_15, %c0_16] : memref<1x1024xf32, #tpu.memory_space<vmem>>, vector<1x1024xf32>
    %21 = vector.broadcast %20 : vector<1x1024xf32> to vector<8x1024xf32>
    %22 = arith.addf %19, %21 : vector<8x1024xf32>
    %cst_17 = arith.constant 0.000000e+00 : f32
    %23 = vector.broadcast %cst_17 : f32 to vector<8x1024xf32>
    %24 = arith.maximumf %22, %23 : vector<8x1024xf32>
    %25 = arith.truncf %24 : vector<8x1024xf32> to vector<8x1024xbf16>
    %c0_18 = arith.constant 0 : index
    %c0_19 = arith.constant 0 : index
    %26 = vector.load %arg8[%c0_18, %c0_19] : memref<1024x128xbf16, #tpu.memory_space<vmem>>, vector<1024x128xbf16>
    %cst_20 = arith.constant dense<0.000000e+00> : vector<8x128xf32>
    %27 = tpu.matmul %25, %26, %cst_20 {dimension_numbers = #tpu.dot_dimension_numbers<[1], [0], [0], [1], [0, 0, 1, 1], [], []>} : vector<8x1024xbf16>, vector<1024x128xbf16>, vector<8x128xf32> -> vector<8x128xf32>
    %c0_21 = arith.constant 0 : index
    %c0_22 = arith.constant 0 : index
    %28 = vector.load %arg9[%c0_21, %c0_22] : memref<1x128xf32, #tpu.memory_space<vmem>>, vector<1x128xf32>
    %29 = vector.broadcast %28 : vector<1x128xf32> to vector<8x128xf32>
    %30 = arith.addf %27, %29 : vector<8x128xf32>
    %cst_23 = arith.constant 0.000000e+00 : f32
    %31 = vector.broadcast %cst_23 : f32 to vector<8x128xf32>
    %32 = arith.maximumf %30, %31 : vector<8x128xf32>
    %33 = arith.truncf %32 : vector<8x128xf32> to vector<8x128xbf16>
    %c0_24 = arith.constant 0 : index
    %c0_25 = arith.constant 0 : index
    %34 = vector.load %arg10[%c0_24, %c0_25] : memref<128x128xbf16, #tpu.memory_space<vmem>>, vector<128x128xbf16>
    %cst_26 = arith.constant dense<0.000000e+00> : vector<8x128xf32>
    %35 = tpu.matmul %33, %34, %cst_26 {dimension_numbers = #tpu.dot_dimension_numbers<[1], [0], [0], [1], [0, 0, 1, 1], [], []>} : vector<8x128xbf16>, vector<128x128xbf16>, vector<8x128xf32> -> vector<8x128xf32>
    %c0_27 = arith.constant 0 : index
    %c0_28 = arith.constant 0 : index
    %36 = vector.load %arg11[%c0_27, %c0_28] : memref<1x128xf32, #tpu.memory_space<vmem>>, vector<1x128xf32>
    %37 = vector.broadcast %36 : vector<1x128xf32> to vector<8x128xf32>
    %38 = arith.addf %35, %37 : vector<8x128xf32>
    %cst_29 = arith.constant 0.000000e+00 : f32
    %39 = vector.broadcast %cst_29 : f32 to vector<8x128xf32>
    %40 = arith.maximumf %38, %39 : vector<8x128xf32>
    %c0_30 = arith.constant 0 : index
    %c0_31 = arith.constant 0 : index
    %41 = vector.load %arg15[%c0_30, %c0_31] : memref<8x128xf32, #tpu.memory_space<vmem>>, vector<8x128xf32>
    tpu.vector_store %arg15[%c0_30, %c0_31], %40 {strides = array<i32>} : memref<8x128xf32, #tpu.memory_space<vmem>>, vector<8x128xf32>,
    %42 = arith.truncf %40 : vector<8x128xf32> to vector<8x128xbf16>
    %c0_32 = arith.constant 0 : index
    %c0_33 = arith.constant 0 : index
    %43 = vector.load %arg12[%c0_32, %c0_33] : memref<128x128xbf16, #tpu.memory_space<vmem>>, vector<128x128xbf16>
    %cst_34 = arith.constant dense<0.000000e+00> : vector<8x128xf32>
    %44 = tpu.matmul %42, %43, %cst_34 {dimension_numbers = #tpu.dot_dimension_numbers<[1], [0], [0], [1], [0, 0, 1, 1], [], []>} : vector<8x128xbf16>, vector<128x128xbf16>, vector<8x128xf32> -> vector<8x128xf32>
    %c0_35 = arith.constant 0 : index
    %c0_36 = arith.constant 0 : index
    %45 = vector.load %arg13[%c0_35, %c0_36] : memref<1x128xf32, #tpu.memory_space<vmem>>, vector<1x128xf32>
    %46 = vector.broadcast %45 : vector<1x128xf32> to vector<8x128xf32>
    %47 = arith.addf %44, %46 : vector<8x128xf32>
    %c0_37 = arith.constant 0 : index
    %c0_38 = arith.constant 0 : index
    %48 = vector.load %arg14[%c0_37, %c0_38] : memref<8x128xf32, #tpu.memory_space<vmem>>, vector<8x128xf32>
    tpu.vector_store %arg14[%c0_37, %c0_38], %47 {strides = array<i32>} : memref<8x128xf32, #tpu.memory_space<vmem>>, vector<8x128xf32>,
    return
  }
  func.func @transform_0(%arg0: i32) -> (i32, i32) {
    %c0_i32 = arith.constant 0 : i32
    %c0_i32_0 = arith.constant 0 : i32
    return %arg0, %c0_i32 : i32, i32
  }
  func.func @transform_1(%arg0: i32) -> (i32, i32) {
    %c0_i32 = arith.constant 0 : i32
    %c0_i32_0 = arith.constant 0 : i32
    %c0_i32_1 = arith.constant 0 : i32
    return %c0_i32, %c0_i32_0 : i32, i32
  }
  func.func @transform_2(%arg0: i32) -> (i32, i32) {
    %c0_i32 = arith.constant 0 : i32
    %c0_i32_0 = arith.constant 0 : i32
    %c0_i32_1 = arith.constant 0 : i32
    return %c0_i32, %c0_i32_0 : i32, i32
  }
  func.func @transform_3(%arg0: i32) -> (i32, i32) {
    %c0_i32 = arith.constant 0 : i32
    %c0_i32_0 = arith.constant 0 : i32
    %c0_i32_1 = arith.constant 0 : i32
    return %c0_i32, %c0_i32_0 : i32, i32
  }
  func.func @transform_4(%arg0: i32) -> (i32, i32) {
    %c0_i32 = arith.constant 0 : i32
    %c0_i32_0 = arith.constant 0 : i32
    %c0_i32_1 = arith.constant 0 : i32
    return %c0_i32, %c0_i32_0 : i32, i32
  }
  func.func @transform_5(%arg0: i32) -> (i32, i32) {
    %c0_i32 = arith.constant 0 : i32
    %c0_i32_0 = arith.constant 0 : i32
    %c0_i32_1 = arith.constant 0 : i32
    return %c0_i32, %c0_i32_0 : i32, i32
  }
  func.func @transform_6(%arg0: i32) -> (i32, i32) {
    %c0_i32 = arith.constant 0 : i32
    %c0_i32_0 = arith.constant 0 : i32
    %c0_i32_1 = arith.constant 0 : i32
    return %c0_i32, %c0_i32_0 : i32, i32
  }
  func.func @transform_7(%arg0: i32) -> (i32, i32) {
    %c0_i32 = arith.constant 0 : i32
    %c0_i32_0 = arith.constant 0 : i32
    %c0_i32_1 = arith.constant 0 : i32
    return %c0_i32, %c0_i32_0 : i32, i32
  }
  func.func @transform_8(%arg0: i32) -> (i32, i32) {
    %c0_i32 = arith.constant 0 : i32
    %c0_i32_0 = arith.constant 0 : i32
    %c0_i32_1 = arith.constant 0 : i32
    return %c0_i32, %c0_i32_0 : i32, i32
  }
  func.func @transform_9(%arg0: i32) -> (i32, i32) {
    %c0_i32 = arith.constant 0 : i32
    %c0_i32_0 = arith.constant 0 : i32
    %c0_i32_1 = arith.constant 0 : i32
    return %c0_i32, %c0_i32_0 : i32, i32
  }
  func.func @transform_10(%arg0: i32) -> (i32, i32) {
    %c0_i32 = arith.constant 0 : i32
    %c0_i32_0 = arith.constant 0 : i32
    %c0_i32_1 = arith.constant 0 : i32
    return %c0_i32, %c0_i32_0 : i32, i32
  }
  func.func @transform_11(%arg0: i32) -> (i32, i32) {
    %c0_i32 = arith.constant 0 : i32
    %c0_i32_0 = arith.constant 0 : i32
    %c0_i32_1 = arith.constant 0 : i32
    return %c0_i32, %c0_i32_0 : i32, i32
  }
  func.func @transform_12(%arg0: i32) -> (i32, i32) {
    %c0_i32 = arith.constant 0 : i32
    %c0_i32_0 = arith.constant 0 : i32
    %c0_i32_1 = arith.constant 0 : i32
    return %c0_i32, %c0_i32_0 : i32, i32
  }
  func.func @transform_13(%arg0: i32) -> (i32, i32) {
    %c0_i32 = arith.constant 0 : i32
    %c0_i32_0 = arith.constant 0 : i32
    return %arg0, %c0_i32 : i32, i32
  }
  func.func @transform_14(%arg0: i32) -> (i32, i32) {
    %c0_i32 = arith.constant 0 : i32
    %c0_i32_0 = arith.constant 0 : i32
    return %arg0, %c0_i32 : i32, i32
  }
}

</mosaic_0001>

<bundles_post_ra>
// kernel: tpu_custom_call.1
= control target key start
LH: loop header
LB: loop body
LE: loop exit
PB: predicated region body
PF: predicated region fallthrough
CT: control target
= control target key end

     0   :  { %20 = vsyncpa [#allocation3], 0  ;;  %s7301_s0 = inlined_call_operand.hbm [shape: f32[8,128], index: 0, kind: input, shape index: {}]   ;;  %s7302_s1 = inlined_call_operand.hbm [shape: bf16[128,128], index: 1, kind: input, shape index: {}]   ;;  %s7303_s2 = inlined_call_operand.hbm [shape: f32[1,128], index: 2, kind: input, shape index: {}]   ;;  %s7304_s3 = inlined_call_operand.hbm [shape: bf16[128,1024], index: 3, kind: input, shape index: {}]   ;;  %s7305_s4 = inlined_call_operand.hbm [shape: f32[1,1024], index: 4, kind: input, shape index: {}]   ;;  %s7306_s5 = inlined_call_operand.hbm [shape: bf16[1024,1024], index: 5, kind: input, shape index: {}]   ;;  %s7307_s6 = inlined_call_operand.hbm [shape: f32[1,1024], index: 6, kind: input, shape index: {}]   ;;  %s7308_s7 = inlined_call_operand.hbm [shape: bf16[1024,128], index: 7, kind: input, shape index: {}]   ;;  %s7309_s8 = inlined_call_operand.hbm [shape: f32[1,128], index: 8, kind: input, shape index: {}]   ;;  %s7310_s9 = inlined_call_operand.hbm [shape: bf16[128,128], index: 9, kind: input, shape index: {}]   ;;  %s7311_s10 = inlined_call_operand.hbm [shape: f32[1,128], index: 10, kind: input, shape index: {}]   ;;  %s7312_s11 = inlined_call_operand.hbm [shape: bf16[128,128], index: 11, kind: input, shape index: {}]   ;;  %s7313_s12 = inlined_call_operand.hbm [shape: f32[1,128], index: 12, kind: input, shape index: {}]   ;;  %s7314_s13 = inlined_call_operand.hbm [shape: f32[8,128], index: 13, kind: output, shape index: {0}]   ;;  %s7315_s14 = inlined_call_operand.hbm [shape: f32[8,128], index: 14, kind: output, shape index: {1}]  }
   0x1   :  { %21 = vsyncpa [#allocation6], 0 }
   0x2   :  { %22 = vsyncpa [#allocation9], 0 }
   0x3   :  { %23 = vsyncpa [#allocation12], 0 }
   0x4   :  { %24 = vsyncpa [#allocation15], 0 }
   0x5   :  { %25 = vsyncpa [#allocation18], 0 }
   0x6   :  { %26 = vsyncpa [#allocation21], 0 }
   0x7   :  { %27 = vsyncpa [#allocation4], 0 }
   0x8   :  { %28 = vsyncpa [#allocation25], 0  ;;  %s6932_s29 = smov [#allocation5]  }
   0x9   :  { %s44_s30 = sshll.u32 %s6932_s29, 4  ;;  %s45_s30 = int_to_ptr.vmem [resolvable:$true] %s44_s30 }
   0xa   :  { %s6622_s15 = scalar_lea.vmem %s45_s30, 1024  ;;  %p6627_p1 = scmp.lt.s32.totalorder %s45_s30, %s45_s30 }
   0xb   :  { %p6623_p0 = scmp.ne.s32.totalorder %s45_s30, %s6622_s15  ;;  %p6628_p2 = scmp.lt.s32.totalorder %s6622_s15, %s6622_s15 }
   0xd   :  { %p6629_p3 = por %p6628_p2, %p6627_p1 }
   0xf   :  { %p6630_p4 = pnand %p6629_p3, %p6623_p0 }
  0x11   :  { %6633 = shalt.err (!%p6630_p4)
}
  0x12   :  { %s6933_s16 = smov 64   ;;  %s6934_s17 = smov 4  }
  0x13   :  { %50 = dma.hbm_to_vmem [thread:$0]  %s7302_s1, 1024, %s45_s30, [#allocation6], %s6933_s16, %s6933_s16, %s6934_s17  }
  0x14   :  { %s6935_s20 = smov [#allocation8]  }
  0x15   :  { %s66_s21 = sshll.u32 %s6935_s20, 4  ;;  %s67_s21 = int_to_ptr.vmem [resolvable:$true] %s66_s21 }
  0x16   :  { %s6642_s22 = scalar_lea.vmem %s67_s21, 8192  ;;  %p6647_p6 = scmp.lt.s32.totalorder %s67_s21, %s67_s21 }
  0x17   :  { %p6643_p5 = scmp.ne.s32.totalorder %s67_s21, %s6642_s22  ;;  %p6648_p7 = scmp.lt.s32.totalorder %s6642_s22, %s6642_s22 }
  0x19   :  { %p6649_p8 = por %p6648_p7, %p6647_p6 }
  0x1b   :  { %p6650_p9 = pnand %p6649_p8, %p6643_p5 }
  0x1d   :  { %6653 = shalt.err (!%p6650_p9)
}
  0x1e   :  { %s6936_s23 = smov 512   ;;  %s6937_s24 = smov 32  }
  0x1f   :  { %72 = dma.hbm_to_vmem [thread:$0]  %s7304_s3, 8192, %s67_s21, [#allocation9], %s6936_s23, %s6936_s23, %s6937_s24  }
  0x20   :  { %s6938_s27 = smov [#allocation11]   ;;  %s6939_s29 = smov [#allocation14]  }
  0x21   :  { %s88_s28 = sshll.u32 %s6938_s27, 4  ;;  %s110_s1 = sshll.u32 %s6939_s29, 4  ;;  %s89_s28 = int_to_ptr.vmem [resolvable:$true] %s88_s28  ;;  %s111_s1 = int_to_ptr.vmem [resolvable:$true] %s110_s1 }
  0x22   :  { %s6662_s30 = scalar_lea.vmem %s89_s28, 65536  ;;  %p6667_p11 = scmp.lt.s32.totalorder %s89_s28, %s89_s28 }
  0x23   :  { %p6663_p10 = scmp.ne.s32.totalorder %s89_s28, %s6662_s30  ;;  %p6668_p12 = scmp.lt.s32.totalorder %s6662_s30, %s6662_s30 }
  0x25   :  { %p6669_p13 = por %p6668_p12, %p6667_p11 }
  0x27   :  { %p6670_p0 = pnand %p6669_p13, %p6663_p10 }
  0x29   :  { %6673 = shalt.err (!%p6670_p0)
}
  0x2a   :  { %94 = dma.hbm_to_vmem [thread:$0]  %s7306_s5, 65536, %s89_s28, [#allocation12], %s6936_s23, %s6936_s23, %s6937_s24  }
  0x2b   :  { %s6682_s19 = scalar_lea.vmem %s111_s1, 8192  ;;  %p6687_p2 = scmp.lt.s32.totalorder %s111_s1, %s111_s1 }
  0x2c   :  { %p6683_p1 = scmp.ne.s32.totalorder %s111_s1, %s6682_s19  ;;  %p6688_p3 = scmp.lt.s32.totalorder %s6682_s19, %s6682_s19 }
  0x2e   :  { %p6689_p4 = por %p6688_p3, %p6687_p2 }
  0x30   :  { %p6690_p5 = pnand %p6689_p4, %p6683_p1 }
  0x32   :  { %6693 = shalt.err (!%p6690_p5)
}
  0x33   :  { %116 = dma.hbm_to_vmem [thread:$0]  %s7308_s7, 8192, %s111_s1, [#allocation15], %s6933_s16, %s6933_s16, %s6934_s17  }
  0x34   :  { %s6940_s21 = smov [#allocation17]   ;;  %s6941_s25 = smov [#allocation20]  }
  0x35   :  { %s132_s22 = sshll.u32 %s6940_s21, 4  ;;  %s154_s26 = sshll.u32 %s6941_s25, 4  ;;  %s133_s22 = int_to_ptr.vmem [resolvable:$true] %s132_s22  ;;  %s155_s26 = int_to_ptr.vmem [resolvable:$true] %s154_s26 }
  0x36   :  { %s6702_s5 = scalar_lea.vmem %s133_s22, 1024  ;;  %p6707_p7 = scmp.lt.s32.totalorder %s133_s22, %s133_s22 }
  0x37   :  { %p6703_p6 = scmp.ne.s32.totalorder %s133_s22, %s6702_s5  ;;  %p6708_p8 = scmp.lt.s32.totalorder %s6702_s5, %s6702_s5 }
  0x39   :  { %p6709_p9 = por %p6708_p8, %p6707_p7 }
  0x3b   :  { %p6710_p10 = pnand %p6709_p9, %p6703_p6 }
  0x3d   :  { %6713 = shalt.err (!%p6710_p10)
}
  0x3e   :  { %138 = dma.hbm_to_vmem [thread:$0]  %s7310_s9, 1024, %s133_s22, [#allocation18], %s6933_s16, %s6933_s16, %s6934_s17  }
  0x3f   :  { %s6722_s7 = scalar_lea.vmem %s155_s26, 1024  ;;  %p6727_p12 = scmp.lt.s32.totalorder %s155_s26, %s155_s26 }
  0x40   :  { %p6723_p11 = scmp.ne.s32.totalorder %s155_s26, %s6722_s7  ;;  %p6728_p13 = scmp.lt.s32.totalorder %s6722_s7, %s6722_s7 }
  0x42   :  { %p6729_p0 = por %p6728_p13, %p6727_p12 }
  0x44   :  { %p6730_p1 = pnand %p6729_p0, %p6723_p11 }
  0x46   :  { %6733 = shalt.err (!%p6730_p1)
}
  0x47   :  { %160 = dma.hbm_to_vmem [thread:$0]  %s7312_s11, 1024, %s155_s26, [#allocation21], %s6933_s16, %s6933_s16, %s6934_s17  }
  0x48   :  { %s6942_s29 = smov [#allocation2]   ;;  %s6943_s30 = smov [#allocation7]  }
  0x49   :  { %s35_s1 = sshll.u32 %s6942_s29, 4  ;;  %s57_s15 = sshll.u32 %s6943_s30, 4  ;;  %s36_s1 = int_to_ptr.vmem [resolvable:$true] %s35_s1  ;;  %s58_s15 = int_to_ptr.vmem [resolvable:$true] %s57_s15 }
  0x4a   :  { %s6742_s9 = scalar_lea.vmem %s36_s1, 128  ;;  %p6747_p3 = scmp.lt.s32.totalorder %s36_s1, %s36_s1 }
  0x4b   :  { %p6743_p2 = scmp.ne.s32.totalorder %s36_s1, %s6742_s9  ;;  %p6748_p4 = scmp.lt.s32.totalorder %s6742_s9, %s6742_s9 }
  0x4d   :  { %p6749_p5 = por %p6748_p4, %p6747_p3 }
  0x4f   :  { %p6750_p6 = pnand %p6749_p5, %p6743_p2 }
  0x51   :  { %6753 = shalt.err (!%p6750_p6)
}
  0x52   :  { %38 = dma.hbm_to_vmem [thread:$0]  %s7301_s0, 128, %s36_s1, [#allocation3]  }
  0x53   :  { %s6762_s3 = scalar_lea.vmem %s58_s15, 16  ;;  %s6766_s11 = scalar_lea.vmem %s58_s15, 32 }
  0x54   :  { %p6763_p7 = scmp.ne.s32.totalorder %s58_s15, %s6762_s3  ;;  %p6767_p8 = scmp.lt.s32.totalorder %s58_s15, %s58_s15 }
  0x55   :  { %p6768_p9 = scmp.lt.s32.totalorder %s6766_s11, %s6762_s3 }
  0x57   :  { %p6769_p10 = por %p6768_p9, %p6767_p8 }
  0x59   :  { %p6770_p11 = pnand %p6769_p10, %p6763_p7 }
  0x5b   :  { %6773 = shalt.err (!%p6770_p11)
}
  0x5c   :  { %60 = dma.hbm_to_vmem [thread:$0]  %s7303_s2, 16, %s58_s15, [#allocation6]  }
  0x5d   :  { %s6944_s20 = smov [#allocation10]   ;;  %s6945_s22 = smov [#allocation13]  }
  0x5e   :  { %s79_s21 = sshll.u32 %s6944_s20, 4  ;;  %s101_s25 = sshll.u32 %s6945_s22, 4  ;;  %s80_s21 = int_to_ptr.vmem [resolvable:$true] %s79_s21  ;;  %s102_s25 = int_to_ptr.vmem [resolvable:$true] %s101_s25 }
  0x5f   :  { %s6782_s26 = scalar_lea.vmem %s80_s21, 128  ;;  %p6787_p13 = scmp.lt.s32.totalorder %s80_s21, %s80_s21 }
  0x60   :  { %p6783_p12 = scmp.ne.s32.totalorder %s80_s21, %s6782_s26  ;;  %p6788_p0 = scmp.lt.s32.totalorder %s6782_s26, %s6782_s26 }
  0x62   :  { %p6789_p1 = por %p6788_p0, %p6787_p13 }
  0x64   :  { %p6790_p2 = pnand %p6789_p1, %p6783_p12 }
  0x66   :  { %6793 = shalt.err (!%p6790_p2)
}
  0x67   :  { %82 = dma.hbm_to_vmem [thread:$0]  %s7305_s4, 128, %s80_s21, [#allocation9]  }
  0x68   :  { %s6802_s23 = scalar_lea.vmem %s102_s25, 128  ;;  %p6807_p4 = scmp.lt.s32.totalorder %s102_s25, %s102_s25 }
  0x69   :  { %p6803_p3 = scmp.ne.s32.totalorder %s102_s25, %s6802_s23  ;;  %p6808_p5 = scmp.lt.s32.totalorder %s6802_s23, %s6802_s23 }
  0x6b   :  { %p6809_p6 = por %p6808_p5, %p6807_p4 }
  0x6d   :  { %p6810_p7 = pnand %p6809_p6, %p6803_p3 }
  0x6f   :  { %6813 = shalt.err (!%p6810_p7)
}
  0x70   :  { %104 = dma.hbm_to_vmem [thread:$0]  %s7307_s6, 128, %s102_s25, [#allocation12]  }
  0x71   :  { %s6946_s7 = smov [#allocation16]   ;;  %s6947_s28 = smov [#allocation19]  }
  0x72   :  { %s123_s27 = sshll.u32 %s6946_s7, 4  ;;  %s145_s29 = sshll.u32 %s6947_s28, 4  ;;  %s124_s27 = int_to_ptr.vmem [resolvable:$true] %s123_s27  ;;  %s146_s29 = int_to_ptr.vmem [resolvable:$true] %s145_s29 }
  0x73   :  { %s6822_s1 = scalar_lea.vmem %s124_s27, 16  ;;  %s6826_s4 = scalar_lea.vmem %s124_s27, 32 }
  0x74   :  { %p6823_p8 = scmp.ne.s32.totalorder %s124_s27, %s6822_s1  ;;  %p6827_p9 = scmp.lt.s32.totalorder %s124_s27, %s124_s27 }
  0x75   :  { %p6828_p10 = scmp.lt.s32.totalorder %s6826_s4, %s6822_s1 }
  0x77   :  { %p6829_p11 = por %p6828_p10, %p6827_p9 }
  0x79   :  { %p6830_p12 = pnand %p6829_p11, %p6823_p8 }
  0x7b   :  { %6833 = shalt.err (!%p6830_p12)
}
  0x7c   :  { %126 = dma.hbm_to_vmem [thread:$0]  %s7309_s8, 16, %s124_s27, [#allocation15]  }
  0x7d   :  { %s6842_s9 = scalar_lea.vmem %s146_s29, 16  ;;  %s6846_s6 = scalar_lea.vmem %s146_s29, 32 }
  0x7e   :  { %p6843_p13 = scmp.ne.s32.totalorder %s146_s29, %s6842_s9  ;;  %p6847_p0 = scmp.lt.s32.totalorder %s146_s29, %s146_s29 }
  0x7f   :  { %p6848_p1 = scmp.lt.s32.totalorder %s6846_s6, %s6842_s9 }
  0x81   :  { %p6849_p2 = por %p6848_p1, %p6847_p0 }
  0x83   :  { %p6850_p3 = pnand %p6849_p2, %p6843_p13 }
  0x85   :  { %6853 = shalt.err (!%p6850_p3)
}
  0x86   :  { %148 = dma.hbm_to_vmem [thread:$0]  %s7311_s10, 16, %s146_s29, [#allocation18]  }
  0x87   :  { %s6948_s3 = smov [#allocation22]  }
  0x88   :  { %s167_s11 = sshll.u32 %s6948_s3, 4  ;;  %s168_s11 = int_to_ptr.vmem [resolvable:$true] %s167_s11 }
  0x89   :  { %s6862_s16 = scalar_lea.vmem %s168_s11, 16  ;;  %s6866_s17 = scalar_lea.vmem %s168_s11, 32 }
  0x8a   :  { %p6863_p4 = scmp.ne.s32.totalorder %s168_s11, %s6862_s16  ;;  %p6867_p5 = scmp.lt.s32.totalorder %s168_s11, %s168_s11 }
  0x8b   :  { %p6868_p6 = scmp.lt.s32.totalorder %s6866_s17, %s6862_s16 }
  0x8d   :  { %p6869_p7 = por %p6868_p6, %p6867_p5 }
  0x8f   :  { %p6870_p8 = pnand %p6869_p7, %p6863_p4 }
  0x91   :  { %6873 = shalt.err (!%p6870_p8)
}
  0x92   :  { %170 = dma.hbm_to_vmem [thread:$0]  %s7313_s12, 16, %s168_s11, [#allocation21]  }
  0x93   :  { %6914 = dma.done.wait [#allocation3], 128  }
  0x94   :  { %6915 = vsyncadd [#allocation3], 4294967168 }
  0x95   :  { %6916 = dma.done.wait [#allocation6], 1040  }
  0x96   :  { %6917 = vsyncadd [#allocation6], 4294966256 }
  0x97   :  { %6918 = dma.done.wait [#allocation9], 8320  }
  0x98   :  { %6919 = vsyncadd [#allocation9], 4294958976 }
  0x99   :  { %6920 = dma.done.wait [#allocation12], 65664  }
  0x9a   :  { %6921 = vsyncadd [#allocation12], 4294901632 }
  0x9b   :  { %6922 = dma.done.wait [#allocation15], 8208  }
  0x9c   :  { %6923 = vsyncadd [#allocation15], 4294959088 }
  0x9d   :  { %6924 = dma.done.wait [#allocation18], 1040  }
  0x9e   :  { %6925 = vsyncadd [#allocation18], 4294966256 }
  0x9f   :  { %6926 = dma.done.wait [#allocation21], 1040  }
  0xa0   :  { %6927 = vsyncadd [#allocation21], 4294966256  ;;  %v6949_v0 = vmov 0.0   ;;  %vm6950_vm0 = vmmov 0   ;;  %v6525_v1 = vld [vmem:[#allocation5 + $0x38] sm:$0xff]   ;;  %v6526_v2 = vld [vmem:[#allocation5 + $0x30] sm:$0xff]  }
  0xa1   :  { %6443 = vmatprep.subr.bf16.mxu0 %v6949_v0  ;;  %6459 = vmatprep.mubr.msk.bf16.mxu0 %vm6950_vm0, %v6949_v0  ;;  %v6527_v3 = vld [vmem:[#allocation5 + $0x28] sm:$0xff]   ;;  %v6528_v9 = vld [vmem:[#allocation5 + $0x20] sm:$0xff]   ;;  %v6529_v16 = vld [vmem:[#allocation5 + $0x18] sm:$0xff]   ;;  %s6952_s10 = smov [#allocation24]  }
  0xa2   :  { %6444 = vmatpush3.bf16.msra.mxu0 %v6525_v1  ;;  %v382_v4 = vld [vmem:[#allocation8 + $0x1c0] sm:$0xff]  ;;  %v6530_v20 = vld [vmem:[#allocation5 + $0x10] sm:$0xff]   ;;  %v211_v32 = vld [vmem:[#allocation2] sm:$0xff]  ;;  %s5641_s12 = sshll.u32 %s6952_s10, 4  ;;  %s5642_s12 = int_to_ptr.vmem [resolvable:$true] %s5641_s12 }
  0xa3   :  { %6445 = vmatprep.subr.bf16.mxu0 %v6949_v0  ;;  %v386_v5 = vld [vmem:[#allocation8 + $0x1e0] sm:$0xff]  ;;  %v383_v29 = vld [vmem:[#allocation8 + $0x1c8] sm:$0xff]  ;;  %v212_v41 = vpack.c.bf16 %v211_v32, %v211_v32  ;;  %s6874_s21 = scalar_lea.vmem %s5642_s12, 128  ;;  %p6879_p10 = scmp.lt.s32.totalorder %s5642_s12, %s5642_s12 }
  0xa4   :  { %v5726_v6 = vcombine.high %v382_v4, %v386_v5  ;;  %v5725_v7 = vcombine.low %v382_v4, %v386_v5  ;;  %v374_v8 = vld [vmem:[#allocation8 + $0x180] sm:$0xff]  ;;  %v387_v30 = vld [vmem:[#allocation8 + $0x1e8] sm:$0xff]  ;;  %p6875_p9 = scmp.ne.s32.totalorder %s5642_s12, %s6874_s21  ;;  %p6880_p11 = scmp.lt.s32.totalorder %s6874_s21, %s6874_s21 }
  0xa5   :  { %v378_v10 = vld [vmem:[#allocation8 + $0x1a0] sm:$0xff]  ;;  %v375_v37 = vld [vmem:[#allocation8 + $0x188] sm:$0xff]  ;;  %v5728_v39 = vcombine.high %v383_v29, %v387_v30  ;;  %v5727_v43 = vcombine.low %v383_v29, %v387_v30 }
  0xa6   :  { %6446 = vmatpush3.bf16.msra.mxu0 %v6526_v2  ;;  %752 = vmatprep.subr.bf16.mxu1 %v5726_v6  ;;  %v5718_v11 = vcombine.high %v374_v8, %v378_v10  ;;  %v366_v12 = vld [vmem:[#allocation8 + $0x140] sm:$0xff]  ;;  %v5717_v14 = vcombine.low %v374_v8, %v378_v10  ;;  %v379_v38 = vld [vmem:[#allocation8 + $0x1a8] sm:$0xff]  ;;  %p6881_p12 = por %p6880_p11, %p6879_p10 }
  0xa7   :  { %6447 = vmatprep.subr.bf16.mxu0 %v6949_v0  ;;  %v370_v13 = vld [vmem:[#allocation8 + $0x160] sm:$0xff]  ;;  %753 = vmatpush1.bf16.msra.mxu1 %v5725_v7  ;;  %v367_v44 = vld [vmem:[#allocation8 + $0x148] sm:$0xff]  ;;  %v5720_v46 = vcombine.high %v375_v37, %v379_v38  ;;  %v5719_v48 = vcombine.low %v375_v37, %v379_v38  ;;  %v369_v37 = vld [vmem:[#allocation8 + $0x158] sm:$0xff] }
  0xa8   :  { %754 = vmatprep.subr.bf16.mxu1 %v5718_v11  ;;  %v5710_v15 = vcombine.high %v366_v12, %v370_v13  ;;  %v358_v17 = vld [vmem:[#allocation8 + $0x100] sm:$0xff]  ;;  %v5709_v19 = vcombine.low %v366_v12, %v370_v13  ;;  %v371_v45 = vld [vmem:[#allocation8 + $0x168] sm:$0xff]  ;;  %v384_v12 = vld [vmem:[#allocation8 + $0x1d0] sm:$0xff]  ;;  %p6882_p13 = pnand %p6881_p12, %p6875_p9 }
  0xa9   :  { %v362_v18 = vld [vmem:[#allocation8 + $0x120] sm:$0xff]  ;;  %v359_v49 = vld [vmem:[#allocation8 + $0x108] sm:$0xff]  ;;  %v5712_v51 = vcombine.high %v367_v44, %v371_v45  ;;  %v5711_v52 = vcombine.low %v367_v44, %v371_v45  ;;  %v388_v13 = vld [vmem:[#allocation8 + $0x1f0] sm:$0xff] }
  0xaa   :  { %6448 = vmatpush3.bf16.msra.mxu0 %v6527_v3  ;;  %v5702_v21 = vcombine.high %v358_v17, %v362_v18  ;;  %v350_v22 = vld [vmem:[#allocation8 + $0xc0] sm:$0xff]  ;;  %v5701_v25 = vcombine.low %v358_v17, %v362_v18  ;;  %v363_v50 = vld [vmem:[#allocation8 + $0x128] sm:$0xff]  ;;  %v5729_v17 = vcombine.low %v384_v12, %v388_v13  ;;  %v373_v38 = vld [vmem:[#allocation8 + $0x178] sm:$0xff] }
  0xab   :  { %6449 = vmatprep.subr.bf16.mxu0 %v6949_v0  ;;  %755 = vmatpush1.bf16.msra.mxu1 %v5717_v14  ;;  %v354_v23 = vld [vmem:[#allocation8 + $0xe0] sm:$0xff]  ;;  %v351_v53 = vld [vmem:[#allocation8 + $0xc8] sm:$0xff]  ;;  %v5704_v55 = vcombine.high %v359_v49, %v363_v50  ;;  %v5703_v56 = vcombine.low %v359_v49, %v363_v50  ;;  %v385_v14 = vld [vmem:[#allocation8 + $0x1d8] sm:$0xff] }
  0xac   :  { %756 = vmatprep.subr.bf16.mxu1 %v5710_v15  ;;  %v6531_v24 = vld [vmem:[#allocation5 + $0x8] sm:$0xff]   ;;  %v5694_v28 = vcombine.high %v350_v22, %v354_v23  ;;  %v6532_v31 = vld [vmem:[#allocation5] sm:$0xff]   ;;  %v5693_v33 = vcombine.low %v350_v22, %v354_v23  ;;  %v5730_v15 = vcombine.high %v384_v12, %v388_v13  ;;  %v364_v44 = vld [vmem:[#allocation8 + $0x130] sm:$0xff] }
  0xad   :  { %v342_v26 = vld [vmem:[#allocation8 + $0x80] sm:$0xff]  ;;  %v355_v54 = vld [vmem:[#allocation8 + $0xe8] sm:$0xff]  ;;  %v361_v45 = vld [vmem:[#allocation8 + $0x118] sm:$0xff] }
  0xae   :  { %6450 = vmatpush3.bf16.msra.mxu0 %v6528_v9  ;;  %v346_v27 = vld [vmem:[#allocation8 + $0xa0] sm:$0xff]  ;;  %v343_v57 = vld [vmem:[#allocation8 + $0x88] sm:$0xff]  ;;  %v5696_v59 = vcombine.high %v351_v53, %v355_v54  ;;  %v5695_v60 = vcombine.low %v351_v53, %v355_v54  ;;  %v353_v53 = vld [vmem:[#allocation8 + $0xd8] sm:$0xff] }
  0xaf   :  { %6451 = vmatprep.subr.bf16.mxu0 %v6949_v0  ;;  %757 = vmatpush1.bf16.msra.mxu1 %v5709_v19  ;;  %v334_v34 = vld [vmem:[#allocation8 + $0x40] sm:$0xff]  ;;  %v5686_v36 = vcombine.high %v342_v26, %v346_v27  ;;  %v5685_v40 = vcombine.low %v342_v26, %v346_v27  ;;  %v347_v58 = vld [vmem:[#allocation8 + $0xa8] sm:$0xff]  ;;  %v380_v26 = vld [vmem:[#allocation8 + $0x1b0] sm:$0xff] }
  0xb0   :  { %758 = vmatprep.subr.bf16.mxu1 %v5702_v21  ;;  %v338_v35 = vld [vmem:[#allocation8 + $0x60] sm:$0xff]  ;;  %v335_v61 = vld [vmem:[#allocation8 + $0x48] sm:$0xff]  ;;  %v5688_v63 = vcombine.high %v343_v57, %v347_v58  ;;  %v5687_v1 = vcombine.low %v343_v57, %v347_v58  ;;  %v5660_v21 = vld [vmem:[#allocation7] ss:$0 sm:$0xff] }
  0xb1   :  { %v5678_v42 = vcombine.high %v334_v34, %v338_v35  ;;  %v5677_v47 = vcombine.low %v334_v34, %v338_v35  ;;  %v339_v62 = vld [vmem:[#allocation8 + $0x68] sm:$0xff]  ;;  %v326_v4 = vld [vmem:[#allocation8] sm:$0xff]  ;;  %v377_v27 = vld [vmem:[#allocation8 + $0x198] sm:$0xff] }
  0xb2   :  { %6452 = vmatpush3.bf16.msra.mxu0 %v6529_v16  ;;  %v5680_v2 = vcombine.high %v335_v61, %v339_v62  ;;  %v5679_v3 = vcombine.low %v335_v61, %v339_v62  ;;  %v330_v5 = vld [vmem:[#allocation8 + $0x20] sm:$0xff]  ;;  %v327_v6 = vld [vmem:[#allocation8 + $0x8] sm:$0xff]  ;;  %v389_v16 = vld [vmem:[#allocation8 + $0x1f8] sm:$0xff] }
  0xb3   :  { %6453 = vmatprep.subr.bf16.mxu0 %v6949_v0  ;;  %759 = vmatpush1.bf16.msra.mxu1 %v5701_v25  ;;  %v5670_v7 = vcombine.high %v326_v4, %v330_v5  ;;  %v331_v8 = vld [vmem:[#allocation8 + $0x28] sm:$0xff]  ;;  %v5669_v11 = vcombine.low %v326_v4, %v330_v5  ;;  %v5731_v18 = vcombine.low %v385_v14, %v389_v16  ;;  %v368_v34 = vld [vmem:[#allocation8 + $0x150] sm:$0xff]  ;;  %v357_v54 = vld [vmem:[#allocation8 + $0xf8] sm:$0xff] }
  0xb4   :  { %760 = vmatprep.subr.bf16.mxu1 %v5694_v28  ;;  %v5671_v9 = vcombine.low %v327_v6, %v331_v8  ;;  %v5672_v10 = vcombine.high %v327_v6, %v331_v8  ;;  %v5732_v19 = vcombine.high %v385_v14, %v389_v16  ;;  %v381_v28 = vld [vmem:[#allocation8 + $0x1b8] sm:$0xff]  ;;  %v5700_v58 = vcombine.high %v353_v53, %v357_v54  ;;  %v336_v4 = vld [vmem:[#allocation8 + $0x50] sm:$0xff] }
  0xb5   :  { %v345_v61 = vld [vmem:[#allocation8 + $0x98] sm:$0xff]  ;;  %v340_v5 = vld [vmem:[#allocation8 + $0x70] sm:$0xff] }
  0xb6   :  { %6454 = vmatpush3.bf16.msra.mxu0 %v6530_v20  ;;  %v6951_v20 = vmov 0   ;;  %v349_v62 = vld [vmem:[#allocation8 + $0xb8] sm:$0xff]  ;;  %v328_v12 = vld [vmem:[#allocation8 + $0x10] sm:$0xff]  ;;  %v5681_v16 = vcombine.low %v336_v4, %v340_v5 }
  0xb7   :  { %6455 = vmatprep.subr.bf16.mxu0 %v6949_v0  ;;  %761 = vmatpush1.bf16.msra.mxu1 %v5693_v33  ;;  %v5724_v33 = vcombine.high %v377_v27, %v381_v28  ;;  %v337_v6 = vld [vmem:[#allocation8 + $0x58] sm:$0xff]  ;;  %v332_v13 = vld [vmem:[#allocation8 + $0x30] sm:$0xff] }
  0xb8   :  { %762 = vmatprep.subr.bf16.mxu1 %v5686_v36  ;;  %784 = vmatprep.mubr.bf16.mxu1 %v6951_v20  ;;  %v372_v36 = vld [vmem:[#allocation8 + $0x170] sm:$0xff]  ;;  %v329_v14 = vld [vmem:[#allocation8 + $0x18] sm:$0xff] }
  0xba   :  { %6456 = vmatpush3.bf16.msra.mxu0 %v6531_v24  ;;  %v376_v24 = vld [vmem:[#allocation8 + $0x190] sm:$0xff] }
  0xbb   :  { %6457 = vmatprep.subr.bf16.mxu0 %v6949_v0  ;;  %763 = vmatpush1.bf16.msra.mxu1 %v5685_v40  ;;  %v5722_v32 = vcombine.high %v376_v24, %v380_v26  ;;  %v5723_v40 = vcombine.low %v377_v27, %v381_v28  ;;  %v980_v28 = vld [vmem:[#allocation11 + $0x180] sm:$0xff] }
  0xbc   :  { %764 = vmatprep.subr.bf16.mxu1 %v5678_v42  ;;  %v5716_v42 = vcombine.high %v369_v37, %v373_v38 }
  0xbe   :  { %6458 = vmatpush3.bf16.msra.mxu0 %v6532_v31 }
  0xbf   :  { %793 = vmatprep.subr.bf16.mxu0 %v5728_v39  ;;  %765 = vmatpush1.bf16.msra.mxu1 %v5677_v47  ;;  %v5721_v39 = vcombine.low %v376_v24, %v380_v26  ;;  %v5713_v47 = vcombine.low %v368_v34, %v372_v36  ;;  %v5673_v24 = vcombine.low %v328_v12, %v332_v13 }
  0xc0   :  { %766 = vmatprep.subr.bf16.mxu1 %v5670_v7  ;;  %v341_v7 = vld [vmem:[#allocation8 + $0x78] sm:$0xff] }
  0xc1   :  { %6460 = vmatmul.mubr.bf16.vlgmr.msra.gmra.mxu0 %v212_v41  ;;  %v5714_v41 = vcombine.high %v368_v34, %v372_v36 }
  0xc2   :  { %794 = vmatpush1.bf16.msra.mxu0 %v5727_v43  ;;  %825 = vmatprep.mubr.bf16.mxu0 %v6951_v20  ;;  %v360_v43 = vld [vmem:[#allocation8 + $0x110] sm:$0xff] }
  0xc3   :  { %795 = vmatprep.subr.bf16.mxu0 %v5720_v46  ;;  %767 = vmatpush1.bf16.msra.mxu1 %v5669_v11  ;;  %v365_v46 = vld [vmem:[#allocation8 + $0x138] sm:$0xff]  ;;  %v5706_v49 = vcombine.high %v360_v43, %v364_v44  ;;  %v5684_v11 = vcombine.high %v337_v6, %v341_v7 }
  0xc4   :  { %834 = vmatprep.subr.bf16.mxu1 %v5730_v15  ;;  %v5708_v50 = vcombine.high %v361_v45, %v365_v46  ;;  %v333_v15 = vld [vmem:[#allocation8 + $0x38] sm:$0xff] }
  0xc6   :  { %796 = vmatpush1.bf16.msra.mxu0 %v5719_v48  ;;  %v5715_v48 = vcombine.low %v369_v37, %v373_v38  ;;  %v972_v37 = vld [vmem:[#allocation11 + $0x140] sm:$0xff] }
  0xc7   :  { %797 = vmatprep.subr.bf16.mxu0 %v5712_v51  ;;  %v352_v51 = vld [vmem:[#allocation8 + $0xd0] sm:$0xff]  ;;  %v976_v38 = vld [vmem:[#allocation11 + $0x160] sm:$0xff] }
  0xca   :  { %798 = vmatpush1.bf16.msra.mxu0 %v5711_v52  ;;  %v356_v52 = vld [vmem:[#allocation8 + $0xf0] sm:$0xff] }
  0xcb   :  { %799 = vmatprep.subr.bf16.mxu0 %v5704_v55  ;;  %v5705_v55 = vcombine.low %v360_v43, %v364_v44  ;;  %v5698_v57 = vcombine.high %v352_v51, %v356_v52  ;;  %v5774_v43 = vcombine.high %v972_v37, %v976_v38 }
  0xce   :  { %800 = vmatpush1.bf16.msra.mxu0 %v5703_v56  ;;  %v5707_v56 = vcombine.low %v361_v45, %v365_v46  ;;  %v964_v45 = vld [vmem:[#allocation11 + $0x100] sm:$0xff] }
  0xcf   :  { %801 = vmatprep.subr.bf16.mxu0 %v5696_v59  ;;  %v344_v59 = vld [vmem:[#allocation8 + $0x90] sm:$0xff]  ;;  %v968_v46 = vld [vmem:[#allocation11 + $0x120] sm:$0xff] }
  0xd2   :  { %802 = vmatpush1.bf16.msra.mxu0 %v5695_v60  ;;  %v348_v60 = vld [vmem:[#allocation8 + $0xb0] sm:$0xff] }
  0xd3   :  { %803 = vmatprep.subr.bf16.mxu0 %v5688_v63  ;;  %v5697_v63 = vcombine.low %v352_v51, %v356_v52  ;;  %v5689_v8 = vcombine.low %v344_v59, %v348_v60  ;;  %v5766_v51 = vcombine.high %v964_v45, %v968_v46  ;;  %v956_v52 = vld [vmem:[#allocation11 + $0xc0] sm:$0xff] }
  0xd6   :  { %804 = vmatpush1.bf16.msra.mxu0 %v5687_v1  ;;  %v5699_v1 = vcombine.low %v353_v53, %v357_v54  ;;  %v960_v53 = vld [vmem:[#allocation11 + $0xe0] sm:$0xff] }
  0xd7   :  { %805 = vmatprep.subr.bf16.mxu0 %v5680_v2  ;;  %v5690_v2 = vcombine.high %v344_v59, %v348_v60  ;;  %v1084_v54 = vld [vmem:[#allocation11 + $0x4c0] sm:$0xff] }
  0xd8   :  { %v948_v60 = vld [vmem:[#allocation11 + $0x80] sm:$0xff] }
  0xda   :  { %806 = vmatpush1.bf16.msra.mxu0 %v5679_v3  ;;  %v5692_v3 = vcombine.high %v345_v61, %v349_v62 }
  0xdb   :  { %807 = vmatprep.subr.bf16.mxu0 %v5672_v10  ;;  %v5682_v10 = vcombine.high %v336_v4, %v340_v5  ;;  %v940_v5 = vld [vmem:[#allocation11 + $0x40] sm:$0xff] }
  0xde   :  { %808 = vmatpush1.bf16.msra.mxu0 %v5671_v9  ;;  %v5691_v9 = vcombine.low %v345_v61, %v349_v62  ;;  %v952_v61 = vld [vmem:[#allocation11 + $0xa0] sm:$0xff] }
  0xdf   :  { %875 = vmatprep.subr.bf16.mxu0 %v5732_v19  ;;  %v5676_v19 = vcombine.high %v329_v14, %v333_v15  ;;  %v1076_v62 = vld [vmem:[#allocation11 + $0x480] sm:$0xff] }
 0x181   :  { %v318_v22 = vpop.f32.mrf.mxu0 }
 0x182   :  { %v319_v23 = vadd.f32 %v5660_v21, %v318_v22  ;;  %v992_v21 = vld [vmem:[#allocation11 + $0x1e0] sm:$0xff] }
 0x183   :  { %v6461_v25 = vpop.f32.mrf.mxu0  ;;  %v1116_v22 = vld [vmem:[#allocation11 + $0x5c0] sm:$0xff] }
 0x184   :  { %v324_v29 = vmax.f32 %v319_v23, 0.0  ;;  %v1120_v23 = vld [vmem:[#allocation11 + $0x5e0] sm:$0xff]  ;;  %v5675_v25 = vcombine.low %v329_v14, %v333_v15 }
 0x185   :  { %v321_v30 = vpop.f32.mrf.mxu0  ;;  %v5918_v27 = vcombine.high %v1116_v22, %v1120_v23  ;;  %v5917_v34 = vcombine.low %v1116_v22, %v1120_v23  ;;  %v936_v14 = vld [vmem:[#allocation11 + $0x20] sm:$0xff] }
 0x186   :  { %v7090_v31 = vpack.c.bf16 %v324_v29, %v324_v29  ;;  %v984_v29 = vld [vmem:[#allocation11 + $0x1a0] sm:$0xff] }
 0x187   :  { %v6462_v35 = vpop.f32.mrf.mxu0  ;;  %v1108_v30 = vld [vmem:[#allocation11 + $0x580] sm:$0xff] }
 0x188   :  { %785 = vmatmul.mubr.bf16.vlgmr.msra.gmra.mxu1 %v7090_v31  ;;  %826 = vmatmul.mubr.bf16.vlgmr.msra.gmra.mxu0 %v7090_v31  ;;  %v5782_v35 = vcombine.high %v980_v28, %v984_v29  ;;  %v1060_v15 = vld [vmem:[#allocation11 + $0x400] sm:$0xff] }
 0x189   :  { %835 = vmatpush1.bf16.msra.mxu1 %v5729_v17  ;;  %876 = vmatpush1.bf16.msra.mxu0 %v5731_v18  ;;  %v5683_v17 = vcombine.low %v337_v6, %v341_v7  ;;  %v5674_v18 = vcombine.high %v328_v12, %v332_v13  ;;  %v944_v6 = vld [vmem:[#allocation11 + $0x60] sm:$0xff] }
 0x18a   :  { %836 = vmatprep.subr.bf16.mxu1 %v5722_v32  ;;  %877 = vmatprep.subr.bf16.mxu0 %v5724_v33  ;;  %v1112_v32 = vld [vmem:[#allocation11 + $0x5a0] sm:$0xff] }
 0x18b   :  { %866 = vmatprep.mubr.bf16.mxu1 %v6951_v20  ;;  %907 = vmatprep.mubr.bf16.mxu0 %v6951_v20  ;;  %v988_v20 = vld [vmem:[#allocation11 + $0x1c0] sm:$0xff]  ;;  %v5910_v36 = vcombine.high %v1108_v30, %v1112_v32 }
 0x18c   :  { %v5790_v26 = vcombine.high %v988_v20, %v992_v21  ;;  %v5789_v33 = vcombine.low %v988_v20, %v992_v21  ;;  %v1068_v7 = vld [vmem:[#allocation11 + $0x440] sm:$0xff] }
 0x18d   :  { %837 = vmatpush1.bf16.msra.mxu1 %v5721_v39  ;;  %878 = vmatpush1.bf16.msra.mxu0 %v5723_v40  ;;  %v1100_v39 = vld [vmem:[#allocation11 + $0x540] sm:$0xff] }
 0x18e   :  { %838 = vmatprep.subr.bf16.mxu1 %v5714_v41  ;;  %879 = vmatprep.subr.bf16.mxu0 %v5716_v42  ;;  %v1104_v40 = vld [vmem:[#allocation11 + $0x560] sm:$0xff]  ;;  %v5781_v41 = vcombine.low %v980_v28, %v984_v29  ;;  %v5909_v42 = vcombine.low %v1108_v30, %v1112_v32 }
 0x18f   :  { %v5902_v44 = vcombine.high %v1100_v39, %v1104_v40  ;;  %v932_v13 = vld [vmem:[#allocation11] sm:$0xff] }
 0x190   :  { %v1052_v21 = vld [vmem:[#allocation11 + $0x3c0] sm:$0xff] }
 0x191   :  { %839 = vmatpush1.bf16.msra.mxu1 %v5713_v47  ;;  %880 = vmatpush1.bf16.msra.mxu0 %v5715_v48  ;;  %v1092_v47 = vld [vmem:[#allocation11 + $0x500] sm:$0xff] }
 0x192   :  { %840 = vmatprep.subr.bf16.mxu1 %v5706_v49  ;;  %881 = vmatprep.subr.bf16.mxu0 %v5708_v50  ;;  %v1096_v48 = vld [vmem:[#allocation11 + $0x520] sm:$0xff]  ;;  %v5773_v49 = vcombine.low %v972_v37, %v976_v38  ;;  %v5901_v50 = vcombine.low %v1100_v39, %v1104_v40 }
 0x193   :  { %v1056_v22 = vld [vmem:[#allocation11 + $0x3e0] sm:$0xff] }
 0x194   :  { %v1180_v23 = vld [vmem:[#allocation11 + $0x7c0] sm:$0xff] }
 0x195   :  { %841 = vmatpush1.bf16.msra.mxu1 %v5705_v55  ;;  %882 = vmatpush1.bf16.msra.mxu0 %v5707_v56  ;;  %v1088_v55 = vld [vmem:[#allocation11 + $0x4e0] sm:$0xff]  ;;  %v5765_v56 = vcombine.low %v964_v45, %v968_v46 }
 0x196   :  { %842 = vmatprep.subr.bf16.mxu1 %v5698_v57  ;;  %883 = vmatprep.subr.bf16.mxu0 %v5700_v58  ;;  %v5893_v57 = vcombine.low %v1092_v47, %v1096_v48  ;;  %v5758_v58 = vcombine.high %v956_v52, %v960_v53  ;;  %v5886_v59 = vcombine.high %v1084_v54, %v1088_v55  ;;  %v1044_v29 = vld [vmem:[#allocation11 + $0x380] sm:$0xff] }
 0x197   :  { %v1048_v30 = vld [vmem:[#allocation11 + $0x3a0] sm:$0xff] }
 0x198   :  { %v1172_v32 = vld [vmem:[#allocation11 + $0x780] sm:$0xff] }
 0x199   :  { %843 = vmatpush1.bf16.msra.mxu1 %v5697_v63  ;;  %884 = vmatpush1.bf16.msra.mxu0 %v5699_v1  ;;  %v1080_v63 = vld [vmem:[#allocation11 + $0x4a0] sm:$0xff]  ;;  %v5757_v1 = vcombine.low %v956_v52, %v960_v53 }
 0x19a   :  { %844 = vmatprep.subr.bf16.mxu1 %v5690_v2  ;;  %885 = vmatprep.subr.bf16.mxu0 %v5692_v3  ;;  %v5885_v2 = vcombine.low %v1084_v54, %v1088_v55  ;;  %v5750_v3 = vcombine.high %v948_v60, %v952_v61  ;;  %v5878_v4 = vcombine.high %v1076_v62, %v1080_v63  ;;  %v1036_v38 = vld [vmem:[#allocation11 + $0x340] sm:$0xff] }
 0x19b   :  { %v1040_v39 = vld [vmem:[#allocation11 + $0x360] sm:$0xff] }
 0x19c   :  { %v1164_v40 = vld [vmem:[#allocation11 + $0x740] sm:$0xff] }
 0x19d   :  { %845 = vmatpush1.bf16.msra.mxu1 %v5689_v8  ;;  %886 = vmatpush1.bf16.msra.mxu0 %v5691_v9  ;;  %v1072_v8 = vld [vmem:[#allocation11 + $0x460] sm:$0xff]  ;;  %v5749_v9 = vcombine.low %v948_v60, %v952_v61 }
 0x19e   :  { %846 = vmatprep.subr.bf16.mxu1 %v5682_v10  ;;  %887 = vmatprep.subr.bf16.mxu0 %v5684_v11  ;;  %v5877_v10 = vcombine.low %v1076_v62, %v1080_v63  ;;  %v5742_v11 = vcombine.high %v940_v5, %v944_v6  ;;  %v5870_v12 = vcombine.high %v1068_v7, %v1072_v8  ;;  %v1028_v46 = vld [vmem:[#allocation11 + $0x300] sm:$0xff] }
 0x19f   :  { %v1024_v54 = vld [vmem:[#allocation11 + $0x2e0] sm:$0xff] }
 0x1a0   :  { %v1148_v55 = vld [vmem:[#allocation11 + $0x6c0] sm:$0xff] }
 0x1a1   :  { %847 = vmatpush1.bf16.msra.mxu1 %v5681_v16  ;;  %888 = vmatpush1.bf16.msra.mxu0 %v5683_v17  ;;  %v1064_v16 = vld [vmem:[#allocation11 + $0x420] sm:$0xff]  ;;  %v5741_v17 = vcombine.low %v940_v5, %v944_v6 }
 0x1a2   :  { %848 = vmatprep.subr.bf16.mxu1 %v5674_v18  ;;  %889 = vmatprep.subr.bf16.mxu0 %v5676_v19  ;;  %v5869_v18 = vcombine.low %v1068_v7, %v1072_v8  ;;  %v5734_v19 = vcombine.high %v932_v13, %v936_v14  ;;  %v5862_v20 = vcombine.high %v1060_v15, %v1064_v16  ;;  %v7102_v61 = vld [vmem:[#allocation11 + $0xde0] sm:$0xff] }
 0x1a3   :  { %v1016_v5 = vld [vmem:[#allocation11 + $0x2a0] sm:$0xff] }
 0x1a4   :  { %v1140_v6 = vld [vmem:[#allocation11 + $0x680] sm:$0xff] }
 0x1a5   :  { %849 = vmatpush1.bf16.msra.mxu1 %v5673_v24  ;;  %890 = vmatpush1.bf16.msra.mxu0 %v5675_v25  ;;  %v1184_v24 = vld [vmem:[#allocation11 + $0x7e0] sm:$0xff]  ;;  %v5733_v25 = vcombine.low %v932_v13, %v936_v14 }
 0x1a6   :  { %4046 = vmatprep.subr.bf16.mxu1 %v5790_v26  ;;  %4087 = vmatprep.subr.bf16.mxu0 %v5918_v27  ;;  %v5861_v26 = vcombine.low %v1060_v15, %v1064_v16  ;;  %v5854_v27 = vcombine.high %v1052_v21, %v1056_v22  ;;  %v5982_v28 = vcombine.high %v1180_v23, %v1184_v24  ;;  %v1144_v7 = vld [vmem:[#allocation11 + $0x6a0] sm:$0xff] }
 0x1a7   :  { %v1008_v13 = vld [vmem:[#allocation11 + $0x260] sm:$0xff] }
 0x1a8   :  { %867 = vmatmul.mubr.bf16.vlgmr.msra.gmra.mxu1 %v7090_v31  ;;  %908 = vmatmul.mubr.bf16.vlgmr.msra.gmra.mxu0 %v7090_v31  ;;  %v5894_v31 = vcombine.high %v1092_v47, %v1096_v48  ;;  %v1032_v47 = vld [vmem:[#allocation11 + $0x320] sm:$0xff] }
 0x1a9   :  { %4047 = vmatpush1.bf16.msra.mxu1 %v5789_v33  ;;  %4088 = vmatpush1.bf16.msra.mxu0 %v5917_v34  ;;  %v1176_v33 = vld [vmem:[#allocation11 + $0x7a0] sm:$0xff]  ;;  %v5853_v34 = vcombine.low %v1052_v21, %v1056_v22  ;;  %v5830_v52 = vcombine.high %v1028_v46, %v1032_v47  ;;  %v5829_v60 = vcombine.low %v1028_v46, %v1032_v47 }
 0x1aa   :  { %4048 = vmatprep.subr.bf16.mxu1 %v5782_v35  ;;  %4089 = vmatprep.subr.bf16.mxu0 %v5910_v36  ;;  %v5981_v35 = vcombine.low %v1180_v23, %v1184_v24  ;;  %v5846_v36 = vcombine.high %v1044_v29, %v1048_v30  ;;  %v5974_v37 = vcombine.high %v1172_v32, %v1176_v33  ;;  %v1156_v48 = vld [vmem:[#allocation11 + $0x700] sm:$0xff] }
 0x1ab   :  { %v1132_v14 = vld [vmem:[#allocation11 + $0x640] sm:$0xff] }
 0x1ac   :  { %v1136_v15 = vld [vmem:[#allocation11 + $0x660] sm:$0xff] }
 0x1ad   :  { %4049 = vmatpush1.bf16.msra.mxu1 %v5781_v41  ;;  %4090 = vmatpush1.bf16.msra.mxu0 %v5909_v42  ;;  %v1168_v41 = vld [vmem:[#allocation11 + $0x760] sm:$0xff]  ;;  %v5845_v42 = vcombine.low %v1044_v29, %v1048_v30 }
 0x1ae   :  { %4050 = vmatprep.subr.bf16.mxu1 %v5774_v43  ;;  %4091 = vmatprep.subr.bf16.mxu0 %v5902_v44  ;;  %v5973_v43 = vcombine.low %v1172_v32, %v1176_v33  ;;  %v5838_v44 = vcombine.high %v1036_v38, %v1040_v39  ;;  %v5966_v45 = vcombine.high %v1164_v40, %v1168_v41  ;;  %v1000_v21 = vld [vmem:[#allocation11 + $0x220] sm:$0xff]  ;;  %v392_v33 = vlaneseq }
 0x1af   :  { %v1124_v22 = vld [vmem:[#allocation11 + $0x600] sm:$0xff] }
 0x1b0   :  { %v1128_v23 = vld [vmem:[#allocation11 + $0x620] sm:$0xff] }
 0x1b1   :  { %4051 = vmatpush1.bf16.msra.mxu1 %v5773_v49  ;;  %4092 = vmatpush1.bf16.msra.mxu0 %v5901_v50  ;;  %v1160_v49 = vld [vmem:[#allocation11 + $0x720] sm:$0xff]  ;;  %v5837_v50 = vcombine.low %v1036_v38, %v1040_v39  ;;  %v5925_v29 = vcombine.low %v1124_v22, %v1128_v23 }
 0x1b2   :  { %4052 = vmatprep.subr.bf16.mxu1 %v5766_v51  ;;  %4093 = vmatprep.subr.bf16.mxu0 %v5894_v31  ;;  %v5965_v51 = vcombine.low %v1164_v40, %v1168_v41  ;;  %v1020_v31 = vld [vmem:[#allocation11 + $0x2c0] sm:$0xff]  ;;  %v5958_v53 = vcombine.high %v1156_v48, %v1160_v49  ;;  %v5957_v62 = vcombine.low %v1156_v48, %v1160_v49 }
 0x1b3   :  { %v5821_v8 = vcombine.low %v1020_v31, %v1024_v54 }
 0x1b5   :  { %4053 = vmatpush1.bf16.msra.mxu1 %v5765_v56  ;;  %4094 = vmatpush1.bf16.msra.mxu0 %v5893_v57  ;;  %v1152_v56 = vld [vmem:[#allocation11 + $0x6e0] sm:$0xff] }
 0x1b6   :  { %4054 = vmatprep.subr.bf16.mxu1 %v5758_v58  ;;  %4095 = vmatprep.subr.bf16.mxu0 %v5886_v59  ;;  %v7096_v57 = vld [vmem:[#allocation11 + $0x9c0] sm:$0xff] }
 0x1b7   :  { %v7098_v58 = vld [vmem:[#allocation11 + $0x9e0] sm:$0xff] }
 0x1b8   :  { %v7100_v59 = vld [vmem:[#allocation11 + $0xdc0] sm:$0xff]  ;;  %v6045_v63 = vcombine.low %v7096_v57, %v7098_v58  ;;  %v6046_v30 = vcombine.high %v7096_v57, %v7098_v58 }
 0x1b9   :  { %4055 = vmatpush1.bf16.msra.mxu1 %v5757_v1  ;;  %4096 = vmatpush1.bf16.msra.mxu0 %v5885_v2  ;;  %v6173_v1 = vcombine.low %v7100_v59, %v7102_v61  ;;  %v5822_v2 = vcombine.high %v1020_v31, %v1024_v54  ;;  %v6174_v32 = vcombine.high %v7100_v59, %v7102_v61  ;;  %v1212_v59 = vld [vmem:[#allocation11 + $0x8c0] sm:$0xff] }
 0x1ba   :  { %4056 = vmatprep.subr.bf16.mxu1 %v5750_v3  ;;  %4097 = vmatprep.subr.bf16.mxu0 %v5878_v4  ;;  %v5950_v3 = vcombine.high %v1148_v55, %v1152_v56  ;;  %v1012_v4 = vld [vmem:[#allocation11 + $0x280] sm:$0xff] }
 0x1bb   :  { %v5813_v16 = vcombine.low %v1012_v4, %v1016_v5  ;;  %v1216_v61 = vld [vmem:[#allocation11 + $0x8e0] sm:$0xff] }
 0x1bd   :  { %4057 = vmatpush1.bf16.msra.mxu1 %v5749_v9  ;;  %4098 = vmatpush1.bf16.msra.mxu0 %v5877_v10  ;;  %v5949_v9 = vcombine.low %v1148_v55, %v1152_v56  ;;  %v5814_v10 = vcombine.high %v1012_v4, %v1016_v5  ;;  %v1236_v55 = vld [vmem:[#allocation11 + $0x980] sm:$0xff] }
 0x1be   :  { %4058 = vmatprep.subr.bf16.mxu1 %v5742_v11  ;;  %4099 = vmatprep.subr.bf16.mxu0 %v5870_v12  ;;  %v5942_v11 = vcombine.high %v1140_v6, %v1144_v7  ;;  %v1004_v12 = vld [vmem:[#allocation11 + $0x240] sm:$0xff] }
 0x1bf   :  { %v5805_v24 = vcombine.low %v1004_v12, %v1008_v13 }
 0x1c1   :  { %4059 = vmatpush1.bf16.msra.mxu1 %v5741_v17  ;;  %4100 = vmatpush1.bf16.msra.mxu0 %v5869_v18  ;;  %v5941_v17 = vcombine.low %v1140_v6, %v1144_v7  ;;  %v5806_v18 = vcombine.high %v1004_v12, %v1008_v13  ;;  %v1228_v12 = vld [vmem:[#allocation11 + $0x940] sm:$0xff] }
 0x1c2   :  { %4060 = vmatprep.subr.bf16.mxu1 %v5734_v19  ;;  %4101 = vmatprep.subr.bf16.mxu0 %v5862_v20  ;;  %v5934_v19 = vcombine.high %v1132_v14, %v1136_v15  ;;  %v996_v20 = vld [vmem:[#allocation11 + $0x200] sm:$0xff] }
 0x1c3   :  { %v1232_v13 = vld [vmem:[#allocation11 + $0x960] sm:$0xff] }
 0x1c5   :  { %4061 = vmatpush1.bf16.msra.mxu1 %v5733_v25  ;;  %4102 = vmatpush1.bf16.msra.mxu0 %v5861_v26  ;;  %v5933_v25 = vcombine.low %v1132_v14, %v1136_v15  ;;  %v5798_v26 = vcombine.high %v996_v20, %v1000_v21  ;;  %v1356_v14 = vld [vmem:[#allocation11 + $0xd40] sm:$0xff] }
 0x1c6   :  { %4062 = vmatprep.subr.bf16.mxu1 %v5854_v27  ;;  %4103 = vmatprep.subr.bf16.mxu0 %v5982_v28  ;;  %v5926_v27 = vcombine.high %v1124_v22, %v1128_v23  ;;  %v5797_v28 = vcombine.low %v996_v20, %v1000_v21  ;;  %v1360_v15 = vld [vmem:[#allocation11 + $0xd60] sm:$0xff] }
 0x1c7   :  { %v1220_v20 = vld [vmem:[#allocation11 + $0x900] sm:$0xff] }
 0x1c8   :  { %v1224_v21 = vld [vmem:[#allocation11 + $0x920] sm:$0xff] }
 0x1c9   :  { %4063 = vmatpush2.bf16.msra.mxu1 %v5853_v34  ;;  %4104 = vmatpush2.bf16.msra.mxu0 %v5981_v35  ;;  %v7112_v34 = vshrl.u32 %v392_v33, 7  ;;  %v1348_v22 = vld [vmem:[#allocation11 + $0xd00] sm:$0xff]  ;;  %v6022_v57 = vcombine.high %v1220_v20, %v1224_v21 }
 0x1ca   :  { %4064 = vmatprep.subr.bf16.mxu1 %v5846_v36  ;;  %4105 = vmatprep.subr.bf16.mxu0 %v5974_v37  ;;  %v7116_v37 = vld [vmem:[#allocation10] sm:$0xff]  ;;  %v1352_v23 = vld [vmem:[#allocation11 + $0xd20] sm:$0xff] }
 0x1cb   :  { %v394_v35 = vsub.s32 0, %v7112_v34  ;;  %v402_v36 = vsub.s32 2, %v7112_v34  ;;  %v398_v38 = vsub.s32 1, %v7112_v34  ;;  %v406_v39 = vsub.s32 3, %v7112_v34  ;;  %v1332_v33 = vld [vmem:[#allocation11 + $0xc80] sm:$0xff] }
 0x1cc   :  { %v6150_v58 = vcombine.high %v1348_v22, %v1352_v23 }
 0x1cd   :  { %4065 = vmatpush2.bf16.msra.mxu1 %v5845_v42  ;;  %4106 = vmatpush2.bf16.msra.mxu0 %v5973_v43  ;;  %v395_v40 = vrot.slane %v7116_v37, %v394_v35  ;;  %v403_v41 = vrot.slane %v7116_v37, %v402_v36  ;;  %v399_v42 = vrot.slane %v7116_v37, %v398_v38 }
 0x1ce   :  { %4066 = vmatprep.subr.bf16.mxu1 %v5838_v44  ;;  %4107 = vmatprep.subr.bf16.mxu0 %v5966_v45  ;;  %v407_v43 = vrot.slane %v7116_v37, %v406_v39 }
 0x1d1   :  { %4067 = vmatpush2.bf16.msra.mxu1 %v5837_v50  ;;  %4108 = vmatpush2.bf16.msra.mxu0 %v5965_v51 }
 0x1d2   :  { %4068 = vmatprep.subr.bf16.mxu1 %v5830_v52  ;;  %4109 = vmatprep.subr.bf16.mxu0 %v5958_v53 }
 0x1d5   :  { %4069 = vmatpush2.bf16.msra.mxu1 %v5829_v60  ;;  %4110 = vmatpush2.bf16.msra.mxu0 %v5957_v62  ;;  %v1240_v62 = vld [vmem:[#allocation11 + $0x9a0] sm:$0xff] }
 0x1d6   :  { %4070 = vmatprep.subr.bf16.mxu1 %v5822_v2  ;;  %4111 = vmatprep.subr.bf16.mxu0 %v5950_v3  ;;  %v1364_v2 = vld [vmem:[#allocation11 + $0xd80] sm:$0xff] }
 0x1d7   :  { %v1368_v3 = vld [vmem:[#allocation11 + $0xda0] sm:$0xff] }
 0x1d9   :  { %4071 = vmatpush2.bf16.msra.mxu1 %v5821_v8  ;;  %4112 = vmatpush2.bf16.msra.mxu0 %v5949_v9 }
 0x1da   :  { %4072 = vmatprep.subr.bf16.mxu1 %v5814_v10  ;;  %4113 = vmatprep.subr.bf16.mxu0 %v5942_v11  ;;  %v6038_v10 = vcombine.high %v1236_v55, %v1240_v62  ;;  %v6166_v11 = vcombine.high %v1364_v2, %v1368_v3 }
 0x1dd   :  { %4073 = vmatpush2.bf16.msra.mxu1 %v5813_v16  ;;  %4114 = vmatpush2.bf16.msra.mxu0 %v5941_v17  ;;  %v6037_v16 = vcombine.low %v1236_v55, %v1240_v62  ;;  %v6165_v17 = vcombine.low %v1364_v2, %v1368_v3  ;;  %v1192_v55 = vld [vmem:[#allocation11 + $0x820] sm:$0xff] }
 0x1de   :  { %4074 = vmatprep.subr.bf16.mxu1 %v5806_v18  ;;  %4115 = vmatprep.subr.bf16.mxu0 %v5934_v19  ;;  %v6030_v18 = vcombine.high %v1228_v12, %v1232_v13  ;;  %v6158_v19 = vcombine.high %v1356_v14, %v1360_v15 }
 0x1e1   :  { %4075 = vmatpush2.bf16.msra.mxu1 %v5805_v24  ;;  %4116 = vmatpush2.bf16.msra.mxu0 %v5933_v25  ;;  %v6029_v24 = vcombine.low %v1228_v12, %v1232_v13  ;;  %v6157_v25 = vcombine.low %v1356_v14, %v1360_v15  ;;  %v1308_v13 = vld [vmem:[#allocation11 + $0xbc0] sm:$0xff] }
 0x1e2   :  { %4076 = vmatprep.subr.bf16.mxu1 %v5798_v26  ;;  %4117 = vmatprep.subr.bf16.mxu0 %v5926_v27  ;;  %v6021_v26 = vcombine.low %v1220_v20, %v1224_v21  ;;  %v6149_v27 = vcombine.low %v1348_v22, %v1352_v23  ;;  %v1312_v14 = vld [vmem:[#allocation11 + $0xbe0] sm:$0xff] }
 0x1e3   :  { %v1436_v15 = vld [vmem:[#allocation11 + $0xfc0] sm:$0xff] }
 0x1e5   :  { %4077 = vmatpush2.bf16.msra.mxu1 %v5797_v28  ;;  %4118 = vmatpush2.bf16.msra.mxu0 %v5925_v29  ;;  %v6014_v28 = vcombine.high %v1212_v59, %v1216_v61 }
 0x1e6   :  { %4128 = vmatprep.subr.bf16.mxu1 %v6046_v30  ;;  %4169 = vmatprep.subr.bf16.mxu0 %v6174_v32  ;;  %v1204_v30 = vld [vmem:[#allocation11 + $0x880] sm:$0xff] }
 0x1e7   :  { %v1208_v32 = vld [vmem:[#allocation11 + $0x8a0] sm:$0xff] }
 0x248   :  { %v786_v44 = vpop.f32.mrf.mxu1  ;;  %v827_v45 = vpop.f32.mrf.mxu0 }
 0x249   :  { %v787_v46 = vadd.f32 %v786_v44, %v395_v40  ;;  %v828_v47 = vadd.f32 %v827_v45, %v403_v41  ;;  %v1336_v40 = vld [vmem:[#allocation11 + $0xca0] sm:$0xff]  ;;  %v6013_v41 = vcombine.low %v1212_v59, %v1216_v61 }
 0x24a   :  { %v788_v48 = vpop.f32.mrf.mxu1  ;;  %v829_v49 = vpop.f32.mrf.mxu0  ;;  %v6134_v44 = vcombine.high %v1332_v33, %v1336_v40  ;;  %v1196_v45 = vld [vmem:[#allocation11 + $0x840] sm:$0xff] }
 0x24b   :  { %v789_v50 = vadd.f32 %v788_v48, %v399_v42  ;;  %v830_v51 = vadd.f32 %v829_v49, %v407_v43  ;;  %v916_v31 = vmax.f32 %v787_v46, 0.0  ;;  %v918_v52 = vmax.f32 %v828_v47, 0.0  ;;  %v1200_v46 = vld [vmem:[#allocation11 + $0x860] sm:$0xff] }
 0x24c   :  { %v790_v53 = vpop.f32.mrf.mxu1  ;;  %v831_v54 = vpop.f32.mrf.mxu0  ;;  %v6006_v43 = vcombine.high %v1204_v30, %v1208_v32  ;;  %v1324_v47 = vld [vmem:[#allocation11 + $0xc40] sm:$0xff]  ;;  %v414_v49 = vsub.s32 5, %v7112_v34  ;;  %v5997_v3 = vcombine.low %v1196_v45, %v1200_v46 }
 0x24d   :  { %v917_v56 = vmax.f32 %v789_v50, 0.0  ;;  %v919_v60 = vmax.f32 %v830_v51, 0.0  ;;  %v7136_v8 = vpack.c.bf16 %v916_v31, %v916_v31  ;;  %v7138_v9 = vpack.c.bf16 %v918_v52, %v918_v52  ;;  %v1328_v48 = vld [vmem:[#allocation11 + $0xc60] sm:$0xff] }
 0x24e   :  { %v791_v4 = vpop.f32.mrf.mxu1  ;;  %v832_v5 = vpop.f32.mrf.mxu0  ;;  %v6005_v50 = vcombine.low %v1204_v30, %v1208_v32  ;;  %v6133_v51 = vcombine.low %v1332_v33, %v1336_v40  ;;  %v422_v31 = vsub.s32 7, %v7112_v34  ;;  %v5998_v52 = vcombine.high %v1196_v45, %v1200_v46  ;;  %v1188_v54 = vld [vmem:[#allocation11 + $0x800] sm:$0xff] }
 0x24f   :  { %v7132_v6 = vpack.c.bf16 %v917_v56, %v917_v56  ;;  %v7134_v7 = vpack.c.bf16 %v919_v60, %v919_v60  ;;  %v6126_v53 = vcombine.high %v1324_v47, %v1328_v48  ;;  %v1316_v56 = vld [vmem:[#allocation11 + $0xc00] sm:$0xff]  ;;  %v415_v62 = vrot.slane %v7116_v37, %v414_v49 }
 0x250   :  { %v1320_v60 = vld [vmem:[#allocation11 + $0xc20] sm:$0xff]  ;;  %v423_v2 = vrot.slane %v7116_v37, %v422_v31  ;;  %v6125_v4 = vcombine.low %v1324_v47, %v1328_v48 }
 0x251   :  { %4078 = vmatprep.mubr.bf16.mxu1 %v7132_v6  ;;  %4119 = vmatprep.mubr.bf16.mxu0 %v7134_v7  ;;  %v6118_v12 = vcombine.high %v1316_v56, %v1320_v60  ;;  %v6117_v22 = vcombine.low %v1316_v56, %v1320_v60  ;;  %v1424_v45 = vld [vmem:[#allocation11 + $0xf60] sm:$0xff] }
 0x252   :  { %4079 = vmatmul.mubr.bf16.vlgmr.msra.gmra.mxu1 %v7136_v8  ;;  %4120 = vmatmul.mubr.bf16.vlgmr.msra.gmra.mxu0 %v7138_v9 }
 0x253   :  { %4129 = vmatpush1.bf16.msra.mxu1 %v6045_v63  ;;  %4170 = vmatpush1.bf16.msra.mxu0 %v6173_v1  ;;  %v1340_v63 = vld [vmem:[#allocation11 + $0xcc0] sm:$0xff] }
 0x254   :  { %4130 = vmatprep.subr.bf16.mxu1 %v6038_v10  ;;  %4171 = vmatprep.subr.bf16.mxu0 %v6166_v11  ;;  %v1344_v1 = vld [vmem:[#allocation11 + $0xce0] sm:$0xff]  ;;  %v5990_v11 = vcombine.high %v1188_v54, %v1192_v55 }
 0x255   :  { %v6142_v29 = vcombine.high %v1340_v63, %v1344_v1  ;;  %v6141_v42 = vcombine.low %v1340_v63, %v1344_v1  ;;  %v1304_v63 = vld [vmem:[#allocation11 + $0xba0] sm:$0xff] }
 0x256   :  { %v1428_v1 = vld [vmem:[#allocation11 + $0xf80] sm:$0xff] }
 0x257   :  { %4131 = vmatpush1.bf16.msra.mxu1 %v6037_v16  ;;  %4172 = vmatpush1.bf16.msra.mxu0 %v6165_v17  ;;  %v1440_v16 = vld [vmem:[#allocation11 + $0xfe0] sm:$0xff] }
 0x258   :  { %4132 = vmatprep.subr.bf16.mxu1 %v6030_v18  ;;  %4173 = vmatprep.subr.bf16.mxu0 %v6158_v19  ;;  %v5989_v19 = vcombine.low %v1188_v54, %v1192_v55  ;;  %v6237_v33 = vcombine.low %v1436_v15, %v1440_v16  ;;  %v1416_v54 = vld [vmem:[#allocation11 + $0xf20] sm:$0xff] }
 0x25b   :  { %4133 = vmatpush1.bf16.msra.mxu1 %v6029_v24  ;;  %4174 = vmatpush1.bf16.msra.mxu0 %v6157_v25  ;;  %v6110_v25 = vcombine.high %v1308_v13, %v1312_v14 }
 0x25c   :  { %4134 = vmatprep.subr.bf16.mxu1 %v6022_v57  ;;  %4175 = vmatprep.subr.bf16.mxu0 %v6150_v58  ;;  %v6238_v57 = vcombine.high %v1436_v15, %v1440_v16  ;;  %v1300_v58 = vld [vmem:[#allocation11 + $0xb80] sm:$0xff] }
 0x25d   :  { %v6102_v40 = vcombine.high %v1300_v58, %v1304_v63  ;;  %v6101_v46 = vcombine.low %v1300_v58, %v1304_v63  ;;  %v1268_v16 = vld [vmem:[#allocation11 + $0xa80] sm:$0xff] }
 0x25e   :  { %v1264_v58 = vld [vmem:[#allocation11 + $0xa60] sm:$0xff] }
 0x25f   :  { %4135 = vmatpush1.bf16.msra.mxu1 %v6021_v26  ;;  %4176 = vmatpush1.bf16.msra.mxu0 %v6149_v27  ;;  %v1432_v26 = vld [vmem:[#allocation11 + $0xfa0] sm:$0xff] }
 0x260   :  { %4136 = vmatprep.subr.bf16.mxu1 %v6014_v28  ;;  %4177 = vmatprep.subr.bf16.mxu0 %v6142_v29  ;;  %v6109_v29 = vcombine.low %v1308_v13, %v1312_v14  ;;  %v6229_v47 = vcombine.low %v1428_v1, %v1432_v26 }
 0x263   :  { %4137 = vmatpush1.bf16.msra.mxu1 %v6013_v41  ;;  %4178 = vmatpush1.bf16.msra.mxu0 %v6141_v42  ;;  %v6230_v41 = vcombine.high %v1428_v1, %v1432_v26  ;;  %v1292_v42 = vld [vmem:[#allocation11 + $0xb40] sm:$0xff] }
 0x264   :  { %4138 = vmatprep.subr.bf16.mxu1 %v6006_v43  ;;  %4179 = vmatprep.subr.bf16.mxu0 %v6134_v44  ;;  %v1296_v43 = vld [vmem:[#allocation11 + $0xb60] sm:$0xff] }
 0x265   :  { %v1420_v44 = vld [vmem:[#allocation11 + $0xf40] sm:$0xff]  ;;  %v6094_v48 = vcombine.high %v1292_v42, %v1296_v43  ;;  %v6093_v55 = vcombine.low %v1292_v42, %v1296_v43 }
 0x266   :  { %v6221_v56 = vcombine.low %v1420_v44, %v1424_v45  ;;  %v1384_v42 = vld [vmem:[#allocation11 + $0xe20] sm:$0xff] }
 0x267   :  { %4139 = vmatpush1.bf16.msra.mxu1 %v6005_v50  ;;  %4180 = vmatpush1.bf16.msra.mxu0 %v6133_v51  ;;  %v6222_v50 = vcombine.high %v1420_v44, %v1424_v45  ;;  %v1284_v51 = vld [vmem:[#allocation11 + $0xb00] sm:$0xff] }
 0x268   :  { %v7158_v5 = vpop.f32.mrf.mxu1  ;;  %v7160_v10 = vpop.f32.mrf.mxu0  ;;  %4140 = vmatprep.subr.bf16.mxu1 %v5998_v52  ;;  %4181 = vmatprep.subr.bf16.mxu0 %v6126_v53  ;;  %v1288_v52 = vld [vmem:[#allocation11 + $0xb20] sm:$0xff] }
 0x269   :  { %v1412_v53 = vld [vmem:[#allocation11 + $0xf00] sm:$0xff]  ;;  %v6086_v60 = vcombine.high %v1284_v51, %v1288_v52 }
 0x26a   :  { %v870_v17 = vpop.f32.mrf.mxu1  ;;  %v911_v18 = vpop.f32.mrf.mxu0  ;;  %v6213_v13 = vcombine.low %v1412_v53, %v1416_v54 }
 0x26b   :  { %v871_v20 = vadd.f32 %v870_v17, %v415_v62  ;;  %v912_v21 = vadd.f32 %v911_v18, %v423_v2  ;;  %4141 = vmatpush1.bf16.msra.mxu1 %v5997_v3  ;;  %4182 = vmatpush1.bf16.msra.mxu0 %v6125_v4  ;;  %v6214_v62 = vcombine.high %v1412_v53, %v1416_v54  ;;  %v1276_v2 = vld [vmem:[#allocation11 + $0xac0] sm:$0xff] }
 0x26c   :  { %v872_v23 = vpop.f32.mrf.mxu1  ;;  %v913_v24 = vpop.f32.mrf.mxu0  ;;  %4142 = vmatprep.subr.bf16.mxu1 %v5990_v11  ;;  %4183 = vmatprep.subr.bf16.mxu0 %v6118_v12  ;;  %v1280_v3 = vld [vmem:[#allocation11 + $0xae0] sm:$0xff]  ;;  %v6085_v12 = vcombine.low %v1284_v51, %v1288_v52  ;;  %v1117_v51 = vld [vmem:[#allocation11 + $0x5c8] sm:$0xff] }
 0x26d   :  { %v921_v59 = vmax.f32 %v871_v20, 0.0  ;;  %v923_v61 = vmax.f32 %v912_v21, 0.0  ;;  %v1404_v4 = vld [vmem:[#allocation11 + $0xec0] sm:$0xff]  ;;  %v6078_v14 = vcombine.high %v1276_v2, %v1280_v3  ;;  %v410_v20 = vsub.s32 4, %v7112_v34  ;;  %v1121_v52 = vld [vmem:[#allocation11 + $0x5e8] sm:$0xff] }
 0x26e   :  { %v873_v27 = vpop.f32.mrf.mxu1  ;;  %v914_v28 = vpop.f32.mrf.mxu0  ;;  %v1408_v11 = vld [vmem:[#allocation11 + $0xee0] sm:$0xff]  ;;  %v6077_v21 = vcombine.low %v1276_v2, %v1280_v3  ;;  %v418_v23 = vsub.s32 6, %v7112_v34  ;;  %v985_v2 = vld [vmem:[#allocation11 + $0x1a8] sm:$0xff] }
 0x26f   :  { %v7162_v30 = vpack.c.bf16 %v921_v59, %v921_v59  ;;  %v7164_v32 = vpack.c.bf16 %v923_v61, %v923_v61  ;;  %4143 = vmatpush1.bf16.msra.mxu1 %v5989_v19  ;;  %4184 = vmatpush1.bf16.msra.mxu0 %v6117_v22  ;;  %v6206_v15 = vcombine.high %v1404_v4, %v1408_v11  ;;  %v1272_v17 = vld [vmem:[#allocation11 + $0xaa0] sm:$0xff]  ;;  %v1113_v3 = vld [vmem:[#allocation11 + $0x5a8] sm:$0xff] }
 0x270   :  { %4144 = vmatprep.subr.bf16.mxu1 %v6110_v25  ;;  %4185 = vmatprep.subr.bf16.mxu0 %v6238_v57  ;;  %v1396_v18 = vld [vmem:[#allocation11 + $0xe80] sm:$0xff]  ;;  %v6205_v22 = vcombine.low %v1404_v4, %v1408_v11  ;;  %v6070_v24 = vcombine.high %v1268_v16, %v1272_v17  ;;  %v411_v63 = vrot.slane %v7116_v37, %v410_v20 }
 0x271   :  { %4160 = vmatprep.mubr.bf16.mxu1 %v7162_v30  ;;  %4201 = vmatprep.mubr.bf16.mxu0 %v7164_v32  ;;  %v1400_v19 = vld [vmem:[#allocation11 + $0xea0] sm:$0xff]  ;;  %v6069_v1 = vcombine.low %v1268_v16, %v1272_v17  ;;  %v419_v27 = vrot.slane %v7116_v37, %v418_v23  ;;  %v973_v16 = vld [vmem:[#allocation11 + $0x148] sm:$0xff] }
 0x272   :  { %v6198_v25 = vcombine.high %v1396_v18, %v1400_v19  ;;  %v1260_v57 = vld [vmem:[#allocation11 + $0xa40] sm:$0xff]  ;;  %v6197_v26 = vcombine.low %v1396_v18, %v1400_v19  ;;  %v977_v17 = vld [vmem:[#allocation11 + $0x168] sm:$0xff] }
 0x273   :  { %4145 = vmatpush2.bf16.msra.mxu1 %v6109_v29  ;;  %4186 = vmatpush2.bf16.msra.mxu0 %v6237_v33  ;;  %v1388_v59 = vld [vmem:[#allocation11 + $0xe40] sm:$0xff]  ;;  %v6062_v28 = vcombine.high %v1260_v57, %v1264_v58  ;;  %v6061_v43 = vcombine.low %v1260_v57, %v1264_v58  ;;  %v1101_v18 = vld [vmem:[#allocation11 + $0x548] sm:$0xff] }
 0x274   :  { %4146 = vmatprep.subr.bf16.mxu1 %v6102_v40  ;;  %4187 = vmatprep.subr.bf16.mxu0 %v6230_v41  ;;  %v1392_v61 = vld [vmem:[#allocation11 + $0xe60] sm:$0xff]  ;;  %v1105_v19 = vld [vmem:[#allocation11 + $0x568] sm:$0xff] }
 0x275   :  { %v6190_v29 = vcombine.high %v1388_v59, %v1392_v61  ;;  %v1252_v33 = vld [vmem:[#allocation11 + $0xa00] sm:$0xff]  ;;  %v6189_v44 = vcombine.low %v1388_v59, %v1392_v61  ;;  %v965_v57 = vld [vmem:[#allocation11 + $0x108] sm:$0xff] }
 0x276   :  { %v1256_v40 = vld [vmem:[#allocation11 + $0xa20] sm:$0xff]  ;;  %v969_v58 = vld [vmem:[#allocation11 + $0x128] sm:$0xff] }
 0x277   :  { %4147 = vmatpush2.bf16.msra.mxu1 %v6101_v46  ;;  %4188 = vmatpush2.bf16.msra.mxu0 %v6229_v47  ;;  %v1380_v41 = vld [vmem:[#allocation11 + $0xe00] sm:$0xff]  ;;  %v6054_v45 = vcombine.high %v1252_v33, %v1256_v40  ;;  %v869_v46 = vadd.f32 %v7158_v5, %v411_v63  ;;  %v910_v47 = vadd.f32 %v7160_v10, %v419_v27  ;;  %v981_v5 = vld [vmem:[#allocation11 + $0x188] sm:$0xff] }
 0x278   :  { %4148 = vmatprep.subr.bf16.mxu1 %v6094_v48  ;;  %4189 = vmatprep.subr.bf16.mxu0 %v6222_v50  ;;  %v6182_v37 = vcombine.high %v1380_v41, %v1384_v42  ;;  %v989_v48 = vld [vmem:[#allocation11 + $0x1c8] sm:$0xff]  ;;  %v6053_v53 = vcombine.low %v1252_v33, %v1256_v40  ;;  %v6181_v54 = vcombine.low %v1380_v41, %v1384_v42 }
 0x279   :  { %v993_v50 = vld [vmem:[#allocation11 + $0x1e8] sm:$0xff]  ;;  %v5775_v63 = vcombine.low %v973_v16, %v977_v17  ;;  %v5767_v41 = vcombine.low %v965_v57, %v969_v58 }
 0x27a   :  { %v1109_v10 = vld [vmem:[#allocation11 + $0x588] sm:$0xff]  ;;  %v5791_v4 = vcombine.low %v989_v48, %v993_v50 }
 0x27b   :  { %4149 = vmatpush2.bf16.msra.mxu1 %v6093_v55  ;;  %4190 = vmatpush2.bf16.msra.mxu0 %v6221_v56  ;;  %v920_v55 = vmax.f32 %v869_v46, 0.0  ;;  %v922_v56 = vmax.f32 %v910_v47, 0.0  ;;  %v1093_v59 = vld [vmem:[#allocation11 + $0x508] sm:$0xff] }
 0x27c   :  { %4150 = vmatprep.subr.bf16.mxu1 %v6086_v60  ;;  %4191 = vmatprep.subr.bf16.mxu0 %v6214_v62  ;;  %v5792_v60 = vcombine.high %v989_v48, %v993_v50  ;;  %v5920_v62 = vcombine.high %v1117_v51, %v1121_v52  ;;  %v1097_v61 = vld [vmem:[#allocation11 + $0x528] sm:$0xff] }
 0x27d   :  { %v7178_v11 = vpack.c.bf16 %v920_v55, %v920_v55  ;;  %v5896_v27 = vcombine.high %v1093_v59, %v1097_v61  ;;  %v1085_v33 = vld [vmem:[#allocation11 + $0x4c8] sm:$0xff]  ;;  %v5895_v42 = vcombine.low %v1093_v59, %v1097_v61 }
 0x27e   :  { %v1089_v40 = vld [vmem:[#allocation11 + $0x4e8] sm:$0xff] }
 0x27f   :  { %4151 = vmatpush2.bf16.msra.mxu1 %v6085_v12  ;;  %4192 = vmatpush2.bf16.msra.mxu0 %v6213_v13  ;;  %v7180_v12 = vpack.c.bf16 %v922_v56, %v922_v56  ;;  %v5919_v13 = vcombine.low %v1117_v51, %v1121_v52  ;;  %v953_v46 = vld [vmem:[#allocation11 + $0xa8] sm:$0xff]  ;;  %v5887_v50 = vcombine.low %v1085_v33, %v1089_v40 }
 0x280   :  { %4152 = vmatprep.subr.bf16.mxu1 %v6078_v14  ;;  %4193 = vmatprep.subr.bf16.mxu0 %v6206_v15  ;;  %v5784_v14 = vcombine.high %v981_v5, %v985_v2  ;;  %v5912_v15 = vcombine.high %v1109_v10, %v1113_v3  ;;  %v1077_v47 = vld [vmem:[#allocation11 + $0x488] sm:$0xff] }
 0x281   :  { %v1069_v55 = vld [vmem:[#allocation11 + $0x448] sm:$0xff] }
 0x282   :  { %v1073_v56 = vld [vmem:[#allocation11 + $0x468] sm:$0xff] }
 0x283   :  { %4153 = vmatpush2.bf16.msra.mxu1 %v6077_v21  ;;  %4194 = vmatpush2.bf16.msra.mxu0 %v6205_v22  ;;  %v5783_v21 = vcombine.low %v981_v5, %v985_v2  ;;  %v5911_v22 = vcombine.low %v1109_v10, %v1113_v3  ;;  %v5872_v2 = vcombine.high %v1069_v55, %v1073_v56  ;;  %v933_v10 = vld [vmem:[#allocation11 + $0x8] sm:$0xff] }
 0x284   :  { %4154 = vmatprep.subr.bf16.mxu1 %v6070_v24  ;;  %4195 = vmatprep.subr.bf16.mxu0 %v6198_v25  ;;  %v5776_v24 = vcombine.high %v973_v16, %v977_v17  ;;  %v5904_v25 = vcombine.high %v1101_v18, %v1105_v19  ;;  %v937_v3 = vld [vmem:[#allocation11 + $0x28] sm:$0xff] }
 0x285   :  { %v5736_v16 = vcombine.high %v933_v10, %v937_v3  ;;  %v1045_v59 = vld [vmem:[#allocation11 + $0x388] sm:$0xff] }
 0x286   :  { %v1049_v61 = vld [vmem:[#allocation11 + $0x3a8] sm:$0xff] }
 0x287   :  { %4155 = vmatpush2.bf16.msra.mxu1 %v6069_v1  ;;  %4196 = vmatpush2.bf16.msra.mxu0 %v6197_v26  ;;  %v5903_v1 = vcombine.low %v1101_v18, %v1105_v19  ;;  %v5768_v26 = vcombine.high %v965_v57, %v969_v58  ;;  %v1053_v18 = vld [vmem:[#allocation11 + $0x3c8] sm:$0xff] }
 0x288   :  { %4156 = vmatprep.subr.bf16.mxu1 %v6062_v28  ;;  %4197 = vmatprep.subr.bf16.mxu0 %v6190_v29  ;;  %v957_v28 = vld [vmem:[#allocation11 + $0xc8] sm:$0xff] }
 0x289   :  { %v961_v29 = vld [vmem:[#allocation11 + $0xe8] sm:$0xff] }
 0x28a   :  { %v5759_v48 = vcombine.low %v957_v28, %v961_v29  ;;  %v1057_v19 = vld [vmem:[#allocation11 + $0x3e8] sm:$0xff] }
 0x28b   :  { %4157 = vmatpush2.bf16.msra.mxu1 %v6061_v43  ;;  %4198 = vmatpush2.bf16.msra.mxu0 %v6189_v44  ;;  %v5760_v43 = vcombine.high %v957_v28, %v961_v29  ;;  %v5888_v44 = vcombine.high %v1085_v33, %v1089_v40  ;;  %v5856_v57 = vcombine.high %v1053_v18, %v1057_v19  ;;  %v1037_v33 = vld [vmem:[#allocation11 + $0x348] sm:$0xff] }
 0x28c   :  { %4158 = vmatprep.subr.bf16.mxu1 %v6054_v45  ;;  %4199 = vmatprep.subr.bf16.mxu0 %v6182_v37  ;;  %v949_v45 = vld [vmem:[#allocation11 + $0x88] sm:$0xff]  ;;  %v5848_v28 = vcombine.high %v1045_v59, %v1049_v61 }
 0x28d   :  { %v1081_v37 = vld [vmem:[#allocation11 + $0x4a8] sm:$0xff]  ;;  %v5752_v51 = vcombine.high %v949_v45, %v953_v46 }
 0x28e   :  { %v5880_v52 = vcombine.high %v1077_v47, %v1081_v37  ;;  %v1041_v40 = vld [vmem:[#allocation11 + $0x368] sm:$0xff] }
 0x28f   :  { %4159 = vmatpush2.bf16.msra.mxu1 %v6053_v53  ;;  %4200 = vmatpush2.bf16.msra.mxu0 %v6181_v54  ;;  %v941_v53 = vld [vmem:[#allocation11 + $0x48] sm:$0xff] }
 0x290   :  { %4210 = vmatprep.subr.bf16.mxu1 %v5792_v60  ;;  %4251 = vmatprep.subr.bf16.mxu0 %v5920_v62  ;;  %v945_v54 = vld [vmem:[#allocation11 + $0x68] sm:$0xff]  ;;  %v5751_v60 = vcombine.low %v949_v45, %v953_v46  ;;  %v5879_v62 = vcombine.low %v1077_v47, %v1081_v37  ;;  %v5840_v45 = vcombine.high %v1037_v33, %v1041_v40 }
 0x291   :  { %v5744_v5 = vcombine.high %v941_v53, %v945_v54  ;;  %v1029_v47 = vld [vmem:[#allocation11 + $0x308] sm:$0xff] }
 0x292   :  { %4161 = vmatmul.mubr.bf16.vlgmr.msra.gmra.mxu1 %v7178_v11  ;;  %4202 = vmatmul.mubr.bf16.vlgmr.msra.gmra.mxu0 %v7180_v12  ;;  %v1033_v37 = vld [vmem:[#allocation11 + $0x328] sm:$0xff] }
 0x293   :  { %4211 = vmatpush1.bf16.msra.mxu1 %v5791_v4  ;;  %4242 = vmatprep.mubr.bf16.mxu1 %v7132_v6  ;;  %v1061_v4 = vld [vmem:[#allocation11 + $0x408] sm:$0xff] }
 0x294   :  { %4252 = vmatpush1.bf16.msra.mxu0 %v5919_v13  ;;  %4283 = vmatprep.mubr.bf16.mxu0 %v7134_v7  ;;  %v1065_v13 = vld [vmem:[#allocation11 + $0x428] sm:$0xff] }
 0x295   :  { %4212 = vmatprep.subr.bf16.mxu1 %v5784_v14  ;;  %4253 = vmatprep.subr.bf16.mxu0 %v5912_v15  ;;  %v5743_v14 = vcombine.low %v941_v53, %v945_v54  ;;  %v5871_v15 = vcombine.low %v1069_v55, %v1073_v56  ;;  %v5864_v17 = vcombine.high %v1061_v4, %v1065_v13  ;;  %v1021_v55 = vld [vmem:[#allocation11 + $0x2c8] sm:$0xff] }
 0x296   :  { %v5832_v53 = vcombine.high %v1029_v47, %v1033_v37  ;;  %v1025_v56 = vld [vmem:[#allocation11 + $0x2e8] sm:$0xff] }
 0x297   :  { %4213 = vmatpush1.bf16.msra.mxu1 %v5783_v21  ;;  %v1181_v21 = vld [vmem:[#allocation11 + $0x7c8] sm:$0xff] }
 0x298   :  { %4254 = vmatpush1.bf16.msra.mxu0 %v5911_v22  ;;  %4214 = vmatprep.subr.bf16.mxu1 %v5776_v24  ;;  %v1185_v22 = vld [vmem:[#allocation11 + $0x7e8] sm:$0xff]  ;;  %v5735_v24 = vcombine.low %v933_v10, %v937_v3  ;;  %v5824_v10 = vcombine.high %v1021_v55, %v1025_v56 }
 0x299   :  { %4255 = vmatprep.subr.bf16.mxu0 %v5904_v25  ;;  %v5863_v25 = vcombine.low %v1061_v4, %v1065_v13  ;;  %v5984_v58 = vcombine.high %v1181_v21, %v1185_v22  ;;  %v1013_v4 = vld [vmem:[#allocation11 + $0x288] sm:$0xff] }
 0x29a   :  { %v1017_v13 = vld [vmem:[#allocation11 + $0x2a8] sm:$0xff] }
 0x29b   :  { %4215 = vmatpush1.bf16.msra.mxu1 %v5775_v63  ;;  %v1173_v63 = vld [vmem:[#allocation11 + $0x788] sm:$0xff] }
 0x29c   :  { %4256 = vmatpush1.bf16.msra.mxu0 %v5903_v1  ;;  %4216 = vmatprep.subr.bf16.mxu1 %v5768_v26  ;;  %v1177_v1 = vld [vmem:[#allocation11 + $0x7a8] sm:$0xff]  ;;  %v5855_v26 = vcombine.low %v1053_v18, %v1057_v19  ;;  %v5816_v18 = vcombine.high %v1013_v4, %v1017_v13 }
 0x29d   :  { %4257 = vmatprep.subr.bf16.mxu0 %v5896_v27  ;;  %v5983_v27 = vcombine.low %v1181_v21, %v1185_v22  ;;  %v5976_v29 = vcombine.high %v1173_v63, %v1177_v1  ;;  %v1005_v21 = vld [vmem:[#allocation11 + $0x248] sm:$0xff] }
 0x29e   :  { %v1009_v22 = vld [vmem:[#allocation11 + $0x268] sm:$0xff] }
 0x29f   :  { %4217 = vmatpush1.bf16.msra.mxu1 %v5767_v41  ;;  %v1165_v41 = vld [vmem:[#allocation11 + $0x748] sm:$0xff] }
 0x2a0   :  { %4258 = vmatpush1.bf16.msra.mxu0 %v5895_v42  ;;  %4218 = vmatprep.subr.bf16.mxu1 %v5760_v43  ;;  %v1169_v42 = vld [vmem:[#allocation11 + $0x768] sm:$0xff]  ;;  %v5847_v43 = vcombine.low %v1045_v59, %v1049_v61  ;;  %v5808_v59 = vcombine.high %v1005_v21, %v1009_v22 }
 0x2a1   :  { %4259 = vmatprep.subr.bf16.mxu0 %v5888_v44  ;;  %v5975_v44 = vcombine.low %v1173_v63, %v1177_v1  ;;  %v5968_v46 = vcombine.high %v1165_v41, %v1169_v42  ;;  %v997_v63 = vld [vmem:[#allocation11 + $0x208] sm:$0xff] }
 0x2a2   :  { %v1001_v1 = vld [vmem:[#allocation11 + $0x228] sm:$0xff] }
 0x2a3   :  { %4219 = vmatpush1.bf16.msra.mxu1 %v5759_v48  ;;  %v1157_v48 = vld [vmem:[#allocation11 + $0x708] sm:$0xff] }
 0x2a4   :  { %4260 = vmatpush1.bf16.msra.mxu0 %v5887_v50  ;;  %4220 = vmatprep.subr.bf16.mxu1 %v5752_v51  ;;  %v1161_v50 = vld [vmem:[#allocation11 + $0x728] sm:$0xff]  ;;  %v5839_v51 = vcombine.low %v1037_v33, %v1041_v40  ;;  %v5800_v33 = vcombine.high %v997_v63, %v1001_v1 }
 0x2a5   :  { %4261 = vmatprep.subr.bf16.mxu0 %v5880_v52  ;;  %v5967_v52 = vcombine.low %v1165_v41, %v1169_v42  ;;  %v5960_v54 = vcombine.high %v1157_v48, %v1161_v50  ;;  %v1245_v41 = vld [vmem:[#allocation11 + $0x9c8] sm:$0xff] }
 0x2a6   :  { %v1249_v42 = vld [vmem:[#allocation11 + $0x9e8] sm:$0xff] }
 0x2a7   :  { %4221 = vmatpush1.bf16.msra.mxu1 %v5751_v60  ;;  %v1149_v60 = vld [vmem:[#allocation11 + $0x6c8] sm:$0xff] }
 0x2a8   :  { %4262 = vmatpush1.bf16.msra.mxu0 %v5879_v62  ;;  %4222 = vmatprep.subr.bf16.mxu1 %v5744_v5  ;;  %v1153_v62 = vld [vmem:[#allocation11 + $0x6e8] sm:$0xff]  ;;  %v5831_v5 = vcombine.low %v1029_v47, %v1033_v37  ;;  %v6048_v47 = vcombine.high %v1245_v41, %v1249_v42 }
 0x2a9   :  { %4263 = vmatprep.subr.bf16.mxu0 %v5872_v2  ;;  %v5959_v2 = vcombine.low %v1157_v48, %v1161_v50  ;;  %v5952_v3 = vcombine.high %v1149_v60, %v1153_v62  ;;  %v1237_v48 = vld [vmem:[#allocation11 + $0x988] sm:$0xff] }
 0x2aa   :  { %v1241_v50 = vld [vmem:[#allocation11 + $0x9a8] sm:$0xff] }
 0x2ab   :  { %4223 = vmatpush1.bf16.msra.mxu1 %v5743_v14  ;;  %v1141_v14 = vld [vmem:[#allocation11 + $0x688] sm:$0xff] }
 0x2ac   :  { %4264 = vmatpush1.bf16.msra.mxu0 %v5871_v15  ;;  %4224 = vmatprep.subr.bf16.mxu1 %v5736_v16  ;;  %v1145_v15 = vld [vmem:[#allocation11 + $0x6a8] sm:$0xff]  ;;  %v5823_v16 = vcombine.low %v1021_v55, %v1025_v56  ;;  %v6040_v55 = vcombine.high %v1237_v48, %v1241_v50 }
 0x2ad   :  { %4265 = vmatprep.subr.bf16.mxu0 %v5864_v17  ;;  %v5951_v17 = vcombine.low %v1149_v60, %v1153_v62  ;;  %v5944_v19 = vcombine.high %v1141_v14, %v1145_v15  ;;  %v1229_v56 = vld [vmem:[#allocation11 + $0x948] sm:$0xff] }
 0x2ae   :  { %v1233_v60 = vld [vmem:[#allocation11 + $0x968] sm:$0xff] }
 0x2af   :  { %4225 = vmatpush1.bf16.msra.mxu1 %v5735_v24  ;;  %v1133_v24 = vld [vmem:[#allocation11 + $0x648] sm:$0xff] }
 0x2b0   :  { %4266 = vmatpush1.bf16.msra.mxu0 %v5863_v25  ;;  %4226 = vmatprep.subr.bf16.mxu1 %v5856_v57  ;;  %v1137_v25 = vld [vmem:[#allocation11 + $0x668] sm:$0xff]  ;;  %v5815_v57 = vcombine.low %v1013_v4, %v1017_v13  ;;  %v6032_v4 = vcombine.high %v1229_v56, %v1233_v60 }
 0x2b1   :  { %4267 = vmatprep.subr.bf16.mxu0 %v5984_v58  ;;  %v5943_v58 = vcombine.low %v1141_v14, %v1145_v15  ;;  %v5936_v61 = vcombine.high %v1133_v24, %v1137_v25  ;;  %v1221_v14 = vld [vmem:[#allocation11 + $0x908] sm:$0xff] }
 0x2b2   :  { %v1225_v15 = vld [vmem:[#allocation11 + $0x928] sm:$0xff] }
 0x2b3   :  { %4227 = vmatpush2.bf16.msra.mxu1 %v5855_v26  ;;  %v1125_v26 = vld [vmem:[#allocation11 + $0x608] sm:$0xff] }
 0x2b4   :  { %4268 = vmatpush2.bf16.msra.mxu0 %v5983_v27  ;;  %4228 = vmatprep.subr.bf16.mxu1 %v5848_v28  ;;  %v1129_v27 = vld [vmem:[#allocation11 + $0x628] sm:$0xff]  ;;  %v5807_v28 = vcombine.low %v1005_v21, %v1009_v22  ;;  %v6024_v21 = vcombine.high %v1221_v14, %v1225_v15 }
 0x2b5   :  { %4269 = vmatprep.subr.bf16.mxu0 %v5976_v29  ;;  %v5935_v29 = vcombine.low %v1133_v24, %v1137_v25  ;;  %v5928_v40 = vcombine.high %v1125_v26, %v1129_v27  ;;  %v1213_v24 = vld [vmem:[#allocation11 + $0x8c8] sm:$0xff] }
 0x2b6   :  { %v1217_v25 = vld [vmem:[#allocation11 + $0x8e8] sm:$0xff] }
 0x2b7   :  { %4229 = vmatpush2.bf16.msra.mxu1 %v5847_v43  ;;  %v1373_v43 = vld [vmem:[#allocation11 + $0xdc8] sm:$0xff] }
 0x2b8   :  { %4270 = vmatpush2.bf16.msra.mxu0 %v5975_v44  ;;  %4230 = vmatprep.subr.bf16.mxu1 %v5840_v45  ;;  %v1377_v44 = vld [vmem:[#allocation11 + $0xde8] sm:$0xff]  ;;  %v5799_v45 = vcombine.low %v997_v63, %v1001_v1  ;;  %v6016_v63 = vcombine.high %v1213_v24, %v1217_v25 }
 0x2b9   :  { %4271 = vmatprep.subr.bf16.mxu0 %v5968_v46  ;;  %v5927_v46 = vcombine.low %v1125_v26, %v1129_v27  ;;  %v6176_v37 = vcombine.high %v1373_v43, %v1377_v44  ;;  %v1205_v26 = vld [vmem:[#allocation11 + $0x888] sm:$0xff] }
 0x2ba   :  { %v1209_v27 = vld [vmem:[#allocation11 + $0x8a8] sm:$0xff] }
 0x2bb   :  { %4231 = vmatpush2.bf16.msra.mxu1 %v5839_v51  ;;  %v6047_v51 = vcombine.low %v1245_v41, %v1249_v42  ;;  %v6008_v41 = vcombine.high %v1205_v26, %v1209_v27 }
 0x2bc   :  { %4272 = vmatpush2.bf16.msra.mxu0 %v5967_v52  ;;  %4232 = vmatprep.subr.bf16.mxu1 %v5832_v53  ;;  %v1365_v52 = vld [vmem:[#allocation11 + $0xd88] sm:$0xff] }
 0x2bd   :  { %4273 = vmatprep.subr.bf16.mxu0 %v5960_v54  ;;  %v1369_v53 = vld [vmem:[#allocation11 + $0xda8] sm:$0xff]  ;;  %v6175_v54 = vcombine.low %v1373_v43, %v1377_v44 }
 0x2be   :  { %v6168_v62 = vcombine.high %v1365_v52, %v1369_v53  ;;  %v1197_v43 = vld [vmem:[#allocation11 + $0x848] sm:$0xff] }
 0x2bf   :  { %4233 = vmatpush2.bf16.msra.mxu1 %v5831_v5  ;;  %v1357_v5 = vld [vmem:[#allocation11 + $0xd48] sm:$0xff] }
 0x2c0   :  { %4274 = vmatpush2.bf16.msra.mxu0 %v5959_v2  ;;  %4234 = vmatprep.subr.bf16.mxu1 %v5824_v10  ;;  %v1361_v2 = vld [vmem:[#allocation11 + $0xd68] sm:$0xff]  ;;  %v6039_v10 = vcombine.low %v1237_v48, %v1241_v50 }
 0x2c1   :  { %4275 = vmatprep.subr.bf16.mxu0 %v5952_v3  ;;  %v6167_v3 = vcombine.low %v1365_v52, %v1369_v53  ;;  %v6160_v13 = vcombine.high %v1357_v5, %v1361_v2  ;;  %v1201_v44 = vld [vmem:[#allocation11 + $0x868] sm:$0xff] }
 0x2c2   :  { %v6000_v48 = vcombine.high %v1197_v43, %v1201_v44  ;;  %v1193_v52 = vld [vmem:[#allocation11 + $0x828] sm:$0xff] }
 0x2c3   :  { %4235 = vmatpush2.bf16.msra.mxu1 %v5823_v16  ;;  %v1349_v16 = vld [vmem:[#allocation11 + $0xd08] sm:$0xff] }
 0x2c4   :  { %4276 = vmatpush2.bf16.msra.mxu0 %v5951_v17  ;;  %4236 = vmatprep.subr.bf16.mxu1 %v5816_v18  ;;  %v1353_v17 = vld [vmem:[#allocation11 + $0xd28] sm:$0xff]  ;;  %v6031_v18 = vcombine.low %v1229_v56, %v1233_v60 }
 0x2c5   :  { %4277 = vmatprep.subr.bf16.mxu0 %v5944_v19  ;;  %v6159_v19 = vcombine.low %v1357_v5, %v1361_v2  ;;  %v6152_v22 = vcombine.high %v1349_v16, %v1353_v17  ;;  %v1317_v53 = vld [vmem:[#allocation11 + $0xc08] sm:$0xff] }
 0x2c6   :  { %v1309_v5 = vld [vmem:[#allocation11 + $0xbc8] sm:$0xff] }
 0x2c7   :  { %4237 = vmatpush2.bf16.msra.mxu1 %v5815_v57  ;;  %v1341_v57 = vld [vmem:[#allocation11 + $0xcc8] sm:$0xff] }
 0x2c8   :  { %4278 = vmatpush2.bf16.msra.mxu0 %v5943_v58  ;;  %4238 = vmatprep.subr.bf16.mxu1 %v5808_v59  ;;  %v1345_v58 = vld [vmem:[#allocation11 + $0xce8] sm:$0xff]  ;;  %v6023_v59 = vcombine.low %v1221_v14, %v1225_v15 }
 0x2c9   :  { %4279 = vmatprep.subr.bf16.mxu0 %v5936_v61  ;;  %v6151_v61 = vcombine.low %v1349_v16, %v1353_v17  ;;  %v6144_v1 = vcombine.high %v1341_v57, %v1345_v58  ;;  %v1313_v2 = vld [vmem:[#allocation11 + $0xbe8] sm:$0xff] }
 0x2ca   :  { %v6112_v14 = vcombine.high %v1309_v5, %v1313_v2  ;;  %v1301_v16 = vld [vmem:[#allocation11 + $0xb88] sm:$0xff] }
 0x2cb   :  { %4239 = vmatpush2.bf16.msra.mxu1 %v5807_v28  ;;  %v1333_v28 = vld [vmem:[#allocation11 + $0xc88] sm:$0xff] }
 0x2cc   :  { %4280 = vmatpush2.bf16.msra.mxu0 %v5935_v29  ;;  %4240 = vmatprep.subr.bf16.mxu1 %v5800_v33  ;;  %v1337_v29 = vld [vmem:[#allocation11 + $0xca8] sm:$0xff]  ;;  %v6015_v33 = vcombine.low %v1213_v24, %v1217_v25 }
 0x2cd   :  { %4281 = vmatprep.subr.bf16.mxu0 %v5928_v40  ;;  %v6143_v40 = vcombine.low %v1341_v57, %v1345_v58  ;;  %v6136_v42 = vcombine.high %v1333_v28, %v1337_v29  ;;  %v1305_v17 = vld [vmem:[#allocation11 + $0xba8] sm:$0xff] }
 0x2ce   :  { %v6104_v24 = vcombine.high %v1301_v16, %v1305_v17  ;;  %v1293_v57 = vld [vmem:[#allocation11 + $0xb48] sm:$0xff] }
 0x2cf   :  { %4241 = vmatpush2.bf16.msra.mxu1 %v5799_v45  ;;  %v1325_v45 = vld [vmem:[#allocation11 + $0xc48] sm:$0xff] }
 0x2d0   :  { %4282 = vmatpush2.bf16.msra.mxu0 %v5927_v46  ;;  %4292 = vmatprep.subr.bf16.mxu1 %v6048_v47  ;;  %v1329_v46 = vld [vmem:[#allocation11 + $0xc68] sm:$0xff]  ;;  %v6007_v47 = vcombine.low %v1205_v26, %v1209_v27 }
 0x2d1   :  { %4333 = vmatprep.subr.bf16.mxu0 %v6176_v37  ;;  %v6135_v37 = vcombine.low %v1333_v28, %v1337_v29  ;;  %v6128_v50 = vcombine.high %v1325_v45, %v1329_v46  ;;  %v6127_v56 = vcombine.low %v1325_v45, %v1329_v46  ;;  %v1297_v58 = vld [vmem:[#allocation11 + $0xb68] sm:$0xff] }
 0x2d2   :  { %4243 = vmatmul.mubr.bf16.vlgmr.msra.gmra.mxu1 %v7136_v8  ;;  %v6096_v26 = vcombine.high %v1293_v57, %v1297_v58  ;;  %v1285_v28 = vld [vmem:[#allocation11 + $0xb08] sm:$0xff] }
 0x2d3   :  { %4284 = vmatmul.mubr.bf16.vlgmr.msra.gmra.mxu0 %v7138_v9  ;;  %4293 = vmatpush1.bf16.msra.mxu1 %v6047_v51  ;;  %v1189_v51 = vld [vmem:[#allocation11 + $0x808] sm:$0xff] }
 0x2d4   :  { %4324 = vmatprep.mubr.bf16.mxu1 %v7162_v30  ;;  %4334 = vmatpush1.bf16.msra.mxu0 %v6175_v54  ;;  %v1321_v54 = vld [vmem:[#allocation11 + $0xc28] sm:$0xff]  ;;  %v5992_v60 = vcombine.high %v1189_v51, %v1193_v52 }
 0x2d5   :  { %4365 = vmatprep.mubr.bf16.mxu0 %v7164_v32  ;;  %4294 = vmatprep.subr.bf16.mxu1 %v6040_v55  ;;  %v5999_v55 = vcombine.low %v1197_v43, %v1201_v44  ;;  %v1289_v29 = vld [vmem:[#allocation11 + $0xb28] sm:$0xff] }
 0x2d6   :  { %4335 = vmatprep.subr.bf16.mxu0 %v6168_v62  ;;  %v6120_v62 = vcombine.high %v1317_v53, %v1321_v54  ;;  %v6088_v43 = vcombine.high %v1285_v28, %v1289_v29  ;;  %v1277_v45 = vld [vmem:[#allocation11 + $0xac8] sm:$0xff] }
 0x2d7   :  { %4295 = vmatpush1.bf16.msra.mxu1 %v6039_v10  ;;  %v1437_v10 = vld [vmem:[#allocation11 + $0xfc8] sm:$0xff] }
 0x2d8   :  { %4336 = vmatpush1.bf16.msra.mxu0 %v6167_v3  ;;  %4296 = vmatprep.subr.bf16.mxu1 %v6032_v4  ;;  %v1441_v3 = vld [vmem:[#allocation11 + $0xfe8] sm:$0xff]  ;;  %v5991_v4 = vcombine.low %v1189_v51, %v1193_v52 }
 0x2d9   :  { %4337 = vmatprep.subr.bf16.mxu0 %v6160_v13  ;;  %v6119_v13 = vcombine.low %v1317_v53, %v1321_v54  ;;  %v6240_v15 = vcombine.high %v1437_v10, %v1441_v3  ;;  %v1281_v46 = vld [vmem:[#allocation11 + $0xae8] sm:$0xff] }
 0x2da   :  { %v6080_v51 = vcombine.high %v1277_v45, %v1281_v46  ;;  %v1269_v53 = vld [vmem:[#allocation11 + $0xa88] sm:$0xff] }
 0x2db   :  { %4297 = vmatpush1.bf16.msra.mxu1 %v6031_v18  ;;  %v1429_v18 = vld [vmem:[#allocation11 + $0xf88] sm:$0xff] }
 0x2dc   :  { %4338 = vmatpush1.bf16.msra.mxu0 %v6159_v19  ;;  %4298 = vmatprep.subr.bf16.mxu1 %v6024_v21  ;;  %v1433_v19 = vld [vmem:[#allocation11 + $0xfa8] sm:$0xff]  ;;  %v6111_v21 = vcombine.low %v1309_v5, %v1313_v2 }
 0x2dd   :  { %4339 = vmatprep.subr.bf16.mxu0 %v6152_v22  ;;  %v6239_v22 = vcombine.low %v1437_v10, %v1441_v3  ;;  %v6232_v25 = vcombine.high %v1429_v18, %v1433_v19  ;;  %v1273_v54 = vld [vmem:[#allocation11 + $0xaa8] sm:$0xff] }
 0x2de   :  { %v6072_v5 = vcombine.high %v1269_v53, %v1273_v54  ;;  %v1261_v10 = vld [vmem:[#allocation11 + $0xa48] sm:$0xff] }
 0x2df   :  { %4299 = vmatpush1.bf16.msra.mxu1 %v6023_v59  ;;  %v1421_v59 = vld [vmem:[#allocation11 + $0xf48] sm:$0xff] }
 0x2e0   :  { %4340 = vmatpush1.bf16.msra.mxu0 %v6151_v61  ;;  %4300 = vmatprep.subr.bf16.mxu1 %v6016_v63  ;;  %v1425_v61 = vld [vmem:[#allocation11 + $0xf68] sm:$0xff]  ;;  %v6103_v63 = vcombine.low %v1301_v16, %v1305_v17 }
 0x2e1   :  { %4341 = vmatprep.subr.bf16.mxu0 %v6144_v1  ;;  %v6231_v1 = vcombine.low %v1429_v18, %v1433_v19  ;;  %v6224_v27 = vcombine.high %v1421_v59, %v1425_v61  ;;  %v1265_v3 = vld [vmem:[#allocation11 + $0xa68] sm:$0xff] }
 0x2e2   :  { %v6064_v16 = vcombine.high %v1261_v10, %v1265_v3  ;;  %v1253_v18 = vld [vmem:[#allocation11 + $0xa08] sm:$0xff] }
 0x2e3   :  { %4301 = vmatpush1.bf16.msra.mxu1 %v6015_v33  ;;  %v1413_v33 = vld [vmem:[#allocation11 + $0xf08] sm:$0xff] }
 0x2e4   :  { %4342 = vmatpush1.bf16.msra.mxu0 %v6143_v40  ;;  %4302 = vmatprep.subr.bf16.mxu1 %v6008_v41  ;;  %v1417_v40 = vld [vmem:[#allocation11 + $0xf28] sm:$0xff]  ;;  %v6095_v41 = vcombine.low %v1293_v57, %v1297_v58 }
 0x2e5   :  { %4343 = vmatprep.subr.bf16.mxu0 %v6136_v42  ;;  %v6223_v42 = vcombine.low %v1421_v59, %v1425_v61  ;;  %v6216_v44 = vcombine.high %v1413_v33, %v1417_v40  ;;  %v1257_v19 = vld [vmem:[#allocation11 + $0xa28] sm:$0xff]  ;;  %v990_v59 = vld [vmem:[#allocation11 + $0x1d0] sm:$0xff] }
 0x2e6   :  { %v6056_v57 = vcombine.high %v1253_v18, %v1257_v19  ;;  %v994_v61 = vld [vmem:[#allocation11 + $0x1f0] sm:$0xff] }
 0x2e7   :  { %4303 = vmatpush1.bf16.msra.mxu1 %v6007_v47  ;;  %v1405_v47 = vld [vmem:[#allocation11 + $0xec8] sm:$0xff] }
 0x2e8   :  { %4344 = vmatpush1.bf16.msra.mxu0 %v6135_v37  ;;  %4304 = vmatprep.subr.bf16.mxu1 %v6000_v48  ;;  %v1409_v37 = vld [vmem:[#allocation11 + $0xee8] sm:$0xff]  ;;  %v6087_v48 = vcombine.low %v1285_v28, %v1289_v29  ;;  %v5794_v28 = vcombine.high %v990_v59, %v994_v61  ;;  %v7190_v29 = vld [vmem:[#allocation13] sm:$0xff] }
 0x2e9   :  { %4345 = vmatprep.subr.bf16.mxu0 %v6128_v50  ;;  %v6215_v50 = vcombine.low %v1413_v33, %v1417_v40  ;;  %v6208_v52 = vcombine.high %v1405_v47, %v1409_v37  ;;  %v982_v40 = vld [vmem:[#allocation11 + $0x190] sm:$0xff] }
 0x2eb   :  { %4305 = vmatpush1.bf16.msra.mxu1 %v5999_v55  ;;  %v1397_v55 = vld [vmem:[#allocation11 + $0xe88] sm:$0xff] }
 0x2ec   :  { %4346 = vmatpush1.bf16.msra.mxu0 %v6127_v56  ;;  %4306 = vmatprep.subr.bf16.mxu1 %v5992_v60  ;;  %v1401_v56 = vld [vmem:[#allocation11 + $0xea8] sm:$0xff]  ;;  %v6079_v60 = vcombine.low %v1277_v45, %v1281_v46  ;;  %v1114_v45 = vld [vmem:[#allocation11 + $0x5b0] sm:$0xff] }
 0x2ed   :  { %4347 = vmatprep.subr.bf16.mxu0 %v6120_v62  ;;  %v6207_v62 = vcombine.low %v1405_v47, %v1409_v37  ;;  %v6200_v2 = vcombine.high %v1397_v55, %v1401_v56  ;;  %v1453_v47 = vrot.slane %v7190_v29, %v398_v38 }
 0x2ef   :  { %4307 = vmatpush1.bf16.msra.mxu1 %v5991_v4  ;;  %v1389_v4 = vld [vmem:[#allocation11 + $0xe48] sm:$0xff] }
 0x2f0   :  { %4348 = vmatpush1.bf16.msra.mxu0 %v6119_v13  ;;  %4308 = vmatprep.subr.bf16.mxu1 %v6112_v14  ;;  %v1393_v13 = vld [vmem:[#allocation11 + $0xe68] sm:$0xff]  ;;  %v6071_v14 = vcombine.low %v1269_v53, %v1273_v54  ;;  %v1102_v54 = vld [vmem:[#allocation11 + $0x550] sm:$0xff] }
 0x2f1   :  { %4349 = vmatprep.subr.bf16.mxu0 %v6240_v15  ;;  %v6199_v15 = vcombine.low %v1397_v55, %v1401_v56  ;;  %v6192_v17 = vcombine.high %v1389_v4, %v1393_v13 }
 0x2f3   :  { %4309 = vmatpush2.bf16.msra.mxu1 %v6111_v21  ;;  %v1381_v21 = vld [vmem:[#allocation11 + $0xe08] sm:$0xff] }
 0x2f4   :  { %4350 = vmatpush2.bf16.msra.mxu0 %v6239_v22  ;;  %4310 = vmatprep.subr.bf16.mxu1 %v6104_v24  ;;  %v1385_v22 = vld [vmem:[#allocation11 + $0xe28] sm:$0xff]  ;;  %v6063_v24 = vcombine.low %v1261_v10, %v1265_v3 }
 0x2f5   :  { %4351 = vmatprep.subr.bf16.mxu0 %v6232_v25  ;;  %v6191_v25 = vcombine.low %v1389_v4, %v1393_v13  ;;  %v6184_v58 = vcombine.high %v1381_v21, %v1385_v22  ;;  %v966_v4 = vld [vmem:[#allocation11 + $0x110] sm:$0xff] }
 0x2f6   :  { %v970_v13 = vld [vmem:[#allocation11 + $0x130] sm:$0xff] }
 0x2f7   :  { %4311 = vmatpush2.bf16.msra.mxu1 %v6103_v63  ;;  %v1118_v63 = vld [vmem:[#allocation11 + $0x5d0] sm:$0xff] }
 0x2f8   :  { %4352 = vmatpush2.bf16.msra.mxu0 %v6231_v1  ;;  %4312 = vmatprep.subr.bf16.mxu1 %v6096_v26  ;;  %v1122_v1 = vld [vmem:[#allocation11 + $0x5f0] sm:$0xff]  ;;  %v6055_v26 = vcombine.low %v1253_v18, %v1257_v19 }
 0x2f9   :  { %4353 = vmatprep.subr.bf16.mxu0 %v6224_v27  ;;  %v6183_v27 = vcombine.low %v1381_v21, %v1385_v22  ;;  %v5922_v33 = vcombine.high %v1118_v63, %v1122_v1  ;;  %v5921_v46 = vcombine.low %v1118_v63, %v1122_v1  ;;  %v1090_v63 = vld [vmem:[#allocation11 + $0x4f0] sm:$0xff]  ;;  %v5769_v1 = vcombine.low %v966_v4, %v970_v13 }
 0x2fb   :  { %4313 = vmatpush2.bf16.msra.mxu1 %v6095_v41  ;;  %v986_v41 = vld [vmem:[#allocation11 + $0x1b0] sm:$0xff] }
 0x2fc   :  { %4354 = vmatpush2.bf16.msra.mxu0 %v6223_v42  ;;  %4314 = vmatprep.subr.bf16.mxu1 %v6088_v43  ;;  %v5793_v42 = vcombine.low %v990_v59, %v994_v61  ;;  %v1449_v43 = vrot.slane %v7190_v29, %v394_v35  ;;  %v5786_v37 = vcombine.high %v982_v40, %v986_v41  ;;  %v1106_v35 = vld [vmem:[#allocation11 + $0x570] sm:$0xff] }
 0x2fd   :  { %4355 = vmatprep.subr.bf16.mxu0 %v6216_v44  ;;  %v1110_v44 = vld [vmem:[#allocation11 + $0x590] sm:$0xff]  ;;  %v5785_v56 = vcombine.low %v982_v40, %v986_v41  ;;  %v5906_v3 = vcombine.high %v1102_v54, %v1106_v35 }
 0x2fe   :  { %v5914_v53 = vcombine.high %v1110_v44, %v1114_v45  ;;  %v962_v59 = vld [vmem:[#allocation11 + $0xf0] sm:$0xff] }
 0x2ff   :  { %4315 = vmatpush2.bf16.msra.mxu1 %v6087_v48  ;;  %v974_v48 = vld [vmem:[#allocation11 + $0x150] sm:$0xff] }
 0x300   :  { %4356 = vmatpush2.bf16.msra.mxu0 %v6215_v50  ;;  %4316 = vmatprep.subr.bf16.mxu1 %v6080_v51  ;;  %v978_v50 = vld [vmem:[#allocation11 + $0x170] sm:$0xff] }
 0x301   :  { %4357 = vmatprep.subr.bf16.mxu0 %v6208_v52  ;;  %v5777_v19 = vcombine.low %v974_v48, %v978_v50  ;;  %v1086_v61 = vld [vmem:[#allocation11 + $0x4d0] sm:$0xff] }
 0x302   :  { %v954_v40 = vld [vmem:[#allocation11 + $0xb0] sm:$0xff] }
 0x303   :  { %4317 = vmatpush2.bf16.msra.mxu1 %v6079_v60  ;;  %v1078_v41 = vld [vmem:[#allocation11 + $0x490] sm:$0xff] }
 0x304   :  { %4358 = vmatpush2.bf16.msra.mxu0 %v6207_v62  ;;  %4318 = vmatprep.subr.bf16.mxu1 %v6072_v5  ;;  %v5913_v62 = vcombine.low %v1110_v44, %v1114_v45  ;;  %v5778_v5 = vcombine.high %v974_v48, %v978_v50  ;;  %v5889_v44 = vcombine.low %v1086_v61, %v1090_v63  ;;  %v1070_v48 = vld [vmem:[#allocation11 + $0x450] sm:$0xff] }
 0x305   :  { %4359 = vmatprep.subr.bf16.mxu0 %v6200_v2  ;;  %v1074_v50 = vld [vmem:[#allocation11 + $0x470] sm:$0xff] }
 0x307   :  { %4319 = vmatpush2.bf16.msra.mxu1 %v6071_v14 }
 0x308   :  { %4360 = vmatpush2.bf16.msra.mxu0 %v6199_v15  ;;  %4320 = vmatprep.subr.bf16.mxu1 %v6064_v16  ;;  %v1094_v16 = vld [vmem:[#allocation11 + $0x510] sm:$0xff] }
 0x309   :  { %4361 = vmatprep.subr.bf16.mxu0 %v6192_v17  ;;  %v1098_v17 = vld [vmem:[#allocation11 + $0x530] sm:$0xff] }
 0x30b   :  { %4321 = vmatpush2.bf16.msra.mxu1 %v6063_v24  ;;  %v5905_v24 = vcombine.low %v1102_v54, %v1106_v35  ;;  %v5874_v54 = vcombine.high %v1070_v48, %v1074_v50  ;;  %v934_v35 = vld [vmem:[#allocation11 + $0x10] sm:$0xff] }
 0x30c   :  { %4362 = vmatpush2.bf16.msra.mxu0 %v6191_v25  ;;  %4322 = vmatprep.subr.bf16.mxu1 %v6056_v57  ;;  %v5770_v25 = vcombine.high %v966_v4, %v970_v13  ;;  %v5898_v57 = vcombine.high %v1094_v16, %v1098_v17  ;;  %v1058_v4 = vld [vmem:[#allocation11 + $0x3f0] sm:$0xff] }
 0x30d   :  { %4363 = vmatprep.subr.bf16.mxu0 %v6184_v58  ;;  %v958_v58 = vld [vmem:[#allocation11 + $0xd0] sm:$0xff] }
 0x30e   :  { %v1182_v13 = vld [vmem:[#allocation11 + $0x7d0] sm:$0xff] }
 0x30f   :  { %4323 = vmatpush2.bf16.msra.mxu1 %v6055_v26  ;;  %v5897_v26 = vcombine.low %v1094_v16, %v1098_v17 }
 0x310   :  { %4364 = vmatpush2.bf16.msra.mxu0 %v6183_v27  ;;  %4374 = vmatprep.subr.bf16.mxu1 %v5794_v28  ;;  %v5762_v27 = vcombine.high %v958_v58, %v962_v59  ;;  %v5890_v28 = vcombine.high %v1086_v61, %v1090_v63  ;;  %v1038_v63 = vld [vmem:[#allocation11 + $0x350] sm:$0xff] }
 0x311   :  { %4415 = vmatprep.subr.bf16.mxu0 %v5922_v33  ;;  %v950_v33 = vld [vmem:[#allocation11 + $0x90] sm:$0xff] }
 0x312   :  { %4325 = vmatmul.mubr.bf16.vlgmr.msra.gmra.mxu1 %v7178_v11  ;;  %v4080_v51 = vpop.f32.mrf.mxu1  ;;  %v4121_v52 = vpop.f32.mrf.mxu0  ;;  %v5754_v45 = vcombine.high %v950_v33, %v954_v40 }
 0x313   :  { %4366 = vmatmul.mubr.bf16.vlgmr.msra.gmra.mxu0 %v7180_v12  ;;  %v4081_v55 = vadd.f32 %v4080_v51, %v1449_v43  ;;  %4375 = vmatpush1.bf16.msra.mxu1 %v5793_v42  ;;  %v1082_v42 = vld [vmem:[#allocation11 + $0x4b0] sm:$0xff]  ;;  %v5761_v43 = vcombine.low %v958_v58, %v962_v59  ;;  %v5753_v51 = vcombine.low %v950_v33, %v954_v40 }
 0x314   :  { %4406 = vmatprep.mubr.bf16.mxu1 %v7132_v6  ;;  %4416 = vmatpush1.bf16.msra.mxu0 %v5921_v46  ;;  %v4082_v60 = vpop.f32.mrf.mxu1  ;;  %v4123_v38 = vpop.f32.mrf.mxu0  ;;  %v5882_v46 = vcombine.high %v1078_v41, %v1082_v42 }
 0x315   :  { %v7201_v2 = vadd.f32 %v4121_v52, %v4081_v55  ;;  %4447 = vmatprep.mubr.bf16.mxu0 %v7134_v7  ;;  %v4083_v10 = vadd.f32 %v4082_v60, %v1453_v47  ;;  %4376 = vmatprep.subr.bf16.mxu1 %v5786_v37  ;;  %v942_v47 = vld [vmem:[#allocation11 + $0x50] sm:$0xff]  ;;  %v5881_v52 = vcombine.low %v1078_v41, %v1082_v42 }
 0x316   :  { %4417 = vmatprep.subr.bf16.mxu0 %v5914_v53  ;;  %v4084_v14 = vpop.f32.mrf.mxu1  ;;  %v4125_v15 = vpop.f32.mrf.mxu0  ;;  %v946_v37 = vld [vmem:[#allocation11 + $0x70] sm:$0xff] }
 0x317   :  { %v7204_v18 = vadd.f32 %v4123_v38, %v4083_v10  ;;  %4377 = vmatpush1.bf16.msra.mxu1 %v5785_v56  ;;  %v5746_v53 = vcombine.high %v942_v47, %v946_v37  ;;  %v938_v55 = vld [vmem:[#allocation11 + $0x30] sm:$0xff]  ;;  %v5745_v38 = vcombine.low %v942_v47, %v946_v37 }
 0x318   :  { %4418 = vmatpush1.bf16.msra.mxu0 %v5913_v62  ;;  %v4085_v21 = vpop.f32.mrf.mxu1  ;;  %v4126_v22 = vpop.f32.mrf.mxu0  ;;  %4378 = vmatprep.subr.bf16.mxu1 %v5778_v5  ;;  %v1062_v56 = vld [vmem:[#allocation11 + $0x410] sm:$0xff]  ;;  %v5873_v62 = vcombine.low %v1070_v48, %v1074_v50  ;;  %v5738_v5 = vcombine.high %v934_v35, %v938_v55  ;;  %v5737_v15 = vcombine.low %v934_v35, %v938_v55 }
 0x319   :  { %4419 = vmatprep.subr.bf16.mxu0 %v5906_v3  ;;  %v1066_v60 = vld [vmem:[#allocation11 + $0x430] sm:$0xff] }
 0x31a   :  { %v5866_v10 = vcombine.high %v1062_v56, %v1066_v60  ;;  %v1054_v3 = vld [vmem:[#allocation11 + $0x3d0] sm:$0xff]  ;;  %v5865_v16 = vcombine.low %v1062_v56, %v1066_v60 }
 0x31b   :  { %4379 = vmatpush1.bf16.msra.mxu1 %v5777_v19  ;;  %v1186_v14 = vld [vmem:[#allocation11 + $0x7f0] sm:$0xff]  ;;  %v5858_v17 = vcombine.high %v1054_v3, %v1058_v4 }
 0x31c   :  { %4420 = vmatpush1.bf16.msra.mxu0 %v5905_v24  ;;  %4380 = vmatprep.subr.bf16.mxu1 %v5770_v25  ;;  %v5986_v19 = vcombine.high %v1182_v13, %v1186_v14  ;;  %v1046_v21 = vld [vmem:[#allocation11 + $0x390] sm:$0xff]  ;;  %v5985_v58 = vcombine.low %v1182_v13, %v1186_v14 }
 0x31d   :  { %4421 = vmatprep.subr.bf16.mxu0 %v5898_v57  ;;  %v1050_v22 = vld [vmem:[#allocation11 + $0x3b0] sm:$0xff]  ;;  %v5857_v57 = vcombine.low %v1054_v3, %v1058_v4 }
 0x31e   :  { %v1174_v24 = vld [vmem:[#allocation11 + $0x790] sm:$0xff]  ;;  %v5850_v59 = vcombine.high %v1046_v21, %v1050_v22 }
 0x31f   :  { %4381 = vmatpush1.bf16.msra.mxu1 %v5769_v1  ;;  %v1178_v25 = vld [vmem:[#allocation11 + $0x7b0] sm:$0xff] }
 0x320   :  { %4422 = vmatpush1.bf16.msra.mxu0 %v5897_v26  ;;  %4382 = vmatprep.subr.bf16.mxu1 %v5762_v27  ;;  %v5978_v61 = vcombine.high %v1174_v24, %v1178_v25  ;;  %v1042_v1 = vld [vmem:[#allocation11 + $0x370] sm:$0xff]  ;;  %v5977_v33 = vcombine.low %v1174_v24, %v1178_v25 }
 0x321   :  { %4423 = vmatprep.subr.bf16.mxu0 %v5890_v28  ;;  %v1166_v26 = vld [vmem:[#allocation11 + $0x750] sm:$0xff]  ;;  %v5849_v28 = vcombine.low %v1046_v21, %v1050_v22  ;;  %v5842_v40 = vcombine.high %v1038_v63, %v1042_v1 }
 0x322   :  { %v1170_v27 = vld [vmem:[#allocation11 + $0x770] sm:$0xff] }
 0x323   :  { %4383 = vmatpush1.bf16.msra.mxu1 %v5761_v43  ;;  %v5970_v41 = vcombine.high %v1166_v26, %v1170_v27  ;;  %v1030_v42 = vld [vmem:[#allocation11 + $0x310] sm:$0xff]  ;;  %v5969_v47 = vcombine.low %v1166_v26, %v1170_v27 }
 0x324   :  { %4424 = vmatpush1.bf16.msra.mxu0 %v5889_v44  ;;  %4384 = vmatprep.subr.bf16.mxu1 %v5754_v45  ;;  %v1034_v43 = vld [vmem:[#allocation11 + $0x330] sm:$0xff] }
 0x325   :  { %4425 = vmatprep.subr.bf16.mxu0 %v5882_v46  ;;  %v1158_v44 = vld [vmem:[#allocation11 + $0x710] sm:$0xff]  ;;  %v5841_v46 = vcombine.low %v1038_v63, %v1042_v1  ;;  %v5834_v37 = vcombine.high %v1030_v42, %v1034_v43 }
 0x326   :  { %v1162_v45 = vld [vmem:[#allocation11 + $0x730] sm:$0xff] }
 0x327   :  { %4385 = vmatpush1.bf16.msra.mxu1 %v5753_v51  ;;  %v5962_v48 = vcombine.high %v1158_v44, %v1162_v45  ;;  %v1022_v50 = vld [vmem:[#allocation11 + $0x2d0] sm:$0xff]  ;;  %v5961_v35 = vcombine.low %v1158_v44, %v1162_v45 }
 0x328   :  { %4426 = vmatpush1.bf16.msra.mxu0 %v5881_v52  ;;  %4386 = vmatprep.subr.bf16.mxu1 %v5746_v53  ;;  %v1026_v51 = vld [vmem:[#allocation11 + $0x2f0] sm:$0xff] }
 0x329   :  { %4427 = vmatprep.subr.bf16.mxu0 %v5874_v54  ;;  %v1150_v52 = vld [vmem:[#allocation11 + $0x6d0] sm:$0xff]  ;;  %v5833_v54 = vcombine.low %v1030_v42, %v1034_v43  ;;  %v5826_v55 = vcombine.high %v1022_v50, %v1026_v51 }
 0x32a   :  { %v1154_v53 = vld [vmem:[#allocation11 + $0x6f0] sm:$0xff] }
 0x32b   :  { %4387 = vmatpush1.bf16.msra.mxu1 %v5745_v38  ;;  %v5954_v56 = vcombine.high %v1150_v52, %v1154_v53  ;;  %v1014_v60 = vld [vmem:[#allocation11 + $0x290] sm:$0xff]  ;;  %v5953_v3 = vcombine.low %v1150_v52, %v1154_v53 }
 0x32c   :  { %4428 = vmatpush1.bf16.msra.mxu0 %v5873_v62  ;;  %4388 = vmatprep.subr.bf16.mxu1 %v5738_v5  ;;  %v1018_v38 = vld [vmem:[#allocation11 + $0x2b0] sm:$0xff] }
 0x32d   :  { %4429 = vmatprep.subr.bf16.mxu0 %v5866_v10  ;;  %v1142_v62 = vld [vmem:[#allocation11 + $0x690] sm:$0xff]  ;;  %v5825_v10 = vcombine.low %v1022_v50, %v1026_v51  ;;  %v5818_v4 = vcombine.high %v1014_v60, %v1018_v38 }
 0x32e   :  { %v1146_v5 = vld [vmem:[#allocation11 + $0x6b0] sm:$0xff] }
 0x32f   :  { %4389 = vmatpush1.bf16.msra.mxu1 %v5737_v15  ;;  %v5946_v13 = vcombine.high %v1142_v62, %v1146_v5  ;;  %v1006_v14 = vld [vmem:[#allocation11 + $0x250] sm:$0xff]  ;;  %v5945_v21 = vcombine.low %v1142_v62, %v1146_v5 }
 0x330   :  { %4430 = vmatpush1.bf16.msra.mxu0 %v5865_v16  ;;  %4390 = vmatprep.subr.bf16.mxu1 %v5858_v17  ;;  %v1010_v15 = vld [vmem:[#allocation11 + $0x270] sm:$0xff] }
 0x331   :  { %4431 = vmatprep.subr.bf16.mxu0 %v5986_v19  ;;  %v1134_v16 = vld [vmem:[#allocation11 + $0x650] sm:$0xff]  ;;  %v5817_v19 = vcombine.low %v1014_v60, %v1018_v38  ;;  %v5810_v22 = vcombine.high %v1006_v14, %v1010_v15 }
 0x332   :  { %v1138_v17 = vld [vmem:[#allocation11 + $0x670] sm:$0xff] }
 0x333   :  { %4391 = vmatpush2.bf16.msra.mxu1 %v5857_v57  ;;  %v5938_v24 = vcombine.high %v1134_v16, %v1138_v17  ;;  %v998_v25 = vld [vmem:[#allocation11 + $0x210] sm:$0xff]  ;;  %v5937_v63 = vcombine.low %v1134_v16, %v1138_v17 }
 0x334   :  { %4432 = vmatpush2.bf16.msra.mxu0 %v5985_v58  ;;  %4392 = vmatprep.subr.bf16.mxu1 %v5850_v59  ;;  %v1002_v57 = vld [vmem:[#allocation11 + $0x230] sm:$0xff] }
 0x335   :  { %4433 = vmatprep.subr.bf16.mxu0 %v5978_v61  ;;  %v1126_v58 = vld [vmem:[#allocation11 + $0x610] sm:$0xff]  ;;  %v5809_v61 = vcombine.low %v1006_v14, %v1010_v15  ;;  %v5802_v1 = vcombine.high %v998_v25, %v1002_v57 }
 0x336   :  { %v1130_v59 = vld [vmem:[#allocation11 + $0x630] sm:$0xff] }
 0x337   :  { %4393 = vmatpush2.bf16.msra.mxu1 %v5849_v28  ;;  %v5930_v26 = vcombine.high %v1126_v58, %v1130_v59  ;;  %v1246_v27 = vld [vmem:[#allocation11 + $0x9d0] sm:$0xff]  ;;  %v5929_v42 = vcombine.low %v1126_v58, %v1130_v59 }
 0x338   :  { %4434 = vmatpush2.bf16.msra.mxu0 %v5977_v33  ;;  %4394 = vmatprep.subr.bf16.mxu1 %v5842_v40  ;;  %v1250_v28 = vld [vmem:[#allocation11 + $0x9f0] sm:$0xff] }
 0x339   :  { %4435 = vmatprep.subr.bf16.mxu0 %v5970_v41  ;;  %v1374_v33 = vld [vmem:[#allocation11 + $0xdd0] sm:$0xff]  ;;  %v5801_v41 = vcombine.low %v998_v25, %v1002_v57  ;;  %v6050_v43 = vcombine.high %v1246_v27, %v1250_v28 }
 0x33a   :  { %v1378_v40 = vld [vmem:[#allocation11 + $0xdf0] sm:$0xff] }
 0x33b   :  { %4395 = vmatpush2.bf16.msra.mxu1 %v5841_v46  ;;  %v6178_v44 = vcombine.high %v1374_v33, %v1378_v40  ;;  %v1238_v45 = vld [vmem:[#allocation11 + $0x990] sm:$0xff]  ;;  %v6177_v50 = vcombine.low %v1374_v33, %v1378_v40 }
 0x33c   :  { %4436 = vmatpush2.bf16.msra.mxu0 %v5969_v47  ;;  %4396 = vmatprep.subr.bf16.mxu1 %v5834_v37  ;;  %v1242_v46 = vld [vmem:[#allocation11 + $0x9b0] sm:$0xff]  ;;  %v6049_v47 = vcombine.low %v1246_v27, %v1250_v28 }
 0x33d   :  { %4437 = vmatprep.subr.bf16.mxu0 %v5962_v48  ;;  %v1366_v37 = vld [vmem:[#allocation11 + $0xd90] sm:$0xff]  ;;  %v6042_v51 = vcombine.high %v1238_v45, %v1242_v46  ;;  %v6041_v62 = vcombine.low %v1238_v45, %v1242_v46 }
 0x33e   :  { %v1370_v48 = vld [vmem:[#allocation11 + $0xdb0] sm:$0xff] }
 0x33f   :  { %4397 = vmatpush2.bf16.msra.mxu1 %v5833_v54  ;;  %v1230_v52 = vld [vmem:[#allocation11 + $0x950] sm:$0xff] }
 0x340   :  { %4438 = vmatpush2.bf16.msra.mxu0 %v5961_v35  ;;  %4398 = vmatprep.subr.bf16.mxu1 %v5826_v55  ;;  %v1234_v53 = vld [vmem:[#allocation11 + $0x970] sm:$0xff]  ;;  %v6170_v55 = vcombine.high %v1366_v37, %v1370_v48 }
 0x341   :  { %4439 = vmatprep.subr.bf16.mxu0 %v5954_v56  ;;  %v1358_v56 = vld [vmem:[#allocation11 + $0xd50] sm:$0xff]  ;;  %v6033_v25 = vcombine.low %v1230_v52, %v1234_v53 }
 0x342   :  { %v1362_v60 = vld [vmem:[#allocation11 + $0xd70] sm:$0xff] }
 0x343   :  { %4399 = vmatpush2.bf16.msra.mxu1 %v5825_v10  ;;  %v6162_v15 = vcombine.high %v1358_v56, %v1362_v60  ;;  %v1226_v16 = vld [vmem:[#allocation11 + $0x930] sm:$0xff]  ;;  %v6161_v59 = vcombine.low %v1358_v56, %v1362_v60 }
 0x344   :  { %4440 = vmatpush2.bf16.msra.mxu0 %v5953_v3  ;;  %4400 = vmatprep.subr.bf16.mxu1 %v5818_v4  ;;  %v6169_v3 = vcombine.low %v1366_v37, %v1370_v48  ;;  %v6034_v4 = vcombine.high %v1230_v52, %v1234_v53  ;;  %v1346_v27 = vld [vmem:[#allocation11 + $0xcf0] sm:$0xff] }
 0x345   :  { %4441 = vmatprep.subr.bf16.mxu0 %v5946_v13  ;;  %v1338_v45 = vld [vmem:[#allocation11 + $0xcb0] sm:$0xff] }
 0x346   :  { %v1326_v52 = vld [vmem:[#allocation11 + $0xc50] sm:$0xff] }
 0x347   :  { %4401 = vmatpush2.bf16.msra.mxu1 %v5817_v19  ;;  %v1330_v53 = vld [vmem:[#allocation11 + $0xc70] sm:$0xff] }
 0x348   :  { %4442 = vmatpush2.bf16.msra.mxu0 %v5945_v21  ;;  %4402 = vmatprep.subr.bf16.mxu1 %v5810_v22  ;;  %v1350_v21 = vld [vmem:[#allocation11 + $0xd10] sm:$0xff]  ;;  %v6130_v56 = vcombine.high %v1326_v52, %v1330_v53 }
 0x349   :  { %4443 = vmatprep.subr.bf16.mxu0 %v5938_v24  ;;  %v1354_v22 = vld [vmem:[#allocation11 + $0xd30] sm:$0xff] }
 0x34a   :  { %v6153_v33 = vcombine.low %v1350_v21, %v1354_v22  ;;  %v1190_v60 = vld [vmem:[#allocation11 + $0x810] sm:$0xff] }
 0x34b   :  { %4403 = vmatpush2.bf16.msra.mxu1 %v5809_v61 }
 0x34c   :  { %4444 = vmatpush2.bf16.msra.mxu0 %v5937_v63  ;;  %4404 = vmatprep.subr.bf16.mxu1 %v5802_v1  ;;  %v1214_v63 = vld [vmem:[#allocation11 + $0x8d0] sm:$0xff] }
 0x34d   :  { %4445 = vmatprep.subr.bf16.mxu0 %v5930_v26  ;;  %v1218_v1 = vld [vmem:[#allocation11 + $0x8f0] sm:$0xff] }
 0x34e   :  { %v1342_v26 = vld [vmem:[#allocation11 + $0xcd0] sm:$0xff]  ;;  %v6018_v40 = vcombine.high %v1214_v63, %v1218_v1  ;;  %v6017_v46 = vcombine.low %v1214_v63, %v1218_v1 }
 0x34f   :  { %4405 = vmatpush2.bf16.msra.mxu1 %v5801_v41  ;;  %v6146_v41 = vcombine.high %v1342_v26, %v1346_v27 }
 0x350   :  { %4446 = vmatpush2.bf16.msra.mxu0 %v5929_v42  ;;  %4456 = vmatprep.subr.bf16.mxu1 %v6050_v43  ;;  %v1206_v42 = vld [vmem:[#allocation11 + $0x890] sm:$0xff] }
 0x351   :  { %4497 = vmatprep.subr.bf16.mxu0 %v6178_v44  ;;  %v1210_v43 = vld [vmem:[#allocation11 + $0x8b0] sm:$0xff] }
 0x352   :  { %v4162_v54 = vpop.f32.mrf.mxu1  ;;  %v4203_v35 = vpop.f32.mrf.mxu0  ;;  %4407 = vmatmul.mubr.bf16.vlgmr.msra.gmra.mxu1 %v7136_v8  ;;  %v1334_v44 = vld [vmem:[#allocation11 + $0xc90] sm:$0xff]  ;;  %v6010_v37 = vcombine.high %v1206_v42, %v1210_v43 }
 0x353   :  { %v4163_v38 = vadd.f32 %v4162_v54, %v7201_v2  ;;  %4448 = vmatmul.mubr.bf16.vlgmr.msra.gmra.mxu0 %v7138_v9  ;;  %4457 = vmatpush1.bf16.msra.mxu1 %v6049_v47  ;;  %v1222_v2 = vld [vmem:[#allocation11 + $0x910] sm:$0xff]  ;;  %v6145_v47 = vcombine.low %v1342_v26, %v1346_v27  ;;  %v6138_v48 = vcombine.high %v1334_v44, %v1338_v45 }
 0x354   :  { %4488 = vmatprep.mubr.bf16.mxu1 %v7162_v30  ;;  %4498 = vmatpush1.bf16.msra.mxu0 %v6177_v50  ;;  %v4164_v5 = vpop.f32.mrf.mxu1  ;;  %v4205_v10 = vpop.f32.mrf.mxu0  ;;  %v6026_v61 = vcombine.high %v1222_v2, %v1226_v16  ;;  %v6025_v28 = vcombine.low %v1222_v2, %v1226_v16  ;;  %v1198_v50 = vld [vmem:[#allocation11 + $0x850] sm:$0xff]  ;;  %v6009_v54 = vcombine.low %v1206_v42, %v1210_v43 }
 0x355   :  { %v7210_v13 = vadd.f32 %v4203_v35, %v4163_v38  ;;  %4529 = vmatprep.mubr.bf16.mxu0 %v7164_v32  ;;  %v4165_v14 = vadd.f32 %v4164_v5, %v7204_v18  ;;  %4458 = vmatprep.subr.bf16.mxu1 %v6042_v51  ;;  %v6154_v18 = vcombine.high %v1350_v21, %v1354_v22  ;;  %v1202_v51 = vld [vmem:[#allocation11 + $0x870] sm:$0xff] }
 0x356   :  { %v4166_v17 = vpop.f32.mrf.mxu1  ;;  %v4207_v19 = vpop.f32.mrf.mxu0  ;;  %4499 = vmatprep.subr.bf16.mxu0 %v6170_v55  ;;  %v6137_v35 = vcombine.low %v1334_v44, %v1338_v45  ;;  %v6002_v55 = vcombine.high %v1198_v50, %v1202_v51  ;;  %v1194_v38 = vld [vmem:[#allocation11 + $0x830] sm:$0xff] }
 0x357   :  { %v7214_v24 = vadd.f32 %v4205_v10, %v4165_v14  ;;  %4459 = vmatpush1.bf16.msra.mxu1 %v6041_v62  ;;  %v1318_v62 = vld [vmem:[#allocation11 + $0xc10] sm:$0xff]  ;;  %v6001_v10 = vcombine.low %v1198_v50, %v1202_v51  ;;  %v5993_v19 = vcombine.low %v1190_v60, %v1194_v38 }
 0x358   :  { %4500 = vmatpush1.bf16.msra.mxu0 %v6169_v3  ;;  %v4167_v57 = vpop.f32.mrf.mxu1  ;;  %v4208_v58 = vpop.f32.mrf.mxu0  ;;  %4460 = vmatprep.subr.bf16.mxu1 %v6034_v4  ;;  %v1322_v5 = vld [vmem:[#allocation11 + $0xc30] sm:$0xff]  ;;  %v6129_v3 = vcombine.low %v1326_v52, %v1330_v53  ;;  %v5994_v4 = vcombine.high %v1190_v60, %v1194_v38 }
 0x359   :  { %4501 = vmatprep.subr.bf16.mxu0 %v6162_v15  ;;  %v6122_v14 = vcombine.high %v1318_v62, %v1322_v5  ;;  %v1310_v15 = vld [vmem:[#allocation11 + $0xbd0] sm:$0xff]  ;;  %v6121_v21 = vcombine.low %v1318_v62, %v1322_v5 }
 0x35a   :  { %v1314_v2 = vld [vmem:[#allocation11 + $0xbf0] sm:$0xff] }
 0x35b   :  { %4461 = vmatpush1.bf16.msra.mxu1 %v6033_v25  ;;  %v1438_v16 = vld [vmem:[#allocation11 + $0xfd0] sm:$0xff]  ;;  %v6114_v22 = vcombine.high %v1310_v15, %v1314_v2 }
 0x35c   :  { %4502 = vmatpush1.bf16.msra.mxu0 %v6161_v59  ;;  %4462 = vmatprep.subr.bf16.mxu1 %v6026_v61  ;;  %v1442_v17 = vld [vmem:[#allocation11 + $0xff0] sm:$0xff] }
 0x35d   :  { %4503 = vmatprep.subr.bf16.mxu0 %v6154_v18  ;;  %v6242_v25 = vcombine.high %v1438_v16, %v1442_v17  ;;  %v1302_v57 = vld [vmem:[#allocation11 + $0xb90] sm:$0xff]  ;;  %v6113_v18 = vcombine.low %v1310_v15, %v1314_v2  ;;  %v6241_v63 = vcombine.low %v1438_v16, %v1442_v17 }
 0x35e   :  { %v1306_v58 = vld [vmem:[#allocation11 + $0xbb0] sm:$0xff] }
 0x35f   :  { %4463 = vmatpush1.bf16.msra.mxu1 %v6025_v28  ;;  %v1430_v59 = vld [vmem:[#allocation11 + $0xf90] sm:$0xff]  ;;  %v6106_v1 = vcombine.high %v1302_v57, %v1306_v58 }
 0x360   :  { %4504 = vmatpush1.bf16.msra.mxu0 %v6153_v33  ;;  %4464 = vmatprep.subr.bf16.mxu1 %v6018_v40  ;;  %v1434_v61 = vld [vmem:[#allocation11 + $0xfb0] sm:$0xff] }
 0x361   :  { %4505 = vmatprep.subr.bf16.mxu0 %v6146_v41  ;;  %v6234_v26 = vcombine.high %v1430_v59, %v1434_v61  ;;  %v1294_v27 = vld [vmem:[#allocation11 + $0xb50] sm:$0xff]  ;;  %v6105_v41 = vcombine.low %v1302_v57, %v1306_v58  ;;  %v6233_v42 = vcombine.low %v1430_v59, %v1434_v61 }
 0x362   :  { %v1298_v28 = vld [vmem:[#allocation11 + $0xb70] sm:$0xff] }
 0x363   :  { %4465 = vmatpush1.bf16.msra.mxu1 %v6017_v46  ;;  %v1422_v33 = vld [vmem:[#allocation11 + $0xf50] sm:$0xff]  ;;  %v6098_v43 = vcombine.high %v1294_v27, %v1298_v28 }
 0x364   :  { %4506 = vmatpush1.bf16.msra.mxu0 %v6145_v47  ;;  %4466 = vmatprep.subr.bf16.mxu1 %v6010_v37  ;;  %v1426_v40 = vld [vmem:[#allocation11 + $0xf70] sm:$0xff] }
 0x365   :  { %4507 = vmatprep.subr.bf16.mxu0 %v6138_v48  ;;  %v6226_v44 = vcombine.high %v1422_v33, %v1426_v40  ;;  %v1286_v45 = vld [vmem:[#allocation11 + $0xb10] sm:$0xff]  ;;  %v6097_v48 = vcombine.low %v1294_v27, %v1298_v28  ;;  %v6225_v50 = vcombine.low %v1422_v33, %v1426_v40  ;;  %v991_v40 = vld [vmem:[#allocation11 + $0x1d8] sm:$0xff] }
 0x366   :  { %v1290_v46 = vld [vmem:[#allocation11 + $0xb30] sm:$0xff] }
 0x367   :  { %4467 = vmatpush1.bf16.msra.mxu1 %v6009_v54  ;;  %v1414_v47 = vld [vmem:[#allocation11 + $0xf10] sm:$0xff]  ;;  %v6090_v51 = vcombine.high %v1286_v45, %v1290_v46 }
 0x368   :  { %4508 = vmatpush1.bf16.msra.mxu0 %v6137_v35  ;;  %4468 = vmatprep.subr.bf16.mxu1 %v6002_v55  ;;  %v1418_v37 = vld [vmem:[#allocation11 + $0xf30] sm:$0xff] }
 0x369   :  { %4509 = vmatprep.subr.bf16.mxu0 %v6130_v56  ;;  %v6218_v52 = vcombine.high %v1414_v47, %v1418_v37  ;;  %v1278_v53 = vld [vmem:[#allocation11 + $0xad0] sm:$0xff]  ;;  %v6089_v56 = vcombine.low %v1286_v45, %v1290_v46  ;;  %v6217_v60 = vcombine.low %v1414_v47, %v1418_v37  ;;  %v983_v37 = vld [vmem:[#allocation11 + $0x198] sm:$0xff] }
 0x36a   :  { %v1282_v54 = vld [vmem:[#allocation11 + $0xaf0] sm:$0xff] }
 0x36b   :  { %4469 = vmatpush1.bf16.msra.mxu1 %v6001_v10  ;;  %v1406_v35 = vld [vmem:[#allocation11 + $0xed0] sm:$0xff]  ;;  %v6082_v38 = vcombine.high %v1278_v53, %v1282_v54 }
 0x36c   :  { %4510 = vmatpush1.bf16.msra.mxu0 %v6129_v3  ;;  %4470 = vmatprep.subr.bf16.mxu1 %v5994_v4  ;;  %v1410_v55 = vld [vmem:[#allocation11 + $0xef0] sm:$0xff] }
 0x36d   :  { %4511 = vmatprep.subr.bf16.mxu0 %v6122_v14  ;;  %v6210_v62 = vcombine.high %v1406_v35, %v1410_v55  ;;  %v1270_v5 = vld [vmem:[#allocation11 + $0xa90] sm:$0xff]  ;;  %v6081_v14 = vcombine.low %v1278_v53, %v1282_v54  ;;  %v6209_v15 = vcombine.low %v1406_v35, %v1410_v55  ;;  %v1115_v53 = vld [vmem:[#allocation11 + $0x5b8] sm:$0xff]  ;;  %v1461_v35 = vrot.slane %v7190_v29, %v406_v39 }
 0x36e   :  { %v1274_v10 = vld [vmem:[#allocation11 + $0xab0] sm:$0xff] }
 0x36f   :  { %4471 = vmatpush1.bf16.msra.mxu1 %v5993_v19  ;;  %v1398_v3 = vld [vmem:[#allocation11 + $0xe90] sm:$0xff]  ;;  %v6074_v2 = vcombine.high %v1270_v5, %v1274_v10 }
 0x370   :  { %4512 = vmatpush1.bf16.msra.mxu0 %v6121_v21  ;;  %4472 = vmatprep.subr.bf16.mxu1 %v6114_v22  ;;  %v1402_v4 = vld [vmem:[#allocation11 + $0xeb0] sm:$0xff] }
 0x371   :  { %4513 = vmatprep.subr.bf16.mxu0 %v6242_v25  ;;  %v6202_v16 = vcombine.high %v1398_v3, %v1402_v4  ;;  %v1262_v17 = vld [vmem:[#allocation11 + $0xa50] sm:$0xff]  ;;  %v6073_v25 = vcombine.low %v1270_v5, %v1274_v10  ;;  %v6201_v57 = vcombine.low %v1398_v3, %v1402_v4  ;;  %v1103_v5 = vld [vmem:[#allocation11 + $0x558] sm:$0xff] }
 0x372   :  { %v1266_v19 = vld [vmem:[#allocation11 + $0xa70] sm:$0xff] }
 0x373   :  { %4473 = vmatpush2.bf16.msra.mxu1 %v6113_v18  ;;  %v1390_v21 = vld [vmem:[#allocation11 + $0xe50] sm:$0xff]  ;;  %v6066_v58 = vcombine.high %v1262_v17, %v1266_v19 }
 0x374   :  { %4514 = vmatpush2.bf16.msra.mxu0 %v6241_v63  ;;  %4474 = vmatprep.subr.bf16.mxu1 %v6106_v1  ;;  %v1394_v22 = vld [vmem:[#allocation11 + $0xe70] sm:$0xff] }
 0x375   :  { %4515 = vmatprep.subr.bf16.mxu0 %v6234_v26  ;;  %v6194_v59 = vcombine.high %v1390_v21, %v1394_v22  ;;  %v1254_v61 = vld [vmem:[#allocation11 + $0xa10] sm:$0xff]  ;;  %v6065_v26 = vcombine.low %v1262_v17, %v1266_v19  ;;  %v6193_v27 = vcombine.low %v1390_v21, %v1394_v22  ;;  %v967_v19 = vld [vmem:[#allocation11 + $0x118] sm:$0xff] }
 0x376   :  { %v1258_v18 = vld [vmem:[#allocation11 + $0xa30] sm:$0xff]  ;;  %v971_v21 = vld [vmem:[#allocation11 + $0x138] sm:$0xff] }
 0x377   :  { %4475 = vmatpush2.bf16.msra.mxu1 %v6105_v41  ;;  %v1382_v63 = vld [vmem:[#allocation11 + $0xe10] sm:$0xff]  ;;  %v6058_v28 = vcombine.high %v1254_v61, %v1258_v18  ;;  %v995_v41 = vld [vmem:[#allocation11 + $0x1f8] sm:$0xff] }
 0x378   :  { %4516 = vmatpush2.bf16.msra.mxu0 %v6233_v42  ;;  %4476 = vmatprep.subr.bf16.mxu1 %v6098_v43  ;;  %v1386_v1 = vld [vmem:[#allocation11 + $0xe30] sm:$0xff]  ;;  %v1119_v42 = vld [vmem:[#allocation11 + $0x5d8] sm:$0xff]  ;;  %v5796_v46 = vcombine.high %v991_v40, %v995_v41 }
 0x379   :  { %4517 = vmatprep.subr.bf16.mxu0 %v6226_v44  ;;  %v6186_v33 = vcombine.high %v1382_v63, %v1386_v1  ;;  %v1123_v43 = vld [vmem:[#allocation11 + $0x5f8] sm:$0xff]  ;;  %v6057_v44 = vcombine.low %v1254_v61, %v1258_v18  ;;  %v6185_v45 = vcombine.low %v1382_v63, %v1386_v1 }
 0x37a   :  { %v5924_v47 = vcombine.high %v1119_v42, %v1123_v43  ;;  %v5923_v54 = vcombine.low %v1119_v42, %v1123_v43 }
 0x37b   :  { %4477 = vmatpush2.bf16.msra.mxu1 %v6097_v48  ;;  %v987_v48 = vld [vmem:[#allocation11 + $0x1b8] sm:$0xff] }
 0x37c   :  { %4518 = vmatpush2.bf16.msra.mxu0 %v6225_v50  ;;  %4478 = vmatprep.subr.bf16.mxu1 %v6090_v51  ;;  %v1457_v50 = vrot.slane %v7190_v29, %v402_v36  ;;  %v5795_v51 = vcombine.low %v991_v40, %v995_v41  ;;  %v5788_v55 = vcombine.high %v983_v37, %v987_v48  ;;  %v1107_v36 = vld [vmem:[#allocation11 + $0x578] sm:$0xff] }
 0x37d   :  { %4519 = vmatprep.subr.bf16.mxu0 %v6218_v52  ;;  %v1111_v52 = vld [vmem:[#allocation11 + $0x598] sm:$0xff]  ;;  %v5787_v4 = vcombine.low %v983_v37, %v987_v48  ;;  %v5908_v17 = vcombine.high %v1103_v5, %v1107_v36  ;;  %v5907_v18 = vcombine.low %v1103_v5, %v1107_v36  ;;  %v5771_v40 = vcombine.low %v967_v19, %v971_v21 }
 0x37e   :  { %v5915_v39 = vcombine.low %v1111_v52, %v1115_v53  ;;  %v939_v5 = vld [vmem:[#allocation11 + $0x38] sm:$0xff] }
 0x37f   :  { %4479 = vmatpush2.bf16.msra.mxu1 %v6089_v56  ;;  %v975_v56 = vld [vmem:[#allocation11 + $0x158] sm:$0xff] }
 0x380   :  { %4520 = vmatpush2.bf16.msra.mxu0 %v6217_v60  ;;  %4480 = vmatprep.subr.bf16.mxu1 %v6082_v38  ;;  %v979_v60 = vld [vmem:[#allocation11 + $0x178] sm:$0xff] }
 0x381   :  { %4521 = vmatprep.subr.bf16.mxu0 %v6210_v62  ;;  %v5916_v62 = vcombine.high %v1111_v52, %v1115_v53  ;;  %v5780_v29 = vcombine.high %v975_v56, %v979_v60  ;;  %v943_v52 = vld [vmem:[#allocation11 + $0x58] sm:$0xff] }
 0x382   :  { %v947_v53 = vld [vmem:[#allocation11 + $0x78] sm:$0xff] }
 0x383   :  { %4481 = vmatpush2.bf16.msra.mxu1 %v6081_v14  ;;  %v1063_v36 = vld [vmem:[#allocation11 + $0x418] sm:$0xff] }
 0x384   :  { %4522 = vmatpush2.bf16.msra.mxu0 %v6209_v15  ;;  %4482 = vmatprep.subr.bf16.mxu1 %v6074_v2 }
 0x385   :  { %4523 = vmatprep.subr.bf16.mxu0 %v6202_v16 }
 0x387   :  { %4483 = vmatpush2.bf16.msra.mxu1 %v6073_v25  ;;  %v1095_v25 = vld [vmem:[#allocation11 + $0x518] sm:$0xff] }
 0x388   :  { %4524 = vmatpush2.bf16.msra.mxu0 %v6201_v57  ;;  %4484 = vmatprep.subr.bf16.mxu1 %v6066_v58  ;;  %v1099_v57 = vld [vmem:[#allocation11 + $0x538] sm:$0xff] }
 0x389   :  { %4525 = vmatprep.subr.bf16.mxu0 %v6194_v59  ;;  %v5779_v59 = vcombine.low %v975_v56, %v979_v60  ;;  %v5900_v1 = vcombine.high %v1095_v25, %v1099_v57  ;;  %v5899_v41 = vcombine.low %v1095_v25, %v1099_v57  ;;  %v5748_v60 = vcombine.high %v943_v52, %v947_v53  ;;  %v1047_v57 = vld [vmem:[#allocation11 + $0x398] sm:$0xff] }
 0x38b   :  { %4485 = vmatpush2.bf16.msra.mxu1 %v6065_v26  ;;  %v959_v26 = vld [vmem:[#allocation11 + $0xd8] sm:$0xff] }
 0x38c   :  { %4526 = vmatpush2.bf16.msra.mxu0 %v6193_v27  ;;  %4486 = vmatprep.subr.bf16.mxu1 %v6058_v28  ;;  %v963_v27 = vld [vmem:[#allocation11 + $0xf8] sm:$0xff] }
 0x38d   :  { %4527 = vmatprep.subr.bf16.mxu0 %v6186_v33  ;;  %v1087_v28 = vld [vmem:[#allocation11 + $0x4d8] sm:$0xff]  ;;  %v5764_v42 = vcombine.high %v959_v26, %v963_v27  ;;  %v5763_v37 = vcombine.low %v959_v26, %v963_v27 }
 0x38e   :  { %v1091_v33 = vld [vmem:[#allocation11 + $0x4f8] sm:$0xff] }
 0x38f   :  { %4487 = vmatpush2.bf16.msra.mxu1 %v6057_v44  ;;  %v5892_v43 = vcombine.high %v1087_v28, %v1091_v33  ;;  %v951_v44 = vld [vmem:[#allocation11 + $0x98] sm:$0xff]  ;;  %v5891_v48 = vcombine.low %v1087_v28, %v1091_v33 }
 0x390   :  { %4528 = vmatpush2.bf16.msra.mxu0 %v6185_v45  ;;  %4538 = vmatprep.subr.bf16.mxu1 %v5796_v46  ;;  %v955_v45 = vld [vmem:[#allocation11 + $0xb8] sm:$0xff] }
 0x391   :  { %4579 = vmatprep.subr.bf16.mxu0 %v5924_v47  ;;  %v1079_v46 = vld [vmem:[#allocation11 + $0x498] sm:$0xff] }
 0x392   :  { %v4244_v38 = vpop.f32.mrf.mxu1  ;;  %4489 = vmatmul.mubr.bf16.vlgmr.msra.gmra.mxu1 %v7178_v11  ;;  %v1083_v47 = vld [vmem:[#allocation11 + $0x4b8] sm:$0xff] }
 0x393   :  { %v4245_v10 = vadd.f32 %v4244_v38, %v1457_v50  ;;  %v4285_v3 = vpop.f32.mrf.mxu0  ;;  %4530 = vmatmul.mubr.bf16.vlgmr.msra.gmra.mxu0 %v7180_v12  ;;  %4539 = vmatpush1.bf16.msra.mxu1 %v5795_v51  ;;  %v5756_v50 = vcombine.high %v951_v44, %v955_v45  ;;  %v5884_v51 = vcombine.high %v1079_v46, %v1083_v47  ;;  %v1039_v26 = vld [vmem:[#allocation11 + $0x358] sm:$0xff] }
 0x394   :  { %4570 = vmatprep.mubr.bf16.mxu1 %v7132_v6  ;;  %4580 = vmatpush1.bf16.msra.mxu0 %v5923_v54  ;;  %v4246_v14 = vpop.f32.mrf.mxu1  ;;  %v1071_v54 = vld [vmem:[#allocation11 + $0x458] sm:$0xff]  ;;  %v5883_v56 = vcombine.low %v1079_v46, %v1083_v47 }
 0x395   :  { %v7225_v15 = vadd.f32 %v4285_v3, %v4245_v10  ;;  %4611 = vmatprep.mubr.bf16.mxu0 %v7134_v7  ;;  %v4247_v2 = vadd.f32 %v4246_v14, %v1461_v35  ;;  %v4287_v16 = vpop.f32.mrf.mxu0  ;;  %4540 = vmatprep.subr.bf16.mxu1 %v5788_v55  ;;  %v5772_v7 = vcombine.high %v967_v19, %v971_v21  ;;  %v1075_v35 = vld [vmem:[#allocation11 + $0x478] sm:$0xff] }
 0x396   :  { %v4248_v22 = vpop.f32.mrf.mxu1  ;;  %4581 = vmatprep.subr.bf16.mxu0 %v5916_v62  ;;  %v5755_v55 = vcombine.low %v951_v44, %v955_v45  ;;  %v5876_v38 = vcombine.high %v1071_v54, %v1075_v35  ;;  %v935_v62 = vld [vmem:[#allocation11 + $0x18] sm:$0xff]  ;;  %v5747_v3 = vcombine.low %v943_v52, %v947_v53 }
 0x397   :  { %v7228_v58 = vadd.f32 %v4287_v16, %v4247_v2  ;;  %v4289_v6 = vpop.f32.mrf.mxu0  ;;  %4541 = vmatpush1.bf16.msra.mxu1 %v5787_v4  ;;  %v1067_v10 = vld [vmem:[#allocation11 + $0x438] sm:$0xff]  ;;  %v5875_v4 = vcombine.low %v1071_v54, %v1075_v35  ;;  %v5740_v14 = vcombine.high %v935_v62, %v939_v5  ;;  %v5739_v19 = vcombine.low %v935_v62, %v939_v5 }
 0x398   :  { %4582 = vmatpush1.bf16.msra.mxu0 %v5915_v39  ;;  %v4249_v61 = vpop.f32.mrf.mxu1  ;;  %4542 = vmatprep.subr.bf16.mxu1 %v5780_v29  ;;  %v5868_v39 = vcombine.high %v1063_v36, %v1067_v10  ;;  %v1055_v29 = vld [vmem:[#allocation11 + $0x3d8] sm:$0xff]  ;;  %v5867_v21 = vcombine.low %v1063_v36, %v1067_v10 }
 0x399   :  { %v4290_v63 = vpop.f32.mrf.mxu0  ;;  %4583 = vmatprep.subr.bf16.mxu0 %v5908_v17  ;;  %v1059_v2 = vld [vmem:[#allocation11 + $0x3f8] sm:$0xff] }
 0x39a   :  { %v1183_v16 = vld [vmem:[#allocation11 + $0x7d8] sm:$0xff]  ;;  %v5860_v22 = vcombine.high %v1055_v29, %v1059_v2 }
 0x39b   :  { %4543 = vmatpush1.bf16.msra.mxu1 %v5779_v59  ;;  %v1187_v17 = vld [vmem:[#allocation11 + $0x7f8] sm:$0xff] }
 0x39c   :  { %4584 = vmatpush1.bf16.msra.mxu0 %v5907_v18  ;;  %4544 = vmatprep.subr.bf16.mxu1 %v5772_v7  ;;  %v5988_v25 = vcombine.high %v1183_v16, %v1187_v17  ;;  %v1051_v6 = vld [vmem:[#allocation11 + $0x3b8] sm:$0xff]  ;;  %v5859_v18 = vcombine.low %v1055_v29, %v1059_v2  ;;  %v5987_v7 = vcombine.low %v1183_v16, %v1187_v17 }
 0x39d   :  { %4585 = vmatprep.subr.bf16.mxu0 %v5900_v1  ;;  %v1175_v59 = vld [vmem:[#allocation11 + $0x798] sm:$0xff]  ;;  %v5852_v63 = vcombine.high %v1047_v57, %v1051_v6 }
 0x39e   :  { %v1179_v61 = vld [vmem:[#allocation11 + $0x7b8] sm:$0xff] }
 0x39f   :  { %4545 = vmatpush1.bf16.msra.mxu1 %v5771_v40  ;;  %v5980_v1 = vcombine.high %v1175_v59, %v1179_v61  ;;  %v1043_v27 = vld [vmem:[#allocation11 + $0x378] sm:$0xff]  ;;  %v5851_v40 = vcombine.low %v1047_v57, %v1051_v6 }
 0x3a0   :  { %4586 = vmatpush1.bf16.msra.mxu0 %v5899_v41  ;;  %4546 = vmatprep.subr.bf16.mxu1 %v5764_v42  ;;  %v1167_v28 = vld [vmem:[#allocation11 + $0x758] sm:$0xff]  ;;  %v5979_v41 = vcombine.low %v1175_v59, %v1179_v61  ;;  %v5844_v42 = vcombine.high %v1039_v26, %v1043_v27 }
 0x3a1   :  { %4587 = vmatprep.subr.bf16.mxu0 %v5892_v43  ;;  %v1171_v33 = vld [vmem:[#allocation11 + $0x778] sm:$0xff] }
 0x3a2   :  { %v5972_v43 = vcombine.high %v1167_v28, %v1171_v33  ;;  %v1031_v44 = vld [vmem:[#allocation11 + $0x318] sm:$0xff] }
 0x3a3   :  { %4547 = vmatpush1.bf16.msra.mxu1 %v5763_v37  ;;  %v1035_v45 = vld [vmem:[#allocation11 + $0x338] sm:$0xff]  ;;  %v5843_v37 = vcombine.low %v1039_v26, %v1043_v27 }
 0x3a4   :  { %4588 = vmatpush1.bf16.msra.mxu0 %v5891_v48  ;;  %4548 = vmatprep.subr.bf16.mxu1 %v5756_v50  ;;  %v1159_v46 = vld [vmem:[#allocation11 + $0x718] sm:$0xff]  ;;  %v5971_v48 = vcombine.low %v1167_v28, %v1171_v33  ;;  %v5836_v50 = vcombine.high %v1031_v44, %v1035_v45 }
 0x3a5   :  { %4589 = vmatprep.subr.bf16.mxu0 %v5884_v51  ;;  %v1163_v47 = vld [vmem:[#allocation11 + $0x738] sm:$0xff] }
 0x3a6   :  { %v5964_v51 = vcombine.high %v1159_v46, %v1163_v47  ;;  %v1023_v52 = vld [vmem:[#allocation11 + $0x2d8] sm:$0xff] }
 0x3a7   :  { %4549 = vmatpush1.bf16.msra.mxu1 %v5755_v55  ;;  %v1027_v53 = vld [vmem:[#allocation11 + $0x2f8] sm:$0xff]  ;;  %v5835_v55 = vcombine.low %v1031_v44, %v1035_v45 }
 0x3a8   :  { %4590 = vmatpush1.bf16.msra.mxu0 %v5883_v56  ;;  %4550 = vmatprep.subr.bf16.mxu1 %v5748_v60  ;;  %v1151_v54 = vld [vmem:[#allocation11 + $0x6d8] sm:$0xff]  ;;  %v5963_v56 = vcombine.low %v1159_v46, %v1163_v47  ;;  %v5828_v60 = vcombine.high %v1023_v52, %v1027_v53 }
 0x3a9   :  { %4591 = vmatprep.subr.bf16.mxu0 %v5876_v38  ;;  %v1155_v35 = vld [vmem:[#allocation11 + $0x6f8] sm:$0xff] }
 0x3aa   :  { %v5956_v38 = vcombine.high %v1151_v54, %v1155_v35  ;;  %v1015_v62 = vld [vmem:[#allocation11 + $0x298] sm:$0xff] }
 0x3ab   :  { %4551 = vmatpush1.bf16.msra.mxu1 %v5747_v3  ;;  %v1019_v5 = vld [vmem:[#allocation11 + $0x2b8] sm:$0xff]  ;;  %v5827_v3 = vcombine.low %v1023_v52, %v1027_v53 }
 0x3ac   :  { %4592 = vmatpush1.bf16.msra.mxu0 %v5875_v4  ;;  %4552 = vmatprep.subr.bf16.mxu1 %v5740_v14  ;;  %v1143_v36 = vld [vmem:[#allocation11 + $0x698] sm:$0xff]  ;;  %v5955_v4 = vcombine.low %v1151_v54, %v1155_v35  ;;  %v5820_v14 = vcombine.high %v1015_v62, %v1019_v5 }
 0x3ad   :  { %4593 = vmatprep.subr.bf16.mxu0 %v5868_v39  ;;  %v1147_v10 = vld [vmem:[#allocation11 + $0x6b8] sm:$0xff] }
 0x3ae   :  { %v5948_v39 = vcombine.high %v1143_v36, %v1147_v10  ;;  %v1007_v29 = vld [vmem:[#allocation11 + $0x258] sm:$0xff] }
 0x3af   :  { %4553 = vmatpush1.bf16.msra.mxu1 %v5739_v19  ;;  %v1011_v2 = vld [vmem:[#allocation11 + $0x278] sm:$0xff]  ;;  %v5819_v19 = vcombine.low %v1015_v62, %v1019_v5 }
 0x3b0   :  { %4594 = vmatpush1.bf16.msra.mxu0 %v5867_v21  ;;  %4554 = vmatprep.subr.bf16.mxu1 %v5860_v22  ;;  %v1135_v16 = vld [vmem:[#allocation11 + $0x658] sm:$0xff]  ;;  %v5947_v21 = vcombine.low %v1143_v36, %v1147_v10  ;;  %v5812_v22 = vcombine.high %v1007_v29, %v1011_v2 }
 0x3b1   :  { %4595 = vmatprep.subr.bf16.mxu0 %v5988_v25  ;;  %v1139_v17 = vld [vmem:[#allocation11 + $0x678] sm:$0xff] }
 0x3b2   :  { %v5940_v25 = vcombine.high %v1135_v16, %v1139_v17  ;;  %v999_v57 = vld [vmem:[#allocation11 + $0x218] sm:$0xff] }
 0x3b3   :  { %4555 = vmatpush2.bf16.msra.mxu1 %v5859_v18  ;;  %v1003_v6 = vld [vmem:[#allocation11 + $0x238] sm:$0xff]  ;;  %v5811_v18 = vcombine.low %v1007_v29, %v1011_v2 }
 0x3b4   :  { %4596 = vmatpush2.bf16.msra.mxu0 %v5987_v7  ;;  %4556 = vmatprep.subr.bf16.mxu1 %v5852_v63  ;;  %v1127_v59 = vld [vmem:[#allocation11 + $0x618] sm:$0xff]  ;;  %v5939_v7 = vcombine.low %v1135_v16, %v1139_v17  ;;  %v5804_v63 = vcombine.high %v999_v57, %v1003_v6 }
 0x3b5   :  { %4597 = vmatprep.subr.bf16.mxu0 %v5980_v1  ;;  %v1131_v61 = vld [vmem:[#allocation11 + $0x638] sm:$0xff] }
 0x3b6   :  { %v5932_v1 = vcombine.high %v1127_v59, %v1131_v61  ;;  %v1247_v26 = vld [vmem:[#allocation11 + $0x9d8] sm:$0xff] }
 0x3b7   :  { %4557 = vmatpush2.bf16.msra.mxu1 %v5851_v40  ;;  %v1251_v27 = vld [vmem:[#allocation11 + $0x9f8] sm:$0xff]  ;;  %v5803_v40 = vcombine.low %v999_v57, %v1003_v6 }
 0x3b8   :  { %4598 = vmatpush2.bf16.msra.mxu0 %v5979_v41  ;;  %4558 = vmatprep.subr.bf16.mxu1 %v5844_v42  ;;  %v1375_v28 = vld [vmem:[#allocation11 + $0xdd8] sm:$0xff]  ;;  %v5931_v41 = vcombine.low %v1127_v59, %v1131_v61  ;;  %v6052_v42 = vcombine.high %v1247_v26, %v1251_v27  ;;  %v6051_v46 = vcombine.low %v1247_v26, %v1251_v27 }
 0x3b9   :  { %4599 = vmatprep.subr.bf16.mxu0 %v5972_v43  ;;  %v1379_v33 = vld [vmem:[#allocation11 + $0xdf8] sm:$0xff] }
 0x3ba   :  { %v6180_v43 = vcombine.high %v1375_v28, %v1379_v33  ;;  %v1239_v44 = vld [vmem:[#allocation11 + $0x998] sm:$0xff] }
 0x3bb   :  { %4559 = vmatpush2.bf16.msra.mxu1 %v5843_v37  ;;  %v1243_v45 = vld [vmem:[#allocation11 + $0x9b8] sm:$0xff] }
 0x3bc   :  { %4600 = vmatpush2.bf16.msra.mxu0 %v5971_v48  ;;  %4560 = vmatprep.subr.bf16.mxu1 %v5836_v50  ;;  %v1367_v47 = vld [vmem:[#allocation11 + $0xd98] sm:$0xff]  ;;  %v6179_v48 = vcombine.low %v1375_v28, %v1379_v33  ;;  %v6044_v50 = vcombine.high %v1239_v44, %v1243_v45 }
 0x3bd   :  { %4601 = vmatprep.subr.bf16.mxu0 %v5964_v51  ;;  %v1371_v37 = vld [vmem:[#allocation11 + $0xdb8] sm:$0xff] }
 0x3be   :  { %v1231_v51 = vld [vmem:[#allocation11 + $0x958] sm:$0xff]  ;;  %v6172_v54 = vcombine.high %v1367_v47, %v1371_v37  ;;  %v6171_v5 = vcombine.low %v1367_v47, %v1371_v37 }
 0x3bf   :  { %4561 = vmatpush2.bf16.msra.mxu1 %v5835_v55  ;;  %v1235_v52 = vld [vmem:[#allocation11 + $0x978] sm:$0xff] }
 0x3c0   :  { %4602 = vmatpush2.bf16.msra.mxu0 %v5963_v56  ;;  %4562 = vmatprep.subr.bf16.mxu1 %v5828_v60  ;;  %v1359_v35 = vld [vmem:[#allocation11 + $0xd58] sm:$0xff]  ;;  %v6036_v36 = vcombine.high %v1231_v51, %v1235_v52  ;;  %v6035_v29 = vcombine.low %v1231_v51, %v1235_v52 }
 0x3c1   :  { %4603 = vmatprep.subr.bf16.mxu0 %v5956_v38  ;;  %v1363_v55 = vld [vmem:[#allocation11 + $0xd78] sm:$0xff]  ;;  %v6043_v38 = vcombine.low %v1239_v44, %v1243_v45 }
 0x3c2   :  { %v6163_v16 = vcombine.low %v1359_v35, %v1363_v55  ;;  %v1347_v57 = vld [vmem:[#allocation11 + $0xcf8] sm:$0xff] }
 0x3c3   :  { %4563 = vmatpush2.bf16.msra.mxu1 %v5827_v3  ;;  %v1223_v3 = vld [vmem:[#allocation11 + $0x918] sm:$0xff] }
 0x3c4   :  { %4604 = vmatpush2.bf16.msra.mxu0 %v5955_v4  ;;  %4564 = vmatprep.subr.bf16.mxu1 %v5820_v14  ;;  %v1227_v4 = vld [vmem:[#allocation11 + $0x938] sm:$0xff] }
 0x3c5   :  { %4605 = vmatprep.subr.bf16.mxu0 %v5948_v39  ;;  %v1351_v14 = vld [vmem:[#allocation11 + $0xd18] sm:$0xff]  ;;  %v6028_v17 = vcombine.high %v1223_v3, %v1227_v4  ;;  %v6027_v6 = vcombine.low %v1223_v3, %v1227_v4 }
 0x3c6   :  { %v1355_v39 = vld [vmem:[#allocation11 + $0xd38] sm:$0xff] }
 0x3c7   :  { %4565 = vmatpush2.bf16.msra.mxu1 %v5819_v19  ;;  %v6155_v59 = vcombine.low %v1351_v14, %v1355_v39  ;;  %v1339_v26 = vld [vmem:[#allocation11 + $0xcb8] sm:$0xff] }
 0x3c8   :  { %4606 = vmatpush2.bf16.msra.mxu0 %v5947_v21  ;;  %4566 = vmatprep.subr.bf16.mxu1 %v5812_v22  ;;  %v1215_v21 = vld [vmem:[#allocation11 + $0x8d8] sm:$0xff] }
 0x3c9   :  { %4607 = vmatprep.subr.bf16.mxu0 %v5940_v25  ;;  %v1219_v22 = vld [vmem:[#allocation11 + $0x8f8] sm:$0xff] }
 0x3ca   :  { %v1343_v25 = vld [vmem:[#allocation11 + $0xcd8] sm:$0xff]  ;;  %v6020_v61 = vcombine.high %v1215_v21, %v1219_v22  ;;  %v6019_v27 = vcombine.low %v1215_v21, %v1219_v22 }
 0x3cb   :  { %4567 = vmatpush2.bf16.msra.mxu1 %v5811_v18  ;;  %v6148_v18 = vcombine.high %v1343_v25, %v1347_v57  ;;  %v6147_v28 = vcombine.low %v1343_v25, %v1347_v57  ;;  %v1331_v44 = vld [vmem:[#allocation11 + $0xc78] sm:$0xff] }
 0x3cc   :  { %4608 = vmatpush2.bf16.msra.mxu0 %v5939_v7  ;;  %4568 = vmatprep.subr.bf16.mxu1 %v5804_v63  ;;  %v1207_v7 = vld [vmem:[#allocation11 + $0x898] sm:$0xff] }
 0x3cd   :  { %4609 = vmatprep.subr.bf16.mxu0 %v5932_v1  ;;  %v1211_v63 = vld [vmem:[#allocation11 + $0x8b8] sm:$0xff] }
 0x3ce   :  { %v1335_v1 = vld [vmem:[#allocation11 + $0xc98] sm:$0xff]  ;;  %v6012_v33 = vcombine.high %v1207_v7, %v1211_v63  ;;  %v6011_v45 = vcombine.low %v1207_v7, %v1211_v63 }
 0x3cf   :  { %4569 = vmatpush2.bf16.msra.mxu1 %v5803_v40  ;;  %v6140_v40 = vcombine.high %v1335_v1, %v1339_v26  ;;  %v1319_v51 = vld [vmem:[#allocation11 + $0xc18] sm:$0xff] }
 0x3d0   :  { %4610 = vmatpush2.bf16.msra.mxu0 %v5931_v41  ;;  %4620 = vmatprep.subr.bf16.mxu1 %v6052_v42  ;;  %v1199_v41 = vld [vmem:[#allocation11 + $0x858] sm:$0xff] }
 0x3d1   :  { %4661 = vmatprep.subr.bf16.mxu0 %v6180_v43  ;;  %v1203_v42 = vld [vmem:[#allocation11 + $0x878] sm:$0xff] }
 0x3d2   :  { %v4326_v53 = vpop.f32.mrf.mxu1  ;;  %4571 = vmatmul.mubr.bf16.vlgmr.msra.gmra.mxu1 %v7136_v8  ;;  %v1327_v43 = vld [vmem:[#allocation11 + $0xc58] sm:$0xff]  ;;  %v6004_v47 = vcombine.high %v1199_v41, %v1203_v42 }
 0x3d3   :  { %v4327_v56 = vadd.f32 %v4326_v53, %v7225_v15  ;;  %v4367_v60 = vpop.f32.mrf.mxu0  ;;  %4612 = vmatmul.mubr.bf16.vlgmr.msra.gmra.mxu0 %v7138_v9  ;;  %4621 = vmatpush1.bf16.msra.mxu1 %v6051_v46  ;;  %v6164_v15 = vcombine.high %v1359_v35, %v1363_v55  ;;  %v6139_v46 = vcombine.low %v1335_v1, %v1339_v26  ;;  %v1323_v52 = vld [vmem:[#allocation11 + $0xc38] sm:$0xff] }
 0x3d4   :  { %4652 = vmatprep.mubr.bf16.mxu1 %v7162_v30  ;;  %4662 = vmatpush1.bf16.msra.mxu0 %v6179_v48  ;;  %v7234_v62 = vpop.f32.mrf.mxu1  ;;  %v6132_v37 = vcombine.high %v1327_v43, %v1331_v44  ;;  %v1191_v48 = vld [vmem:[#allocation11 + $0x818] sm:$0xff]  ;;  %v6003_v53 = vcombine.low %v1199_v41, %v1203_v42  ;;  %v6124_v55 = vcombine.high %v1319_v51, %v1323_v52 }
 0x3d5   :  { %v7236_v10 = vadd.f32 %v4367_v60, %v4327_v56  ;;  %4693 = vmatprep.mubr.bf16.mxu0 %v7164_v32  ;;  %v7239_v8 = vpop.f32.mrf.mxu0  ;;  %4622 = vmatprep.subr.bf16.mxu1 %v6044_v50  ;;  %v6156_v32 = vcombine.high %v1351_v14, %v1355_v39  ;;  %v1195_v50 = vld [vmem:[#allocation11 + $0x838] sm:$0xff] }
 0x3d6   :  { %v4330_v9 = vpop.f32.mrf.mxu1  ;;  %4663 = vmatprep.subr.bf16.mxu0 %v6172_v54  ;;  %v6131_v54 = vcombine.low %v1327_v43, %v1331_v44  ;;  %v5996_v35 = vcombine.high %v1191_v48, %v1195_v50  ;;  %v1311_v56 = vld [vmem:[#allocation11 + $0xbd8] sm:$0xff] }
 0x3d7   :  { %v4371_v30 = vpop.f32.mrf.mxu0  ;;  %4623 = vmatpush1.bf16.msra.mxu1 %v6043_v38  ;;  %v1315_v60 = vld [vmem:[#allocation11 + $0xbf8] sm:$0xff] }
 0x3d8   :  { %4664 = vmatpush1.bf16.msra.mxu0 %v6171_v5  ;;  %v4331_v2 = vpop.f32.mrf.mxu1  ;;  %4624 = vmatprep.subr.bf16.mxu1 %v6036_v36  ;;  %v1439_v38 = vld [vmem:[#allocation11 + $0xfd8] sm:$0xff]  ;;  %v5995_v36 = vcombine.low %v1191_v48, %v1195_v50  ;;  %v6116_v3 = vcombine.high %v1311_v56, %v1315_v60 }
 0x3d9   :  { %v4372_v19 = vpop.f32.mrf.mxu0  ;;  %4665 = vmatprep.subr.bf16.mxu0 %v6164_v15  ;;  %v1443_v5 = vld [vmem:[#allocation11 + $0xff8] sm:$0xff]  ;;  %v6123_v15 = vcombine.low %v1319_v51, %v1323_v52 }
 0x3da   :  { %v6244_v4 = vcombine.high %v1439_v38, %v1443_v5  ;;  %v1303_v9 = vld [vmem:[#allocation11 + $0xb98] sm:$0xff]  ;;  %v6243_v2 = vcombine.low %v1439_v38, %v1443_v5 }
 0x3db   :  { %4625 = vmatpush1.bf16.msra.mxu1 %v6035_v29  ;;  %v1307_v14 = vld [vmem:[#allocation11 + $0xbb8] sm:$0xff]  ;;  %v6115_v29 = vcombine.low %v1311_v56, %v1315_v60 }
 0x3dc   :  { %4666 = vmatpush1.bf16.msra.mxu0 %v6163_v16  ;;  %4626 = vmatprep.subr.bf16.mxu1 %v6028_v17  ;;  %v1431_v39 = vld [vmem:[#allocation11 + $0xf98] sm:$0xff]  ;;  %v6108_v16 = vcombine.high %v1303_v9, %v1307_v14  ;;  %v6107_v25 = vcombine.low %v1303_v9, %v1307_v14 }
 0x3dd   :  { %4667 = vmatprep.subr.bf16.mxu0 %v6156_v32  ;;  %v1435_v30 = vld [vmem:[#allocation11 + $0xfb8] sm:$0xff] }
 0x3de   :  { %v6236_v17 = vcombine.high %v1431_v39, %v1435_v30  ;;  %v1295_v19 = vld [vmem:[#allocation11 + $0xb58] sm:$0xff]  ;;  %v6235_v57 = vcombine.low %v1431_v39, %v1435_v30  ;;  %v4329_v39 = vadd.f32 %v7234_v62, %v7228_v58  ;;  %v4703_v58 = vmax.f32 %v7214_v24, 0.0 }
 0x3df   :  { %4627 = vmatpush1.bf16.msra.mxu1 %v6027_v6  ;;  %v1299_v32 = vld [vmem:[#allocation11 + $0xb78] sm:$0xff] }
 0x3e0   :  { %4668 = vmatpush1.bf16.msra.mxu0 %v6155_v59  ;;  %4628 = vmatprep.subr.bf16.mxu1 %v6020_v61  ;;  %v1423_v21 = vld [vmem:[#allocation11 + $0xf58] sm:$0xff]  ;;  %v6100_v6 = vcombine.high %v1295_v19, %v1299_v32  ;;  %v6099_v1 = vcombine.low %v1295_v19, %v1299_v32 }
 0x3e1   :  { %4669 = vmatprep.subr.bf16.mxu0 %v6148_v18  ;;  %v1427_v22 = vld [vmem:[#allocation11 + $0xf78] sm:$0xff] }
 0x3e2   :  { %v6228_v59 = vcombine.high %v1423_v21, %v1427_v22  ;;  %v1287_v61 = vld [vmem:[#allocation11 + $0xb18] sm:$0xff]  ;;  %v6227_v26 = vcombine.low %v1423_v21, %v1427_v22  ;;  %v6533_v21 = vld [vmem:[#allocation14 + $0x78] sm:$0xff]  }
 0x3e3   :  { %4629 = vmatpush1.bf16.msra.mxu1 %v6019_v27  ;;  %v1291_v18 = vld [vmem:[#allocation11 + $0xb38] sm:$0xff]  ;;  %v6534_v22 = vld [vmem:[#allocation14 + $0xf8] sm:$0xff]  }
 0x3e4   :  { %4670 = vmatpush1.bf16.msra.mxu0 %v6147_v28  ;;  %4630 = vmatprep.subr.bf16.mxu1 %v6012_v33  ;;  %v1415_v7 = vld [vmem:[#allocation11 + $0xf18] sm:$0xff]  ;;  %v6092_v27 = vcombine.high %v1287_v61, %v1291_v18  ;;  %v6091_v43 = vcombine.low %v1287_v61, %v1291_v18 }
 0x3e5   :  { %4671 = vmatprep.subr.bf16.mxu0 %v6140_v40  ;;  %v1419_v63 = vld [vmem:[#allocation11 + $0xf38] sm:$0xff] }
 0x3e6   :  { %v6220_v28 = vcombine.high %v1415_v7, %v1419_v63  ;;  %v1279_v33 = vld [vmem:[#allocation11 + $0xad8] sm:$0xff]  ;;  %v6219_v44 = vcombine.low %v1415_v7, %v1419_v63 }
 0x3e7   :  { %4631 = vmatpush1.bf16.msra.mxu1 %v6011_v45  ;;  %v1283_v40 = vld [vmem:[#allocation11 + $0xaf8] sm:$0xff] }
 0x3e8   :  { %4672 = vmatpush1.bf16.msra.mxu0 %v6139_v46  ;;  %4632 = vmatprep.subr.bf16.mxu1 %v6004_v47  ;;  %v1407_v41 = vld [vmem:[#allocation11 + $0xed8] sm:$0xff]  ;;  %v6084_v45 = vcombine.high %v1279_v33, %v1283_v40  ;;  %v6083_v51 = vcombine.low %v1279_v33, %v1283_v40  ;;  %v6543_v40 = vld [vmem:[#allocation14 + $0x28] sm:$0xff]  }
 0x3e9   :  { %4673 = vmatprep.subr.bf16.mxu0 %v6132_v37  ;;  %v1411_v42 = vld [vmem:[#allocation11 + $0xef8] sm:$0xff] }
 0x3ea   :  { %v6212_v46 = vcombine.high %v1407_v41, %v1411_v42  ;;  %v1271_v47 = vld [vmem:[#allocation11 + $0xa98] sm:$0xff]  ;;  %v6211_v52 = vcombine.low %v1407_v41, %v1411_v42  ;;  %v6544_v41 = vld [vmem:[#allocation14 + $0xa8] sm:$0xff]   ;;  %v6545_v42 = vld [vmem:[#allocation14 + $0x60] sm:$0xff]  }
 0x3eb   :  { %4633 = vmatpush1.bf16.msra.mxu1 %v6003_v53  ;;  %v1275_v37 = vld [vmem:[#allocation11 + $0xab8] sm:$0xff] }
 0x3ec   :  { %4674 = vmatpush1.bf16.msra.mxu0 %v6131_v54  ;;  %4634 = vmatprep.subr.bf16.mxu1 %v5996_v35  ;;  %v1399_v48 = vld [vmem:[#allocation11 + $0xe98] sm:$0xff]  ;;  %v6076_v53 = vcombine.high %v1271_v47, %v1275_v37  ;;  %v6075_v38 = vcombine.low %v1271_v47, %v1275_v37  ;;  %v6549_v47 = vld [vmem:[#allocation14 + $0x58] sm:$0xff]  }
 0x3ed   :  { %4675 = vmatprep.subr.bf16.mxu0 %v6124_v55  ;;  %v1403_v50 = vld [vmem:[#allocation11 + $0xeb8] sm:$0xff]  ;;  %v6550_v37 = vld [vmem:[#allocation14 + $0xd8] sm:$0xff]  }
 0x3ee   :  { %v6204_v54 = vcombine.high %v1399_v48, %v1403_v50  ;;  %v1263_v35 = vld [vmem:[#allocation11 + $0xa58] sm:$0xff]  ;;  %v6203_v5 = vcombine.low %v1399_v48, %v1403_v50  ;;  %v6551_v48 = vld [vmem:[#allocation14 + $0x18] sm:$0xff]  }
 0x3ef   :  { %4635 = vmatpush1.bf16.msra.mxu1 %v5995_v36  ;;  %v1267_v55 = vld [vmem:[#allocation11 + $0xa78] sm:$0xff]  ;;  %v6552_v50 = vld [vmem:[#allocation14 + $0x98] sm:$0xff]  }
 0x3f0   :  { %4676 = vmatpush1.bf16.msra.mxu0 %v6123_v15  ;;  %4636 = vmatprep.subr.bf16.mxu1 %v6116_v3  ;;  %v1391_v56 = vld [vmem:[#allocation11 + $0xe58] sm:$0xff]  ;;  %v6068_v36 = vcombine.high %v1263_v35, %v1267_v55  ;;  %v6067_v30 = vcombine.low %v1263_v35, %v1267_v55  ;;  %v6557_v35 = vld [vmem:[#allocation14 + $0x48] sm:$0xff]  }
 0x3f1   :  { %4677 = vmatprep.subr.bf16.mxu0 %v6244_v4  ;;  %v1395_v60 = vld [vmem:[#allocation11 + $0xe78] sm:$0xff]  ;;  %v6558_v55 = vld [vmem:[#allocation14 + $0xc8] sm:$0xff]  }
 0x3f2   :  { %v6196_v15 = vcombine.high %v1391_v56, %v1395_v60  ;;  %v1255_v3 = vld [vmem:[#allocation11 + $0xa18] sm:$0xff] }
 0x3f3   :  { %4637 = vmatpush2.bf16.msra.mxu1 %v6115_v29  ;;  %v1259_v4 = vld [vmem:[#allocation11 + $0xa38] sm:$0xff]  ;;  %v6195_v29 = vcombine.low %v1391_v56, %v1395_v60  ;;  %v6559_v56 = vld [vmem:[#allocation14 + $0x8] sm:$0xff]  }
 0x3f4   :  { %4678 = vmatpush2.bf16.msra.mxu0 %v6243_v2  ;;  %4638 = vmatprep.subr.bf16.mxu1 %v6108_v16  ;;  %v1383_v9 = vld [vmem:[#allocation11 + $0xe18] sm:$0xff]  ;;  %v6060_v2 = vcombine.high %v1255_v3, %v1259_v4  ;;  %v6059_v19 = vcombine.low %v1255_v3, %v1259_v4  ;;  %v6560_v60 = vld [vmem:[#allocation14 + $0x88] sm:$0xff]   ;;  %v6564_v3 = vld [vmem:[#allocation14 + $0x80] sm:$0xff]  }
 0x3f5   :  { %4679 = vmatprep.subr.bf16.mxu0 %v6236_v17  ;;  %v1387_v14 = vld [vmem:[#allocation11 + $0xe38] sm:$0xff]  ;;  %v4370_v17 = vadd.f32 %v7239_v8, %v4329_v39  ;;  %v6565_v4 = vld [vmem:[#allocation14 + $0x178] sm:$0xff]  }
 0x3f6   :  { %v6188_v16 = vcombine.high %v1383_v9, %v1387_v14  ;;  %v6187_v32 = vcombine.low %v1383_v9, %v1387_v14  ;;  %v6538_v61 = vld [vmem:[#allocation14 + $0xf0] sm:$0xff]   ;;  %v4704_v9 = vmax.f32 %v7236_v10, 0.0  ;;  %v6581_v14 = vld [vmem:[#allocation14 + $0x1f8] sm:$0xff]  }
 0x3f7   :  { %4639 = vmatpush2.bf16.msra.mxu1 %v6107_v25  ;;  %v4705_v62 = vmax.f32 %v4370_v17, 0.0  ;;  %v6535_v25 = vld [vmem:[#allocation14 + $0x38] sm:$0xff]   ;;  %v6539_v24 = vld [vmem:[#allocation14 + $0x30] sm:$0xff]  }
 0x3f8   :  { %4680 = vmatpush2.bf16.msra.mxu0 %v6235_v57  ;;  %4640 = vmatprep.subr.bf16.mxu1 %v6100_v6  ;;  %v6536_v57 = vld [vmem:[#allocation14 + $0xb8] sm:$0xff]   ;;  %v6537_v6 = vld [vmem:[#allocation14 + $0x70] sm:$0xff]  }
 0x3f9   :  { %4681 = vmatprep.subr.bf16.mxu0 %v6228_v59  ;;  %v4711_v59 = vpack.c.bf16 %v4703_v58, %v4703_v58  ;;  %v4713_v18 = vpack.c.bf16 %v4705_v62, %v4705_v62  ;;  %v6566_v39 = vld [vmem:[#allocation14 + $0x138] sm:$0xff]   ;;  %v6583_v17 = vld [vmem:[#allocation14 + $0x1f0] sm:$0xff]   ;;  %v6586_v58 = vld [vmem:[#allocation14 + $0x1a8] sm:$0xff]  }
 0x3fa   :  { %v6584_v10 = vld [vmem:[#allocation14 + $0x1b0] sm:$0xff]   ;;  %v6587_v62 = vld [vmem:[#allocation14 + $0x1e0] sm:$0xff]  }
 0x3fb   :  { %4641 = vmatpush2.bf16.msra.mxu1 %v6099_v1  ;;  %v6540_v1 = vld [vmem:[#allocation14 + $0xb0] sm:$0xff]  }
 0x3fc   :  { %4682 = vmatpush2.bf16.msra.mxu0 %v6227_v26  ;;  %4642 = vmatprep.subr.bf16.mxu1 %v6092_v27  ;;  %v6541_v26 = vld [vmem:[#allocation14 + $0x68] sm:$0xff]  }
 0x3fd   :  { %4683 = vmatprep.subr.bf16.mxu0 %v6220_v28  ;;  %v6542_v28 = vld [vmem:[#allocation14 + $0xe8] sm:$0xff]  }
 0x3ff   :  { %4643 = vmatpush2.bf16.msra.mxu1 %v6091_v43 }
 0x400   :  { %4684 = vmatpush2.bf16.msra.mxu0 %v6219_v44  ;;  %4644 = vmatprep.subr.bf16.mxu1 %v6084_v45  ;;  %v6546_v44 = vld [vmem:[#allocation14 + $0xe0] sm:$0xff]  }
 0x401   :  { %4685 = vmatprep.subr.bf16.mxu0 %v6212_v46  ;;  %v6547_v45 = vld [vmem:[#allocation14 + $0x20] sm:$0xff]  }
 0x402   :  { %v6548_v46 = vld [vmem:[#allocation14 + $0xa0] sm:$0xff]  }
 0x403   :  { %4645 = vmatpush2.bf16.msra.mxu1 %v6083_v51  ;;  %v6553_v51 = vld [vmem:[#allocation14 + $0x50] sm:$0xff]  }
 0x404   :  { %4686 = vmatpush2.bf16.msra.mxu0 %v6211_v52  ;;  %4646 = vmatprep.subr.bf16.mxu1 %v6076_v53  ;;  %v6554_v52 = vld [vmem:[#allocation14 + $0xd0] sm:$0xff]  }
 0x405   :  { %4687 = vmatprep.subr.bf16.mxu0 %v6204_v54  ;;  %v6555_v53 = vld [vmem:[#allocation14 + $0x10] sm:$0xff]  }
 0x406   :  { %v6556_v54 = vld [vmem:[#allocation14 + $0x90] sm:$0xff]  }
 0x407   :  { %4647 = vmatpush2.bf16.msra.mxu1 %v6075_v38  ;;  %v6561_v38 = vld [vmem:[#allocation14 + $0x40] sm:$0xff]  }
 0x408   :  { %4688 = vmatpush2.bf16.msra.mxu0 %v6203_v5  ;;  %4648 = vmatprep.subr.bf16.mxu1 %v6068_v36  ;;  %v6562_v5 = vld [vmem:[#allocation14 + $0xc0] sm:$0xff]  }
 0x409   :  { %4689 = vmatprep.subr.bf16.mxu0 %v6196_v15  ;;  %v6563_v36 = vld [vmem:[#allocation14] sm:$0xff]   ;;  %v4702_v15 = vmax.f32 %v7210_v13, 0.0  ;;  %v6568_v13 = vld [vmem:[#allocation14 + $0x130] sm:$0xff]  }
 0x40b   :  { %4649 = vmatpush2.bf16.msra.mxu1 %v6067_v30  ;;  %v4710_v30 = vpack.c.bf16 %v4702_v15, %v4702_v15 }
 0x40c   :  { %4690 = vmatpush2.bf16.msra.mxu0 %v6195_v29  ;;  %4650 = vmatprep.subr.bf16.mxu1 %v6060_v2  ;;  %v6567_v29 = vld [vmem:[#allocation14 + $0x170] sm:$0xff]   ;;  %v6582_v2 = vld [vmem:[#allocation14 + $0x1b8] sm:$0xff]  }
 0x40d   :  { %4691 = vmatprep.subr.bf16.mxu0 %v6188_v16  ;;  %v4712_v16 = vpack.c.bf16 %v4704_v9, %v4704_v9 }
 0x40f   :  { %4651 = vmatpush2.bf16.msra.mxu1 %v6059_v19  ;;  %v6569_v19 = vld [vmem:[#allocation14 + $0x168] sm:$0xff]  }
 0x410   :  { %4692 = vmatpush2.bf16.msra.mxu0 %v6187_v32  ;;  %6337 = vmatprep.subr.bf16.mxu1 %v6533_v21  ;;  %v6585_v32 = vld [vmem:[#allocation14 + $0x1e8] sm:$0xff]  }
 0x411   :  { %6359 = vmatprep.subr.bf16.mxu0 %v6534_v22  ;;  %v6570_v21 = vld [vmem:[#allocation14 + $0x128] sm:$0xff]   ;;  %v6571_v22 = vld [vmem:[#allocation14 + $0x160] sm:$0xff]  }
 0x412   :  { %v7245_v8 = vpop.f32.mrf.mxu1  ;;  %4653 = vmatmul.mubr.bf16.vlgmr.msra.gmra.mxu1 %v7178_v11 }
 0x413   :  { %v7248_v7 = vpop.f32.mrf.mxu0  ;;  %4694 = vmatmul.mubr.bf16.vlgmr.msra.gmra.mxu0 %v7180_v12  ;;  %6338 = vmatpush3.bf16.msra.mxu1 %v6535_v25  ;;  %v6572_v25 = vld [vmem:[#allocation14 + $0x120] sm:$0xff]  }
 0x414   :  { %5269 = vmatprep.mubr.bf16.mxu1 %v4711_v59  ;;  %6360 = vmatpush3.bf16.msra.mxu0 %v6536_v57  ;;  %v7251_v63 = vpop.f32.mrf.mxu1  ;;  %v6573_v57 = vld [vmem:[#allocation14 + $0x158] sm:$0xff]  }
 0x415   :  { %5309 = vmatprep.mubr.bf16.mxu0 %v4713_v18  ;;  %v7253_v27 = vpop.f32.mrf.mxu0  ;;  %6339 = vmatprep.subr.bf16.mxu1 %v6537_v6  ;;  %v6588_v6 = vld [vmem:[#allocation14 + $0x1a0] sm:$0xff]   ;;  %v6589_v59 = vld [vmem:[#allocation14 + $0x1d8] sm:$0xff]   ;;  %v6575_v18 = vld [vmem:[#allocation14 + $0x150] sm:$0xff]  }
 0x416   :  { %v4412_v11 = vpop.f32.mrf.mxu1  ;;  %6361 = vmatprep.subr.bf16.mxu0 %v6538_v61  ;;  %v6574_v61 = vld [vmem:[#allocation14 + $0x118] sm:$0xff]  }
 0x417   :  { %v4453_v33 = vpop.f32.mrf.mxu0  ;;  %6340 = vmatpush3.bf16.msra.mxu1 %v6539_v24  ;;  %v6590_v24 = vld [vmem:[#allocation14 + $0x198] sm:$0xff]   ;;  %v6579_v11 = vld [vmem:[#allocation14 + $0x140] sm:$0xff]  }
 0x418   :  { %6362 = vmatpush3.bf16.msra.mxu0 %v6540_v1  ;;  %v4413_v12 = vpop.f32.mrf.mxu1  ;;  %6341 = vmatprep.subr.bf16.mxu1 %v6541_v26  ;;  %v6576_v1 = vld [vmem:[#allocation14 + $0x110] sm:$0xff]   ;;  %v6577_v26 = vld [vmem:[#allocation14 + $0x148] sm:$0xff]   ;;  %v7257_v33 = vld [vmem:[#allocation13] sm:$0xff] }
 0x419   :  { %v4454_v43 = vpop.f32.mrf.mxu0  ;;  %6363 = vmatprep.subr.bf16.mxu0 %v6542_v28  ;;  %v6578_v28 = vld [vmem:[#allocation14 + $0x108] sm:$0xff]   ;;  %v1469_v12 = vrot.slane %v7257_v33, %v414_v49 }
 0x41b   :  { %6342 = vmatpush3.bf16.msra.mxu1 %v6543_v40  ;;  %v1465_v40 = vrot.slane %v7257_v33, %v410_v20  ;;  %v4411_v43 = vadd.f32 %v7251_v63, %v1469_v12  ;;  %v6593_v63 = vld [vmem:[#allocation14 + $0x1c8] sm:$0xff]  }
 0x41c   :  { %6364 = vmatpush3.bf16.msra.mxu0 %v6544_v41  ;;  %6343 = vmatprep.subr.bf16.mxu1 %v6545_v42  ;;  %v6580_v41 = vld [vmem:[#allocation14 + $0x100] sm:$0xff]  }
 0x41d   :  { %6365 = vmatprep.subr.bf16.mxu0 %v6546_v44  ;;  %v4409_v42 = vadd.f32 %v7245_v8, %v1465_v40  ;;  %v4452_v20 = vadd.f32 %v7253_v27, %v4411_v43  ;;  %v6595_v27 = vld [vmem:[#allocation14 + $0x1c0] sm:$0xff]  }
 0x41f   :  { %6344 = vmatpush3.bf16.msra.mxu1 %v6547_v45  ;;  %v4450_v44 = vadd.f32 %v7248_v7, %v4409_v42  ;;  %v6245_v42 = vld [vmem:[#allocation16] ss:$0 sm:$0xff] }
 0x420   :  { %6366 = vmatpush3.bf16.msra.mxu0 %v6548_v46  ;;  %6345 = vmatprep.subr.bf16.mxu1 %v6549_v47  ;;  %v6591_v46 = vld [vmem:[#allocation14 + $0x1d0] sm:$0xff]  }
 0x421   :  { %6367 = vmatprep.subr.bf16.mxu0 %v6550_v37 }
 0x423   :  { %6346 = vmatpush3.bf16.msra.mxu1 %v6551_v48  ;;  %v6592_v48 = vld [vmem:[#allocation14 + $0x190] sm:$0xff]  }
 0x424   :  { %6368 = vmatpush3.bf16.msra.mxu0 %v6552_v50  ;;  %6347 = vmatprep.subr.bf16.mxu1 %v6553_v51 }
 0x425   :  { %6369 = vmatprep.subr.bf16.mxu0 %v6554_v52 }
 0x427   :  { %6348 = vmatpush3.bf16.msra.mxu1 %v6555_v53 }
 0x428   :  { %6370 = vmatpush3.bf16.msra.mxu0 %v6556_v54  ;;  %6349 = vmatprep.subr.bf16.mxu1 %v6557_v35  ;;  %v6594_v35 = vld [vmem:[#allocation14 + $0x188] sm:$0xff]  }
 0x429   :  { %6371 = vmatprep.subr.bf16.mxu0 %v6558_v55 }
 0x42b   :  { %6350 = vmatpush3.bf16.msra.mxu1 %v6559_v56 }
 0x42c   :  { %6372 = vmatpush3.bf16.msra.mxu0 %v6560_v60  ;;  %6351 = vmatprep.subr.bf16.mxu1 %v6561_v38 }
 0x42d   :  { %6373 = vmatprep.subr.bf16.mxu0 %v6562_v5  ;;  %v6596_v5 = vld [vmem:[#allocation14 + $0x180] sm:$0xff]  }
 0x42f   :  { %6352 = vmatpush3.bf16.msra.mxu1 %v6563_v36 }
 0x430   :  { %6374 = vmatpush3.bf16.msra.mxu0 %v6564_v3  ;;  %6381 = vmatprep.subr.bf16.mxu1 %v6565_v4 }
 0x431   :  { %6403 = vmatprep.subr.bf16.mxu0 %v6581_v14 }
 0x432   :  { %5270 = vmatmul.mubr.bf16.vlgmr.msra.gmra.mxu1 %v4710_v30 }
 0x433   :  { %5310 = vmatmul.mubr.bf16.vlgmr.msra.gmra.mxu0 %v4712_v16  ;;  %6382 = vmatpush3.bf16.msra.mxu1 %v6566_v39  ;;  %v6598_v16 = vld [vmem:[#allocation17 + $0x30] sm:$0xff]  }
 0x434   :  { %6383 = vmatprep.subr.bf16.mxu1 %v6567_v29  ;;  %6404 = vmatpush3.bf16.msra.mxu0 %v6582_v2  ;;  %v6597_v2 = vld [vmem:[#allocation17 + $0x38] sm:$0xff]  }
 0x435   :  { %6405 = vmatprep.subr.bf16.mxu0 %v6583_v17  ;;  %v6599_v17 = vld [vmem:[#allocation17 + $0x28] sm:$0xff]  }
 0x437   :  { %6384 = vmatpush3.bf16.msra.mxu1 %v6568_v13  ;;  %v6600_v13 = vld [vmem:[#allocation17 + $0x20] sm:$0xff]  }
 0x438   :  { %6385 = vmatprep.subr.bf16.mxu1 %v6569_v19  ;;  %6406 = vmatpush3.bf16.msra.mxu0 %v6584_v10  ;;  %v6601_v19 = vld [vmem:[#allocation17 + $0x18] sm:$0xff]   ;;  %v1473_v10 = vrot.slane %v7257_v33, %v418_v23 }
 0x439   :  { %6407 = vmatprep.subr.bf16.mxu0 %v6585_v32  ;;  %v1477_v32 = vrot.slane %v7257_v33, %v422_v31 }
 0x43b   :  { %6386 = vmatpush3.bf16.msra.mxu1 %v6570_v21 }
 0x43c   :  { %6387 = vmatprep.subr.bf16.mxu1 %v6571_v22  ;;  %6408 = vmatpush3.bf16.msra.mxu0 %v6586_v58 }
 0x43d   :  { %6409 = vmatprep.subr.bf16.mxu0 %v6587_v62 }
 0x43f   :  { %6388 = vmatpush3.bf16.msra.mxu1 %v6572_v25 }
 0x440   :  { %6389 = vmatprep.subr.bf16.mxu1 %v6573_v57  ;;  %6410 = vmatpush3.bf16.msra.mxu0 %v6588_v6 }
 0x441   :  { %6411 = vmatprep.subr.bf16.mxu0 %v6589_v59 }
 0x443   :  { %6390 = vmatpush3.bf16.msra.mxu1 %v6574_v61 }
 0x444   :  { %6391 = vmatprep.subr.bf16.mxu1 %v6575_v18  ;;  %6412 = vmatpush3.bf16.msra.mxu0 %v6590_v24 }
 0x445   :  { %6413 = vmatprep.subr.bf16.mxu0 %v6591_v46 }
 0x447   :  { %6392 = vmatpush3.bf16.msra.mxu1 %v6576_v1 }
 0x448   :  { %6393 = vmatprep.subr.bf16.mxu1 %v6577_v26  ;;  %6414 = vmatpush3.bf16.msra.mxu0 %v6592_v48 }
 0x449   :  { %6415 = vmatprep.subr.bf16.mxu0 %v6593_v63 }
 0x44b   :  { %6394 = vmatpush3.bf16.msra.mxu1 %v6578_v28 }
 0x44c   :  { %6395 = vmatprep.subr.bf16.mxu1 %v6579_v11  ;;  %6416 = vmatpush3.bf16.msra.mxu0 %v6594_v35 }
 0x44d   :  { %6417 = vmatprep.subr.bf16.mxu0 %v6595_v27  ;;  %v6607_v27 = vld [vmem:[#allocation20 + $0x28] sm:$0xff]  }
 0x44f   :  { %6396 = vmatpush3.bf16.msra.mxu1 %v6580_v41 }
 0x450   :  { %6463 = vmatprep.subr.bf16.mxu1 %v6949_v0  ;;  %6418 = vmatpush3.bf16.msra.mxu0 %v6596_v5  ;;  %v6609_v5 = vld [vmem:[#allocation20 + $0x18] sm:$0xff]  }
 0x451   :  { %6483 = vmatprep.subr.bf16.mxu0 %v6949_v0 }
 0x452   :  { %v4490_v45 = vpop.f32.mrf.mxu1 }
 0x453   :  { %v4491_v47 = vadd.f32 %v4490_v45, %v4450_v44  ;;  %v4531_v37 = vpop.f32.mrf.mxu0 }
 0x454   :  { %v4492_v49 = vpop.f32.mrf.mxu1 }
 0x455   :  { %v4532_v50 = vadd.f32 %v4531_v37, %v4491_v47  ;;  %v4493_v51 = vadd.f32 %v4492_v49, %v4452_v20  ;;  %v4533_v52 = vpop.f32.mrf.mxu0 }
 0x456   :  { %v4494_v8 = vpop.f32.mrf.mxu1 }
 0x457   :  { %v4534_v53 = vadd.f32 %v4533_v52, %v4493_v51  ;;  %v4535_v54 = vpop.f32.mrf.mxu0  ;;  %v4706_v55 = vmax.f32 %v4532_v50, 0.0  ;;  %v6602_v52 = vld [vmem:[#allocation17 + $0x10] sm:$0xff]  }
 0x458   :  { %v4495_v7 = vpop.f32.mrf.mxu1  ;;  %v6603_v54 = vld [vmem:[#allocation17 + $0x8] sm:$0xff]  }
 0x459   :  { %v4707_v56 = vmax.f32 %v4534_v53, 0.0  ;;  %v4536_v60 = vpop.f32.mrf.mxu0  ;;  %v4714_v36 = vpack.c.bf16 %v4706_v55, %v4706_v55  ;;  %v6604_v7 = vld [vmem:[#allocation17] sm:$0xff]  }
 0x45a   :  { %v6606_v60 = vld [vmem:[#allocation20 + $0x30] sm:$0xff]  }
 0x45b   :  { %v4715_v38 = vpack.c.bf16 %v4707_v56, %v4707_v56  ;;  %v6605_v56 = vld [vmem:[#allocation20 + $0x38] sm:$0xff]  }
 0x45d   :  { %5349 = vmatprep.mubr.bf16.mxu1 %v4715_v38  ;;  %v6608_v38 = vld [vmem:[#allocation20 + $0x20] sm:$0xff]  }
 0x45e   :  { %5350 = vmatmul.mubr.bf16.vlgmr.msra.gmra.mxu1 %v4714_v36  ;;  %v6610_v36 = vld [vmem:[#allocation20 + $0x10] sm:$0xff]  }
 0x45f   :  { %6479 = vmatprep.mubr.msk.bf16.mxu1 %vm6950_vm0, %v6949_v0  ;;  %6464 = vmatpush3.bf16.msra.mxu1 %v6597_v2  ;;  %v6611_v2 = vld [vmem:[#allocation20 + $0x8] sm:$0xff]  }
 0x460   :  { %6465 = vmatprep.subr.bf16.mxu1 %v6949_v0 }
 0x463   :  { %6466 = vmatpush3.bf16.msra.mxu1 %v6598_v16  ;;  %v6612_v16 = vld [vmem:[#allocation20] sm:$0xff]  }
 0x464   :  { %6467 = vmatprep.subr.bf16.mxu1 %v6949_v0 }
 0x467   :  { %6468 = vmatpush3.bf16.msra.mxu1 %v6599_v17  ;;  %v6310_v17 = vld [vmem:[#allocation19] ss:$0 sm:$0xff] }
 0x468   :  { %6469 = vmatprep.subr.bf16.mxu1 %v6949_v0 }
 0x46b   :  { %6470 = vmatpush3.bf16.msra.mxu1 %v6600_v13 }
 0x46c   :  { %6471 = vmatprep.subr.bf16.mxu1 %v6949_v0 }
 0x46f   :  { %6472 = vmatpush3.bf16.msra.mxu1 %v6601_v19 }
 0x470   :  { %6473 = vmatprep.subr.bf16.mxu1 %v6949_v0 }
 0x473   :  { %6474 = vmatpush3.bf16.msra.mxu1 %v6602_v52 }
 0x474   :  { %6475 = vmatprep.subr.bf16.mxu1 %v6949_v0 }
 0x477   :  { %6476 = vmatpush3.bf16.msra.mxu1 %v6603_v54 }
 0x478   :  { %6477 = vmatprep.subr.bf16.mxu1 %v6949_v0 }
 0x47b   :  { %6478 = vmatpush3.bf16.msra.mxu1 %v6604_v7 }
 0x492   :  { %v4572_v15 = vpop.f32.mrf.mxu1 }
 0x493   :  { %v4613_v3 = vpop.f32.mrf.mxu0  ;;  %v4573_v21 = vadd.f32 %v4572_v15, %v1473_v10 }
 0x494   :  { %v4574_v4 = vpop.f32.mrf.mxu1 }
 0x495   :  { %v4615_v9 = vpop.f32.mrf.mxu0  ;;  %v4575_v22 = vadd.f32 %v4574_v4, %v1477_v32  ;;  %v4614_v58 = vadd.f32 %v4613_v3, %v4573_v21 }
 0x496   :  { %v4576_v14 = vpop.f32.mrf.mxu1 }
 0x497   :  { %v4617_v39 = vpop.f32.mrf.mxu0  ;;  %v4616_v25 = vadd.f32 %v4615_v9, %v4575_v22 }
 0x498   :  { %v4577_v30 = vpop.f32.mrf.mxu1 }
 0x499   :  { %v4618_v29 = vpop.f32.mrf.mxu0 }
 0x4d2   :  { %v4654_v62 = vpop.f32.mrf.mxu1 }
 0x4d3   :  { %v4655_v57 = vadd.f32 %v4654_v62, %v4614_v58  ;;  %v4695_v6 = vpop.f32.mrf.mxu0 }
 0x4d4   :  { %v4656_v59 = vpop.f32.mrf.mxu1 }
 0x4d5   :  { %v4696_v61 = vadd.f32 %v4695_v6, %v4655_v57  ;;  %v4657_v18 = vadd.f32 %v4656_v59, %v4616_v25  ;;  %v4697_v24 = vpop.f32.mrf.mxu0 }
 0x4d6   :  { %v4658_v1 = vpop.f32.mrf.mxu1 }
 0x4d7   :  { %v4698_v26 = vadd.f32 %v4697_v24, %v4657_v18  ;;  %v4699_v28 = vpop.f32.mrf.mxu0  ;;  %v4708_v11 = vmax.f32 %v4696_v61, 0.0 }
 0x4d8   :  { %v4659_v23 = vpop.f32.mrf.mxu1 }
 0x4d9   :  { %v4709_v40 = vmax.f32 %v4698_v26, 0.0  ;;  %v4700_v34 = vpop.f32.mrf.mxu0  ;;  %v4716_v31 = vpack.c.bf16 %v4708_v11, %v4708_v11 }
 0x4db   :  { %v4717_v12 = vpack.c.bf16 %v4709_v40, %v4709_v40 }
 0x4dd   :  { %5389 = vmatprep.mubr.bf16.mxu0 %v4717_v12 }
 0x4de   :  { %5390 = vmatmul.mubr.bf16.vlgmr.msra.gmra.mxu0 %v4716_v31 }
 0x4df   :  { %6499 = vmatprep.mubr.msk.bf16.mxu0 %vm6950_vm0, %v6949_v0  ;;  %6484 = vmatpush3.bf16.msra.mxu0 %v6605_v56 }
 0x4e0   :  { %6485 = vmatprep.subr.bf16.mxu0 %v6949_v0 }
 0x4e3   :  { %6486 = vmatpush3.bf16.msra.mxu0 %v6606_v60 }
 0x4e4   :  { %6487 = vmatprep.subr.bf16.mxu0 %v6949_v0 }
 0x4e7   :  { %6488 = vmatpush3.bf16.msra.mxu0 %v6607_v27 }
 0x4e8   :  { %6489 = vmatprep.subr.bf16.mxu0 %v6949_v0 }
 0x4eb   :  { %6490 = vmatpush3.bf16.msra.mxu0 %v6608_v38 }
 0x4ec   :  { %6491 = vmatprep.subr.bf16.mxu0 %v6949_v0 }
 0x4ef   :  { %6492 = vmatpush3.bf16.msra.mxu0 %v6609_v5 }
 0x4f0   :  { %6493 = vmatprep.subr.bf16.mxu0 %v6949_v0 }
 0x4f2   :  { %v6353_v33 = vpop.f32.mrf.mxu1 }
 0x4f3   :  { %v6375_v41 = vpop.f32.mrf.mxu0  ;;  %6494 = vmatpush3.bf16.msra.mxu0 %v6610_v36 }
 0x4f4   :  { %v6354_v43 = vpop.f32.mrf.mxu1  ;;  %6495 = vmatprep.subr.bf16.mxu0 %v6949_v0 }
 0x4f5   :  { %v6355_v44 = vadd.f32 %v6354_v43, %v6353_v33  ;;  %v6376_v45 = vpop.f32.mrf.mxu0 }
 0x4f6   :  { %v6377_v46 = vadd.f32 %v6376_v45, %v6375_v41  ;;  %v6356_v20 = vpop.f32.mrf.mxu1 }
 0x4f7   :  { %v5272_v47 = vadd.f32 %v6355_v44, %v6245_v42  ;;  %v6378_v37 = vpop.f32.mrf.mxu0  ;;  %6496 = vmatpush3.bf16.msra.mxu0 %v6611_v2 }
 0x4f8   :  { %v6357_v48 = vpop.f32.mrf.mxu1  ;;  %6497 = vmatprep.subr.bf16.mxu0 %v6949_v0 }
 0x4f9   :  { %v5312_v49 = vadd.f32 %v6377_v46, %v5272_v47  ;;  %v6379_v50 = vpop.f32.mrf.mxu0 }
 0x4fb   :  { %6498 = vmatpush3.bf16.msra.mxu0 %v6612_v16 }
 0x51e   :  { %v6397_v51 = vpop.f32.mrf.mxu1 }
 0x520   :  { %v6398_v8 = vpop.f32.mrf.mxu1 }
 0x521   :  { %v6399_v63 = vadd.f32 %v6398_v8, %v6397_v51 }
 0x522   :  { %v6400_v53 = vpop.f32.mrf.mxu1 }
 0x523   :  { %v5352_v35 = vadd.f32 %v6399_v63, %v5312_v49 }
 0x524   :  { %v6401_v55 = vpop.f32.mrf.mxu1 }
 0x59e   :  { %v6419_v15 = vpop.f32.mrf.mxu0 }
 0x5a0   :  { %v6420_v3 = vpop.f32.mrf.mxu0 }
 0x5a1   :  { %v6421_v4 = vadd.f32 %v6420_v3, %v6419_v15 }
 0x5a2   :  { %v6422_v9 = vpop.f32.mrf.mxu0 }
 0x5a3   :  { %v5392_v14 = vadd.f32 %v6421_v4, %v5352_v35 }
 0x5a4   :  { %v6423_v39 = vpop.f32.mrf.mxu0 }
 0x5a5   :  { %v5397_v30 = vmax.f32 %v5392_v14, 0.0 }
 0x5a7   :  { %v5398_v29 = vpack.c.bf16 %v5397_v30, %v5397_v30 }
 0x5a9   :  { %6480 = vmatmul.mubr.bf16.vlgmr.msra.gmra.mxu1 %v5398_v29 }
 0x669   :  { %v5504_v13 = vpop.f32.mrf.mxu1 }
 0x66a   :  { %v5505_v19 = vadd.f32 %v6310_v17, %v5504_v13 }
 0x66b   :  { %v6481_v10 = vpop.f32.mrf.mxu1 }
 0x66c   :  { %v5510_v32 = vmax.f32 %v5505_v19, 0.0 }
 0x66d   :  { %v5507_v21 = vpop.f32.mrf.mxu1 }
 0x66e   :  { %v5512_v22 = vpack.c.bf16 %v5510_v32, %v5510_v32  ;;  %5511 = vst [vmem:[#allocation24] sm:$0xff] %v5510_v32 }
 0x66f   :  { %v6482_v58 = vpop.f32.mrf.mxu1 }
 0x670   :  { %6500 = vmatmul.mubr.bf16.vlgmr.msra.gmra.mxu0 %v5512_v22 }
 0x671   :  { %6885 = shalt.err (!%p6882_p13)
}
 0x672   :  { %5644 = dma.vmem_to_hbm [thread:$0]  %s5642_s12, 128, %s7315_s14, [#allocation25]   ;;  %v6319_v0 = vld [vmem:[#allocation22] ss:$0 sm:$0xff] }
 0x673   :  { %s6953_s26 = smov [#allocation23]  }
 0x674   :  { %s5631_s0 = sshll.u32 %s6953_s26, 4  ;;  %s5632_s0 = int_to_ptr.vmem [resolvable:$true] %s5631_s0 }
 0x675   :  { %s6894_s5 = scalar_lea.vmem %s5632_s0, 128  ;;  %p6899_p1 = scmp.lt.s32.totalorder %s5632_s0, %s5632_s0 }
 0x676   :  { %p6895_p0 = scmp.ne.s32.totalorder %s5632_s0, %s6894_s5  ;;  %p6900_p2 = scmp.lt.s32.totalorder %s6894_s5, %s6894_s5 }
 0x678   :  { %p6901_p3 = por %p6900_p2, %p6899_p1 }
 0x67a   :  { %p6902_p4 = pnand %p6901_p3, %p6895_p0 }
 0x730   :  { %v5618_v62 = vpop.f32.mrf.mxu0 }
 0x731   :  { %v5619_v25 = vadd.f32 %v6319_v0, %v5618_v62 }
 0x732   :  { %v6501_v57 = vpop.f32.mrf.mxu0 }
 0x733   :  { %5624 = vst [vmem:[#allocation23] sm:$0xff] %v5619_v25 }
 0x734   :  { %v5621_v6 = vpop.f32.mrf.mxu0 }
 0x735   :  { %6905 = shalt.err (!%p6902_p4)
}
 0x736   :  { %5634 = dma.vmem_to_hbm [thread:$0]  %s5632_s0, 128, %s7314_s13, [#allocation4]   ;;  %v6502_v59 = vpop.f32.mrf.mxu0 }
 0x737   :  { %6928 = dma.done.wait [#allocation4], 128  }
 0x738   :  { %6929 = vsyncadd [#allocation4], 4294967168 }
 0x739   :  { %6930 = dma.done.wait [#allocation25], 128  }
 0x73a   :  { %6931 = vsyncadd [#allocation25], 4294967168 }
 0x73b   :  { %5651 = vsyncpa [#allocation3], 1 }
 0x73c   :  { %5652 = vsyncpa [#allocation6], 1 }
 0x73d   :  { %5653 = vsyncpa [#allocation9], 1 }
 0x73e   :  { %5654 = vsyncpa [#allocation12], 1 }
 0x73f   :  { %5655 = vsyncpa [#allocation15], 1 }
 0x740   :  { %5656 = vsyncpa [#allocation18], 1 }
 0x741   :  { %5657 = vsyncpa [#allocation21], 1 }
 0x742   :  { %5658 = vsyncpa [#allocation4], 1 }
 0x743   :  { %5659 = vsyncpa [#allocation25], 1 }

</bundles_post_ra>
